<compile_context>
chip_gen: v7x
topology: tpu7x:2x2x1
jax: 0.10.0
libtpu: 0.0.40
codegen_flags: <defaults>
</compile_context>

<pallas_src>
import jax
import jax.numpy as jnp
from jax.experimental import pallas as pl
from jax.experimental.pallas import tpu as pltpu

EPS = 1e-5


# ---------------------------------------------------------------------------
# Fused Pallas kernel (whole network, one image per grid step)
# ---------------------------------------------------------------------------

def _patch_cnn_kernel(x_ref,
                      w1_ref, cb1_ref, s1_ref, t1_ref,
                      w2_ref, cb2_ref, s2_ref, t2_ref,
                      w3_ref, cb3_ref, s3_ref, t3_ref,
                      fw1_ref, fb1_ref, fw2_ref, fb2_ref,
                      o_ref,
                      pad2_ref, pad3_ref):

    def conv3x3_relu(read_tap, w_ref, cb_ref, h, w, cin, cout):
        # 3x3 'same' conv as 9 accumulated MXU dots over shifted windows
        # (in-kernel im2col; bf16 operands, f32 accumulation).
        acc = jnp.zeros((h * w, cout), jnp.float32)
        for t in range(9):
            di, dj = t // 3, t % 3
            tap = read_tap(di, dj).reshape(h * w, cin).astype(jnp.bfloat16)
            acc = acc + jnp.dot(tap, w_ref[t], preferred_element_type=jnp.float32)
        return jnp.maximum(acc + cb_ref[...], 0.0)              # (h*w, cout) f32

    def pool2x2_bn(y, h, w, c, s_ref, t_ref):
        # y: (h*w, c), rows in row-major (h, w) order.
        m = jnp.max(y.reshape(h * w // 2, 2, c), axis=1)        # max over w-pairs
        m = m.reshape(h // 2, 2, w // 2, c)
        m = jnp.maximum(m[:, 0], m[:, 1])                       # max over h-pairs
        return m * s_ref[...] + t_ref[...]                      # eval-mode BN (scale/shift)

    # ---- stage 1: Conv(3->16) + ReLU + MaxPool(2,2) + BN ----------------------
    y = conv3x3_relu(lambda di, dj: x_ref[0, di:di + 16, dj:dj + 16, :],
                     w1_ref, cb1_ref, 16, 16, 3, 16)
    p = pool2x2_bn(y, 16, 16, 16, s1_ref, t1_ref)               # (8, 8, 16)
    pad2_ref[...] = jnp.zeros(pad2_ref.shape, pad2_ref.dtype)   # zero border for next conv
    pad2_ref[1:9, 1:9, :] = p

    # ---- stage 2: Conv(16->32) + ReLU + MaxPool(2,2) + BN ---------------------
    y = conv3x3_relu(lambda di, dj: pad2_ref[di:di + 8, dj:dj + 8, :],
                     w2_ref, cb2_ref, 8, 8, 16, 32)
    p = pool2x2_bn(y, 8, 8, 32, s2_ref, t2_ref)                 # (4, 4, 32)
    pad3_ref[...] = jnp.zeros(pad3_ref.shape, pad3_ref.dtype)
    pad3_ref[1:5, 1:5, :] = p

    # ---- stage 3: Conv(32->64) + ReLU + MaxPool(2,2) + BN ---------------------
    y = conv3x3_relu(lambda di, dj: pad3_ref[di:di + 4, dj:dj + 4, :],
                     w3_ref, cb3_ref, 4, 4, 32, 64)
    p3 = pool2x2_bn(y, 4, 4, 64, s3_ref, t3_ref)                # (2, 2, 64) f32

    # ---- head: (Dropout = id) Flatten -> Linear(256,10) -> ReLU
    #            -> (Dropout = id) -> Linear(10,1) -> Sigmoid ---------------------
    # fc1 rows were permuted on the host into per-(h,w) 64x10 blocks so the
    # NHWC-ordered pooled activations can be consumed directly.
    hacc = jnp.zeros((1, 10), jnp.float32)
    for idx in range(4):                                        # idx = h*2 + w
        hh, ww = idx // 2, idx % 2
        row = p3[hh, ww:ww + 1, :].astype(jnp.bfloat16)         # (1, 64)
        hacc = hacc + jnp.dot(row, fw1_ref[idx], preferred_element_type=jnp.float32)
    hvec = jnp.maximum(hacc + fb1_ref[...], 0.0)                # (1, 10)
    z = jnp.dot(hvec.astype(jnp.bfloat16), fw2_ref[...],
                preferred_element_type=jnp.float32) + fb2_ref[...]
    o_ref[0] = jax.nn.sigmoid(z)                                # (1, 1)


# ---------------------------------------------------------------------------
# Host-side parameter prep + wrapper
# ---------------------------------------------------------------------------

def _bn_scale_shift(gamma, beta, mean, var):
    scale = gamma * jax.lax.rsqrt(var + EPS)
    shift = beta - mean * scale
    return scale.reshape(1, -1), shift.reshape(1, -1)


def _conv_taps(w_oihw):
    """torch (Cout, Cin, 3, 3) -> (9, Cin, Cout) bf16, tap index t = kh*3 + kw."""
    cout, cin = w_oihw.shape[0], w_oihw.shape[1]
    return jnp.transpose(w_oihw, (2, 3, 1, 0)).reshape(9, cin, cout).astype(jnp.bfloat16)


@jax.jit
def patch_cnn_forward(x_nchw, params):
    B = x_nchw.shape[0]
    # NCHW -> NHWC, zero-pad H/W by 1 for the first 'same' conv.
    x = jnp.transpose(x_nchw, (0, 2, 3, 1)).astype(jnp.float32)
    xpad = jnp.pad(x, ((0, 0), (1, 1), (1, 1), (0, 0)))

    # Tiny host/XLA-side parameter massaging (done once per call, fused by XLA).
    w1 = _conv_taps(params["conv0_w"]); cb1 = params["conv0_b"].reshape(1, -1)
    w2 = _conv_taps(params["conv1_w"]); cb2 = params["conv1_b"].reshape(1, -1)
    w3 = _conv_taps(params["conv2_w"]); cb3 = params["conv2_b"].reshape(1, -1)
    s1, t1 = _bn_scale_shift(params["bn0_gamma"], params["bn0_beta"],
                             params["bn0_mean"], params["bn0_var"])
    s2, t2 = _bn_scale_shift(params["bn1_gamma"], params["bn1_beta"],
                             params["bn1_mean"], params["bn1_var"])
    s3, t3 = _bn_scale_shift(params["bn2_gamma"], params["bn2_beta"],
                             params["bn2_mean"], params["bn2_var"])
    # torch fc1 weight (10, 256) acts on NCHW-flattened features (c*4 + h*2 + w);
    # permute its rows into per-(h, w) blocks of shape (64, 10).
    fw1 = (params["fc1_w"].T.reshape(64, 4, 10)
           .transpose(1, 0, 2).astype(jnp.bfloat16))            # (4, 64, 10)
    fb1 = params["fc1_b"].reshape(1, -1)
    fw2 = params["fc2_w"].T.astype(jnp.bfloat16)                # (10, 1)
    fb2 = params["fc2_b"].reshape(1, -1)

    def _full(shape):
        zeros = (0,) * len(shape)
        return pl.BlockSpec(shape, lambda b, _z=zeros: _z)

    in_specs = [
        pl.BlockSpec((1, 18, 18, 3), lambda b: (b, 0, 0, 0)),   # one padded image / step
        _full((9, 3, 16)), _full((1, 16)), _full((1, 16)), _full((1, 16)),
        _full((9, 16, 32)), _full((1, 32)), _full((1, 32)), _full((1, 32)),
        _full((9, 32, 64)), _full((1, 64)), _full((1, 64)), _full((1, 64)),
        _full((4, 64, 10)), _full((1, 10)), _full((10, 1)), _full((1, 1)),
    ]

    out = pl.pallas_call(
        _patch_cnn_kernel,
        out_shape=jax.ShapeDtypeStruct((B, 1, 1), jnp.float32),
        grid_spec=pltpu.PrefetchScalarGridSpec(
            num_scalar_prefetch=0,
            grid=(B,),
            in_specs=in_specs,
            out_specs=pl.BlockSpec((1, 1, 1), lambda b: (b, 0, 0)),
            scratch_shapes=[pltpu.VMEM((10, 10, 16), jnp.float32),   # padded stage-2 input
                            pltpu.VMEM((6, 6, 32), jnp.float32)],    # padded stage-3 input
        ),
        compiler_params=pltpu.CompilerParams(
            dimension_semantics=("parallel",)),
    )(xpad, w1, cb1, s1, t1, w2, cb2, s2, t2, w3, cb3, s3, t3, fw1, fb1, fw2, fb2)
    return out.reshape(B, 1)


# ---------------------------------------------------------------------------
# Deterministic synthetic parameters (torch layouts) + pure-JAX reference
# ---------------------------------------------------------------------------

def init_params(key):
    ks = jax.random.split(key, 24)
    p = {}
    k = 0
    for i, (cout, cin) in enumerate([(16, 3), (32, 16), (64, 32)]):
        fan_in = cin * 9
        p[f"conv{i}_w"] = (jax.random.normal(ks[k], (cout, cin, 3, 3), jnp.float32)
                           / jnp.sqrt(fan_in)); k += 1
        p[f"conv{i}_b"] = 0.02 * jax.random.normal(ks[k], (cout,), jnp.float32); k += 1
        # eval-mode BatchNorm2d affine + running stats (non-trivial to exercise the path)
        p[f"bn{i}_gamma"] = 1.0 + 0.2 * jax.random.normal(ks[k], (cout,), jnp.float32); k += 1
        p[f"bn{i}_beta"] = 0.1 * jax.random.normal(ks[k], (cout,), jnp.float32); k += 1
        p[f"bn{i}_mean"] = 0.1 * jax.random.normal(ks[k], (cout,), jnp.float32); k += 1
        p[f"bn{i}_var"] = jax.random.uniform(ks[k], (cout,), jnp.float32, 0.5, 1.5); k += 1
    p["fc1_w"] = jax.random.normal(ks[k], (10, 256), jnp.float32) / 16.0; k += 1
    p["fc1_b"] = 0.05 * jax.random.normal(ks[k], (10,), jnp.float32); k += 1
    p["fc2_w"] = 0.3 * jax.random.normal(ks[k], (1, 10), jnp.float32); k += 1
    p["fc2_b"] = jnp.zeros((1,), jnp.float32)
    return p


def reference_forward(x_nchw, params):
    """Pure-JAX (high precision) mirror of the PyTorch module in eval mode."""
    hp = jax.lax.Precision.HIGHEST
    x = x_nchw.astype(jnp.float32)
    for i in range(3):
        x = jax.lax.conv_general_dilated(
            x, params[f"conv{i}_w"], window_strides=(1, 1), padding="SAME",
            dimension_numbers=("NCHW", "OIHW", "NCHW"), precision=hp)
        x = jnp.maximum(x + params[f"conv{i}_b"].reshape(1, -1, 1, 1), 0.0)
        x = jax.lax.reduce_window(x, -jnp.inf, jax.lax.max,
                                  (1, 1, 2, 2), (1, 1, 2, 2), "VALID")
        scale = params[f"bn{i}_gamma"] * jax.lax.rsqrt(params[f"bn{i}_var"] + EPS)
        shift = params[f"bn{i}_beta"] - params[f"bn{i}_mean"] * scale
        x = x * scale.reshape(1, -1, 1, 1) + shift.reshape(1, -1, 1, 1)
    xf = x.reshape(x.shape[0], -1)                              # torch NCHW flatten
    h = jnp.maximum(jnp.dot(xf, params["fc1_w"].T, precision=hp) + params["fc1_b"], 0.0)
    z = jnp.dot(h, params["fc2_w"].T, precision=hp) + params["fc2_b"]
    return jax.nn.sigmoid(z)


# ---------------------------------------------------------------------------
# Main
# ---------------------------------------------------------------------------

if __name__ == "__main__":
    key = jax.random.PRNGKey(0)
    k_x, k_p = jax.random.split(key)
    # Linear(256, 10) after three 2x pools of a 64-channel map => 16x16, 3-channel input.
    x = jax.random.normal(k_x, (2, 3, 16, 16), jnp.float32)
    params = init_params(k_p)

    out = jax.block_until_ready(patch_cnn_forward(x, params))
    ref = jax.block_until_ready(reference_forward(x, params))

    assert out.shape == (2, 1), out.shape
    assert bool(jnp.all((out >= 0.0) & (out <= 1.0)))
    max_err = float(jnp.max(jnp.abs(out - ref)))
    assert max_err < 0.08, f"mismatch vs reference: {max_err}"
    print("KERNEL_OK")
</pallas_src>

<mosaic_0001>
module attributes {stable_mosaic.version = 11 : i64} {
  func.func @_patch_cnn_kernel(%arg0: i32, %arg1: memref<1x18x18x3xf32, #tpu.memory_space<vmem>>, %arg2: memref<9x3x16xbf16, #tpu.memory_space<vmem>>, %arg3: memref<1x16xf32, #tpu.memory_space<vmem>>, %arg4: memref<1x16xf32, #tpu.memory_space<vmem>>, %arg5: memref<1x16xf32, #tpu.memory_space<vmem>>, %arg6: memref<9x16x32xbf16, #tpu.memory_space<vmem>>, %arg7: memref<1x32xf32, #tpu.memory_space<vmem>>, %arg8: memref<1x32xf32, #tpu.memory_space<vmem>>, %arg9: memref<1x32xf32, #tpu.memory_space<vmem>>, %arg10: memref<9x32x64xbf16, #tpu.memory_space<vmem>>, %arg11: memref<1x64xf32, #tpu.memory_space<vmem>>, %arg12: memref<1x64xf32, #tpu.memory_space<vmem>>, %arg13: memref<1x64xf32, #tpu.memory_space<vmem>>, %arg14: memref<4x64x10xbf16, #tpu.memory_space<vmem>>, %arg15: memref<1x10xf32, #tpu.memory_space<vmem>>, %arg16: memref<10x1xbf16, #tpu.memory_space<vmem>>, %arg17: memref<1x1xf32, #tpu.memory_space<vmem>>, %arg18: memref<1x1x1xf32, #tpu.memory_space<vmem>>, %arg19: memref<10x10x16xf32, #tpu.memory_space<vmem>>, %arg20: memref<6x6x32xf32, #tpu.memory_space<vmem>>) attributes {dimension_semantics = [#tpu.dimension_semantics<parallel>], iteration_bounds = array<i64: 2>, scalar_prefetch = 0 : i64, scratch_operands = 2 : i64, tpu.core_type = #tpu.core_type<tc>, window_params = [{transform_indices = @transform_0, window_bounds = array<i64: 1, 18, 18, 3>}, {pipeline_mode = #tpu.pipeline_mode<synchronous>, transform_indices = @transform_1, window_bounds = array<i64: 9, 3, 16>}, {pipeline_mode = #tpu.pipeline_mode<synchronous>, transform_indices = @transform_2, window_bounds = array<i64: 1, 16>}, {pipeline_mode = #tpu.pipeline_mode<synchronous>, transform_indices = @transform_3, window_bounds = array<i64: 1, 16>}, {pipeline_mode = #tpu.pipeline_mode<synchronous>, transform_indices = @transform_4, window_bounds = array<i64: 1, 16>}, {pipeline_mode = #tpu.pipeline_mode<synchronous>, transform_indices = @transform_5, window_bounds = array<i64: 9, 16, 32>}, {pipeline_mode = #tpu.pipeline_mode<synchronous>, transform_indices = @transform_6, window_bounds = array<i64: 1, 32>}, {pipeline_mode = #tpu.pipeline_mode<synchronous>, transform_indices = @transform_7, window_bounds = array<i64: 1, 32>}, {pipeline_mode = #tpu.pipeline_mode<synchronous>, transform_indices = @transform_8, window_bounds = array<i64: 1, 32>}, {pipeline_mode = #tpu.pipeline_mode<synchronous>, transform_indices = @transform_9, window_bounds = array<i64: 9, 32, 64>}, {pipeline_mode = #tpu.pipeline_mode<synchronous>, transform_indices = @transform_10, window_bounds = array<i64: 1, 64>}, {pipeline_mode = #tpu.pipeline_mode<synchronous>, transform_indices = @transform_11, window_bounds = array<i64: 1, 64>}, {pipeline_mode = #tpu.pipeline_mode<synchronous>, transform_indices = @transform_12, window_bounds = array<i64: 1, 64>}, {pipeline_mode = #tpu.pipeline_mode<synchronous>, transform_indices = @transform_13, window_bounds = array<i64: 4, 64, 10>}, {pipeline_mode = #tpu.pipeline_mode<synchronous>, transform_indices = @transform_14, window_bounds = array<i64: 1, 10>}, {pipeline_mode = #tpu.pipeline_mode<synchronous>, transform_indices = @transform_15, window_bounds = array<i64: 10, 1>}, {pipeline_mode = #tpu.pipeline_mode<synchronous>, transform_indices = @transform_16, window_bounds = array<i64: 1, 1>}, {transform_indices = @transform_17, window_bounds = array<i64: 1, 1, 1>}]} {
    %cst = arith.constant 0.000000e+00 : f32
    %0 = vector.broadcast %cst : f32 to vector<256x16xf32>
    %c0 = arith.constant 0 : index
    %c0_0 = arith.constant 0 : index
    %c0_1 = arith.constant 0 : index
    %c0_2 = arith.constant 0 : index
    %1 = vector.load %arg1[%c0, %c0_0, %c0_1, %c0_2] : memref<1x18x18x3xf32, #tpu.memory_space<vmem>>, vector<1x16x16x3xf32>
    %2 = vector.shape_cast %1 : vector<1x16x16x3xf32> to vector<16x16x3xf32>
    %3 = vector.shape_cast %2 : vector<16x16x3xf32> to vector<256x3xf32>
    %4 = arith.truncf %3 : vector<256x3xf32> to vector<256x3xbf16>
    %c0_3 = arith.constant 0 : index
    %c0_4 = arith.constant 0 : index
    %c0_5 = arith.constant 0 : index
    %5 = vector.load %arg2[%c0_3, %c0_4, %c0_5] : memref<9x3x16xbf16, #tpu.memory_space<vmem>>, vector<1x3x16xbf16>
    %6 = vector.shape_cast %5 : vector<1x3x16xbf16> to vector<3x16xbf16>
    %cst_6 = arith.constant dense<0.000000e+00> : vector<256x16xf32>
    %7 = tpu.matmul %4, %6, %cst_6 {dimension_numbers = #tpu.dot_dimension_numbers<[1], [0], [0], [1], [0, 0, 1, 1], [], []>} : vector<256x3xbf16>, vector<3x16xbf16>, vector<256x16xf32> -> vector<256x16xf32>
    %8 = arith.addf %0, %7 : vector<256x16xf32>
    %c0_7 = arith.constant 0 : index
    %c0_8 = arith.constant 0 : index
    %c1 = arith.constant 1 : index
    %c0_9 = arith.constant 0 : index
    %9 = vector.load %arg1[%c0_7, %c0_8, %c1, %c0_9] : memref<1x18x18x3xf32, #tpu.memory_space<vmem>>, vector<1x16x16x3xf32>
    %10 = vector.shape_cast %9 : vector<1x16x16x3xf32> to vector<16x16x3xf32>
    %11 = vector.shape_cast %10 : vector<16x16x3xf32> to vector<256x3xf32>
    %12 = arith.truncf %11 : vector<256x3xf32> to vector<256x3xbf16>
    %c1_10 = arith.constant 1 : index
    %c0_11 = arith.constant 0 : index
    %c0_12 = arith.constant 0 : index
    %13 = vector.load %arg2[%c1_10, %c0_11, %c0_12] : memref<9x3x16xbf16, #tpu.memory_space<vmem>>, vector<1x3x16xbf16>
    %14 = vector.shape_cast %13 : vector<1x3x16xbf16> to vector<3x16xbf16>
    %cst_13 = arith.constant dense<0.000000e+00> : vector<256x16xf32>
    %15 = tpu.matmul %12, %14, %cst_13 {dimension_numbers = #tpu.dot_dimension_numbers<[1], [0], [0], [1], [0, 0, 1, 1], [], []>} : vector<256x3xbf16>, vector<3x16xbf16>, vector<256x16xf32> -> vector<256x16xf32>
    %16 = arith.addf %8, %15 : vector<256x16xf32>
    %c0_14 = arith.constant 0 : index
    %c0_15 = arith.constant 0 : index
    %c2 = arith.constant 2 : index
    %c0_16 = arith.constant 0 : index
    %17 = vector.load %arg1[%c0_14, %c0_15, %c2, %c0_16] : memref<1x18x18x3xf32, #tpu.memory_space<vmem>>, vector<1x16x16x3xf32>
    %18 = vector.shape_cast %17 : vector<1x16x16x3xf32> to vector<16x16x3xf32>
    %19 = vector.shape_cast %18 : vector<16x16x3xf32> to vector<256x3xf32>
    %20 = arith.truncf %19 : vector<256x3xf32> to vector<256x3xbf16>
    %c2_17 = arith.constant 2 : index
    %c0_18 = arith.constant 0 : index
    %c0_19 = arith.constant 0 : index
    %21 = vector.load %arg2[%c2_17, %c0_18, %c0_19] : memref<9x3x16xbf16, #tpu.memory_space<vmem>>, vector<1x3x16xbf16>
    %22 = vector.shape_cast %21 : vector<1x3x16xbf16> to vector<3x16xbf16>
    %cst_20 = arith.constant dense<0.000000e+00> : vector<256x16xf32>
    %23 = tpu.matmul %20, %22, %cst_20 {dimension_numbers = #tpu.dot_dimension_numbers<[1], [0], [0], [1], [0, 0, 1, 1], [], []>} : vector<256x3xbf16>, vector<3x16xbf16>, vector<256x16xf32> -> vector<256x16xf32>
    %24 = arith.addf %16, %23 : vector<256x16xf32>
    %c0_21 = arith.constant 0 : index
    %c1_22 = arith.constant 1 : index
    %c0_23 = arith.constant 0 : index
    %c0_24 = arith.constant 0 : index
    %25 = vector.load %arg1[%c0_21, %c1_22, %c0_23, %c0_24] : memref<1x18x18x3xf32, #tpu.memory_space<vmem>>, vector<1x16x16x3xf32>
    %26 = vector.shape_cast %25 : vector<1x16x16x3xf32> to vector<16x16x3xf32>
    %27 = vector.shape_cast %26 : vector<16x16x3xf32> to vector<256x3xf32>
    %28 = arith.truncf %27 : vector<256x3xf32> to vector<256x3xbf16>
    %c3 = arith.constant 3 : index
    %c0_25 = arith.constant 0 : index
    %c0_26 = arith.constant 0 : index
    %29 = vector.load %arg2[%c3, %c0_25, %c0_26] : memref<9x3x16xbf16, #tpu.memory_space<vmem>>, vector<1x3x16xbf16>
    %30 = vector.shape_cast %29 : vector<1x3x16xbf16> to vector<3x16xbf16>
    %cst_27 = arith.constant dense<0.000000e+00> : vector<256x16xf32>
    %31 = tpu.matmul %28, %30, %cst_27 {dimension_numbers = #tpu.dot_dimension_numbers<[1], [0], [0], [1], [0, 0, 1, 1], [], []>} : vector<256x3xbf16>, vector<3x16xbf16>, vector<256x16xf32> -> vector<256x16xf32>
    %32 = arith.addf %24, %31 : vector<256x16xf32>
    %c0_28 = arith.constant 0 : index
    %c1_29 = arith.constant 1 : index
    %c1_30 = arith.constant 1 : index
    %c0_31 = arith.constant 0 : index
    %33 = vector.load %arg1[%c0_28, %c1_29, %c1_30, %c0_31] : memref<1x18x18x3xf32, #tpu.memory_space<vmem>>, vector<1x16x16x3xf32>
    %34 = vector.shape_cast %33 : vector<1x16x16x3xf32> to vector<16x16x3xf32>
    %35 = vector.shape_cast %34 : vector<16x16x3xf32> to vector<256x3xf32>
    %36 = arith.truncf %35 : vector<256x3xf32> to vector<256x3xbf16>
    %c4 = arith.constant 4 : index
    %c0_32 = arith.constant 0 : index
    %c0_33 = arith.constant 0 : index
    %37 = vector.load %arg2[%c4, %c0_32, %c0_33] : memref<9x3x16xbf16, #tpu.memory_space<vmem>>, vector<1x3x16xbf16>
    %38 = vector.shape_cast %37 : vector<1x3x16xbf16> to vector<3x16xbf16>
    %cst_34 = arith.constant dense<0.000000e+00> : vector<256x16xf32>
    %39 = tpu.matmul %36, %38, %cst_34 {dimension_numbers = #tpu.dot_dimension_numbers<[1], [0], [0], [1], [0, 0, 1, 1], [], []>} : vector<256x3xbf16>, vector<3x16xbf16>, vector<256x16xf32> -> vector<256x16xf32>
    %40 = arith.addf %32, %39 : vector<256x16xf32>
    %c0_35 = arith.constant 0 : index
    %c1_36 = arith.constant 1 : index
    %c2_37 = arith.constant 2 : index
    %c0_38 = arith.constant 0 : index
    %41 = vector.load %arg1[%c0_35, %c1_36, %c2_37, %c0_38] : memref<1x18x18x3xf32, #tpu.memory_space<vmem>>, vector<1x16x16x3xf32>
    %42 = vector.shape_cast %41 : vector<1x16x16x3xf32> to vector<16x16x3xf32>
    %43 = vector.shape_cast %42 : vector<16x16x3xf32> to vector<256x3xf32>
    %44 = arith.truncf %43 : vector<256x3xf32> to vector<256x3xbf16>
    %c5 = arith.constant 5 : index
    %c0_39 = arith.constant 0 : index
    %c0_40 = arith.constant 0 : index
    %45 = vector.load %arg2[%c5, %c0_39, %c0_40] : memref<9x3x16xbf16, #tpu.memory_space<vmem>>, vector<1x3x16xbf16>
    %46 = vector.shape_cast %45 : vector<1x3x16xbf16> to vector<3x16xbf16>
    %cst_41 = arith.constant dense<0.000000e+00> : vector<256x16xf32>
    %47 = tpu.matmul %44, %46, %cst_41 {dimension_numbers = #tpu.dot_dimension_numbers<[1], [0], [0], [1], [0, 0, 1, 1], [], []>} : vector<256x3xbf16>, vector<3x16xbf16>, vector<256x16xf32> -> vector<256x16xf32>
    %48 = arith.addf %40, %47 : vector<256x16xf32>
    %c0_42 = arith.constant 0 : index
    %c2_43 = arith.constant 2 : index
    %c0_44 = arith.constant 0 : index
    %c0_45 = arith.constant 0 : index
    %49 = vector.load %arg1[%c0_42, %c2_43, %c0_44, %c0_45] : memref<1x18x18x3xf32, #tpu.memory_space<vmem>>, vector<1x16x16x3xf32>
    %50 = vector.shape_cast %49 : vector<1x16x16x3xf32> to vector<16x16x3xf32>
    %51 = vector.shape_cast %50 : vector<16x16x3xf32> to vector<256x3xf32>
    %52 = arith.truncf %51 : vector<256x3xf32> to vector<256x3xbf16>
    %c6 = arith.constant 6 : index
    %c0_46 = arith.constant 0 : index
    %c0_47 = arith.constant 0 : index
    %53 = vector.load %arg2[%c6, %c0_46, %c0_47] : memref<9x3x16xbf16, #tpu.memory_space<vmem>>, vector<1x3x16xbf16>
    %54 = vector.shape_cast %53 : vector<1x3x16xbf16> to vector<3x16xbf16>
    %cst_48 = arith.constant dense<0.000000e+00> : vector<256x16xf32>
    %55 = tpu.matmul %52, %54, %cst_48 {dimension_numbers = #tpu.dot_dimension_numbers<[1], [0], [0], [1], [0, 0, 1, 1], [], []>} : vector<256x3xbf16>, vector<3x16xbf16>, vector<256x16xf32> -> vector<256x16xf32>
    %56 = arith.addf %48, %55 : vector<256x16xf32>
    %c0_49 = arith.constant 0 : index
    %c2_50 = arith.constant 2 : index
    %c1_51 = arith.constant 1 : index
    %c0_52 = arith.constant 0 : index
    %57 = vector.load %arg1[%c0_49, %c2_50, %c1_51, %c0_52] : memref<1x18x18x3xf32, #tpu.memory_space<vmem>>, vector<1x16x16x3xf32>
    %58 = vector.shape_cast %57 : vector<1x16x16x3xf32> to vector<16x16x3xf32>
    %59 = vector.shape_cast %58 : vector<16x16x3xf32> to vector<256x3xf32>
    %60 = arith.truncf %59 : vector<256x3xf32> to vector<256x3xbf16>
    %c7 = arith.constant 7 : index
    %c0_53 = arith.constant 0 : index
    %c0_54 = arith.constant 0 : index
    %61 = vector.load %arg2[%c7, %c0_53, %c0_54] : memref<9x3x16xbf16, #tpu.memory_space<vmem>>, vector<1x3x16xbf16>
    %62 = vector.shape_cast %61 : vector<1x3x16xbf16> to vector<3x16xbf16>
    %cst_55 = arith.constant dense<0.000000e+00> : vector<256x16xf32>
    %63 = tpu.matmul %60, %62, %cst_55 {dimension_numbers = #tpu.dot_dimension_numbers<[1], [0], [0], [1], [0, 0, 1, 1], [], []>} : vector<256x3xbf16>, vector<3x16xbf16>, vector<256x16xf32> -> vector<256x16xf32>
    %64 = arith.addf %56, %63 : vector<256x16xf32>
    %c0_56 = arith.constant 0 : index
    %c2_57 = arith.constant 2 : index
    %c2_58 = arith.constant 2 : index
    %c0_59 = arith.constant 0 : index
    %65 = vector.load %arg1[%c0_56, %c2_57, %c2_58, %c0_59] : memref<1x18x18x3xf32, #tpu.memory_space<vmem>>, vector<1x16x16x3xf32>
    %66 = vector.shape_cast %65 : vector<1x16x16x3xf32> to vector<16x16x3xf32>
    %67 = vector.shape_cast %66 : vector<16x16x3xf32> to vector<256x3xf32>
    %68 = arith.truncf %67 : vector<256x3xf32> to vector<256x3xbf16>
    %c8 = arith.constant 8 : index
    %c0_60 = arith.constant 0 : index
    %c0_61 = arith.constant 0 : index
    %69 = vector.load %arg2[%c8, %c0_60, %c0_61] : memref<9x3x16xbf16, #tpu.memory_space<vmem>>, vector<1x3x16xbf16>
    %70 = vector.shape_cast %69 : vector<1x3x16xbf16> to vector<3x16xbf16>
    %cst_62 = arith.constant dense<0.000000e+00> : vector<256x16xf32>
    %71 = tpu.matmul %68, %70, %cst_62 {dimension_numbers = #tpu.dot_dimension_numbers<[1], [0], [0], [1], [0, 0, 1, 1], [], []>} : vector<256x3xbf16>, vector<3x16xbf16>, vector<256x16xf32> -> vector<256x16xf32>
    %72 = arith.addf %64, %71 : vector<256x16xf32>
    %c0_63 = arith.constant 0 : index
    %c0_64 = arith.constant 0 : index
    %73 = vector.load %arg3[%c0_63, %c0_64] : memref<1x16xf32, #tpu.memory_space<vmem>>, vector<1x16xf32>
    %74 = vector.broadcast %73 : vector<1x16xf32> to vector<256x16xf32>
    %75 = arith.addf %72, %74 : vector<256x16xf32>
    %cst_65 = arith.constant 0.000000e+00 : f32
    %76 = vector.broadcast %cst_65 : f32 to vector<256x16xf32>
    %77 = arith.maximumf %75, %76 : vector<256x16xf32>
    %78 = vector.shape_cast %77 : vector<256x16xf32> to vector<128x2x16xf32>
    %cst_66 = arith.constant dense<0xFF800000> : vector<128x16xf32>
    %79 = vector.multi_reduction <maximumf>, %78, %cst_66 [1] : vector<128x2x16xf32> to vector<128x16xf32>
    %80 = vector.shape_cast %79 : vector<128x16xf32> to vector<8x2x8x16xf32>
    %81 = vector.extract_strided_slice %80 {offsets = [0, 0, 0, 0], sizes = [8, 1, 8, 16], strides = [1, 1, 1, 1]} : vector<8x2x8x16xf32> to vector<8x1x8x16xf32>
    %82 = vector.shape_cast %81 : vector<8x1x8x16xf32> to vector<8x8x16xf32>
    %83 = vector.extract_strided_slice %80 {offsets = [0, 1, 0, 0], sizes = [8, 1, 8, 16], strides = [1, 1, 1, 1]} : vector<8x2x8x16xf32> to vector<8x1x8x16xf32>
    %84 = vector.shape_cast %83 : vector<8x1x8x16xf32> to vector<8x8x16xf32>
    %85 = arith.maximumf %82, %84 : vector<8x8x16xf32>
    %c0_67 = arith.constant 0 : index
    %c0_68 = arith.constant 0 : index
    %86 = vector.load %arg4[%c0_67, %c0_68] : memref<1x16xf32, #tpu.memory_space<vmem>>, vector<1x16xf32>
    %87 = vector.shape_cast %86 : vector<1x16xf32> to vector<1x1x16xf32>
    %88 = vector.broadcast %87 : vector<1x1x16xf32> to vector<8x8x16xf32>
    %89 = arith.mulf %85, %88 : vector<8x8x16xf32>
    %c0_69 = arith.constant 0 : index
    %c0_70 = arith.constant 0 : index
    %90 = vector.load %arg5[%c0_69, %c0_70] : memref<1x16xf32, #tpu.memory_space<vmem>>, vector<1x16xf32>
    %91 = vector.shape_cast %90 : vector<1x16xf32> to vector<1x1x16xf32>
    %92 = vector.broadcast %91 : vector<1x1x16xf32> to vector<8x8x16xf32>
    %93 = arith.addf %89, %92 : vector<8x8x16xf32>
    %cst_71 = arith.constant 0.000000e+00 : f32
    %94 = vector.broadcast %cst_71 : f32 to vector<10x10x16xf32>
    %c0_72 = arith.constant 0 : index
    %c0_73 = arith.constant 0 : index
    %c0_74 = arith.constant 0 : index
    %95 = vector.load %arg19[%c0_72, %c0_73, %c0_74] : memref<10x10x16xf32, #tpu.memory_space<vmem>>, vector<10x10x16xf32>
    tpu.vector_store %arg19[%c0_72, %c0_73, %c0_74], %94 {strides = array<i32>} : memref<10x10x16xf32, #tpu.memory_space<vmem>>, vector<10x10x16xf32>,
    %c1_75 = arith.constant 1 : index
    %c1_76 = arith.constant 1 : index
    %c0_77 = arith.constant 0 : index
    %96 = vector.load %arg19[%c1_75, %c1_76, %c0_77] : memref<10x10x16xf32, #tpu.memory_space<vmem>>, vector<8x8x16xf32>
    tpu.vector_store %arg19[%c1_75, %c1_76, %c0_77], %93 {strides = array<i32>} : memref<10x10x16xf32, #tpu.memory_space<vmem>>, vector<8x8x16xf32>,
    %cst_78 = arith.constant 0.000000e+00 : f32
    %97 = vector.broadcast %cst_78 : f32 to vector<64x32xf32>
    %c0_79 = arith.constant 0 : index
    %c0_80 = arith.constant 0 : index
    %c0_81 = arith.constant 0 : index
    %98 = vector.load %arg19[%c0_79, %c0_80, %c0_81] : memref<10x10x16xf32, #tpu.memory_space<vmem>>, vector<8x8x16xf32>
    %99 = vector.shape_cast %98 : vector<8x8x16xf32> to vector<64x16xf32>
    %100 = arith.truncf %99 : vector<64x16xf32> to vector<64x16xbf16>
    %c0_82 = arith.constant 0 : index
    %c0_83 = arith.constant 0 : index
    %c0_84 = arith.constant 0 : index
    %101 = vector.load %arg6[%c0_82, %c0_83, %c0_84] : memref<9x16x32xbf16, #tpu.memory_space<vmem>>, vector<1x16x32xbf16>
    %102 = vector.shape_cast %101 : vector<1x16x32xbf16> to vector<16x32xbf16>
    %cst_85 = arith.constant dense<0.000000e+00> : vector<64x32xf32>
    %103 = tpu.matmul %100, %102, %cst_85 {dimension_numbers = #tpu.dot_dimension_numbers<[1], [0], [0], [1], [0, 0, 1, 1], [], []>} : vector<64x16xbf16>, vector<16x32xbf16>, vector<64x32xf32> -> vector<64x32xf32>
    %104 = arith.addf %97, %103 : vector<64x32xf32>
    %c0_86 = arith.constant 0 : index
    %c1_87 = arith.constant 1 : index
    %c0_88 = arith.constant 0 : index
    %105 = vector.load %arg19[%c0_86, %c1_87, %c0_88] : memref<10x10x16xf32, #tpu.memory_space<vmem>>, vector<8x8x16xf32>
    %106 = vector.shape_cast %105 : vector<8x8x16xf32> to vector<64x16xf32>
    %107 = arith.truncf %106 : vector<64x16xf32> to vector<64x16xbf16>
    %c1_89 = arith.constant 1 : index
    %c0_90 = arith.constant 0 : index
    %c0_91 = arith.constant 0 : index
    %108 = vector.load %arg6[%c1_89, %c0_90, %c0_91] : memref<9x16x32xbf16, #tpu.memory_space<vmem>>, vector<1x16x32xbf16>
    %109 = vector.shape_cast %108 : vector<1x16x32xbf16> to vector<16x32xbf16>
    %cst_92 = arith.constant dense<0.000000e+00> : vector<64x32xf32>
    %110 = tpu.matmul %107, %109, %cst_92 {dimension_numbers = #tpu.dot_dimension_numbers<[1], [0], [0], [1], [0, 0, 1, 1], [], []>} : vector<64x16xbf16>, vector<16x32xbf16>, vector<64x32xf32> -> vector<64x32xf32>
    %111 = arith.addf %104, %110 : vector<64x32xf32>
    %c0_93 = arith.constant 0 : index
    %c2_94 = arith.constant 2 : index
    %c0_95 = arith.constant 0 : index
    %112 = vector.load %arg19[%c0_93, %c2_94, %c0_95] : memref<10x10x16xf32, #tpu.memory_space<vmem>>, vector<8x8x16xf32>
    %113 = vector.shape_cast %112 : vector<8x8x16xf32> to vector<64x16xf32>
    %114 = arith.truncf %113 : vector<64x16xf32> to vector<64x16xbf16>
    %c2_96 = arith.constant 2 : index
    %c0_97 = arith.constant 0 : index
    %c0_98 = arith.constant 0 : index
    %115 = vector.load %arg6[%c2_96, %c0_97, %c0_98] : memref<9x16x32xbf16, #tpu.memory_space<vmem>>, vector<1x16x32xbf16>
    %116 = vector.shape_cast %115 : vector<1x16x32xbf16> to vector<16x32xbf16>
    %cst_99 = arith.constant dense<0.000000e+00> : vector<64x32xf32>
    %117 = tpu.matmul %114, %116, %cst_99 {dimension_numbers = #tpu.dot_dimension_numbers<[1], [0], [0], [1], [0, 0, 1, 1], [], []>} : vector<64x16xbf16>, vector<16x32xbf16>, vector<64x32xf32> -> vector<64x32xf32>
    %118 = arith.addf %111, %117 : vector<64x32xf32>
    %c1_100 = arith.constant 1 : index
    %c0_101 = arith.constant 0 : index
    %c0_102 = arith.constant 0 : index
    %119 = vector.load %arg19[%c1_100, %c0_101, %c0_102] : memref<10x10x16xf32, #tpu.memory_space<vmem>>, vector<8x8x16xf32>
    %120 = vector.shape_cast %119 : vector<8x8x16xf32> to vector<64x16xf32>
    %121 = arith.truncf %120 : vector<64x16xf32> to vector<64x16xbf16>
    %c3_103 = arith.constant 3 : index
    %c0_104 = arith.constant 0 : index
    %c0_105 = arith.constant 0 : index
    %122 = vector.load %arg6[%c3_103, %c0_104, %c0_105] : memref<9x16x32xbf16, #tpu.memory_space<vmem>>, vector<1x16x32xbf16>
    %123 = vector.shape_cast %122 : vector<1x16x32xbf16> to vector<16x32xbf16>
    %cst_106 = arith.constant dense<0.000000e+00> : vector<64x32xf32>
    %124 = tpu.matmul %121, %123, %cst_106 {dimension_numbers = #tpu.dot_dimension_numbers<[1], [0], [0], [1], [0, 0, 1, 1], [], []>} : vector<64x16xbf16>, vector<16x32xbf16>, vector<64x32xf32> -> vector<64x32xf32>
    %125 = arith.addf %118, %124 : vector<64x32xf32>
    %c1_107 = arith.constant 1 : index
    %c1_108 = arith.constant 1 : index
    %c0_109 = arith.constant 0 : index
    %126 = vector.load %arg19[%c1_107, %c1_108, %c0_109] : memref<10x10x16xf32, #tpu.memory_space<vmem>>, vector<8x8x16xf32>
    %127 = vector.shape_cast %126 : vector<8x8x16xf32> to vector<64x16xf32>
    %128 = arith.truncf %127 : vector<64x16xf32> to vector<64x16xbf16>
    %c4_110 = arith.constant 4 : index
    %c0_111 = arith.constant 0 : index
    %c0_112 = arith.constant 0 : index
    %129 = vector.load %arg6[%c4_110, %c0_111, %c0_112] : memref<9x16x32xbf16, #tpu.memory_space<vmem>>, vector<1x16x32xbf16>
    %130 = vector.shape_cast %129 : vector<1x16x32xbf16> to vector<16x32xbf16>
    %cst_113 = arith.constant dense<0.000000e+00> : vector<64x32xf32>
    %131 = tpu.matmul %128, %130, %cst_113 {dimension_numbers = #tpu.dot_dimension_numbers<[1], [0], [0], [1], [0, 0, 1, 1], [], []>} : vector<64x16xbf16>, vector<16x32xbf16>, vector<64x32xf32> -> vector<64x32xf32>
    %132 = arith.addf %125, %131 : vector<64x32xf32>
    %c1_114 = arith.constant 1 : index
    %c2_115 = arith.constant 2 : index
    %c0_116 = arith.constant 0 : index
    %133 = vector.load %arg19[%c1_114, %c2_115, %c0_116] : memref<10x10x16xf32, #tpu.memory_space<vmem>>, vector<8x8x16xf32>
    %134 = vector.shape_cast %133 : vector<8x8x16xf32> to vector<64x16xf32>
    %135 = arith.truncf %134 : vector<64x16xf32> to vector<64x16xbf16>
    %c5_117 = arith.constant 5 : index
    %c0_118 = arith.constant 0 : index
    %c0_119 = arith.constant 0 : index
    %136 = vector.load %arg6[%c5_117, %c0_118, %c0_119] : memref<9x16x32xbf16, #tpu.memory_space<vmem>>, vector<1x16x32xbf16>
    %137 = vector.shape_cast %136 : vector<1x16x32xbf16> to vector<16x32xbf16>
    %cst_120 = arith.constant dense<0.000000e+00> : vector<64x32xf32>
    %138 = tpu.matmul %135, %137, %cst_120 {dimension_numbers = #tpu.dot_dimension_numbers<[1], [0], [0], [1], [0, 0, 1, 1], [], []>} : vector<64x16xbf16>, vector<16x32xbf16>, vector<64x32xf32> -> vector<64x32xf32>
    %139 = arith.addf %132, %138 : vector<64x32xf32>
    %c2_121 = arith.constant 2 : index
    %c0_122 = arith.constant 0 : index
    %c0_123 = arith.constant 0 : index
    %140 = vector.load %arg19[%c2_121, %c0_122, %c0_123] : memref<10x10x16xf32, #tpu.memory_space<vmem>>, vector<8x8x16xf32>
    %141 = vector.shape_cast %140 : vector<8x8x16xf32> to vector<64x16xf32>
    %142 = arith.truncf %141 : vector<64x16xf32> to vector<64x16xbf16>
    %c6_124 = arith.constant 6 : index
    %c0_125 = arith.constant 0 : index
    %c0_126 = arith.constant 0 : index
    %143 = vector.load %arg6[%c6_124, %c0_125, %c0_126] : memref<9x16x32xbf16, #tpu.memory_space<vmem>>, vector<1x16x32xbf16>
    %144 = vector.shape_cast %143 : vector<1x16x32xbf16> to vector<16x32xbf16>
    %cst_127 = arith.constant dense<0.000000e+00> : vector<64x32xf32>
    %145 = tpu.matmul %142, %144, %cst_127 {dimension_numbers = #tpu.dot_dimension_numbers<[1], [0], [0], [1], [0, 0, 1, 1], [], []>} : vector<64x16xbf16>, vector<16x32xbf16>, vector<64x32xf32> -> vector<64x32xf32>
    %146 = arith.addf %139, %145 : vector<64x32xf32>
    %c2_128 = arith.constant 2 : index
    %c1_129 = arith.constant 1 : index
    %c0_130 = arith.constant 0 : index
    %147 = vector.load %arg19[%c2_128, %c1_129, %c0_130] : memref<10x10x16xf32, #tpu.memory_space<vmem>>, vector<8x8x16xf32>
    %148 = vector.shape_cast %147 : vector<8x8x16xf32> to vector<64x16xf32>
    %149 = arith.truncf %148 : vector<64x16xf32> to vector<64x16xbf16>
    %c7_131 = arith.constant 7 : index
    %c0_132 = arith.constant 0 : index
    %c0_133 = arith.constant 0 : index
    %150 = vector.load %arg6[%c7_131, %c0_132, %c0_133] : memref<9x16x32xbf16, #tpu.memory_space<vmem>>, vector<1x16x32xbf16>
    %151 = vector.shape_cast %150 : vector<1x16x32xbf16> to vector<16x32xbf16>
    %cst_134 = arith.constant dense<0.000000e+00> : vector<64x32xf32>
    %152 = tpu.matmul %149, %151, %cst_134 {dimension_numbers = #tpu.dot_dimension_numbers<[1], [0], [0], [1], [0, 0, 1, 1], [], []>} : vector<64x16xbf16>, vector<16x32xbf16>, vector<64x32xf32> -> vector<64x32xf32>
    %153 = arith.addf %146, %152 : vector<64x32xf32>
    %c2_135 = arith.constant 2 : index
    %c2_136 = arith.constant 2 : index
    %c0_137 = arith.constant 0 : index
    %154 = vector.load %arg19[%c2_135, %c2_136, %c0_137] : memref<10x10x16xf32, #tpu.memory_space<vmem>>, vector<8x8x16xf32>
    %155 = vector.shape_cast %154 : vector<8x8x16xf32> to vector<64x16xf32>
    %156 = arith.truncf %155 : vector<64x16xf32> to vector<64x16xbf16>
    %c8_138 = arith.constant 8 : index
    %c0_139 = arith.constant 0 : index
    %c0_140 = arith.constant 0 : index
    %157 = vector.load %arg6[%c8_138, %c0_139, %c0_140] : memref<9x16x32xbf16, #tpu.memory_space<vmem>>, vector<1x16x32xbf16>
    %158 = vector.shape_cast %157 : vector<1x16x32xbf16> to vector<16x32xbf16>
    %cst_141 = arith.constant dense<0.000000e+00> : vector<64x32xf32>
    %159 = tpu.matmul %156, %158, %cst_141 {dimension_numbers = #tpu.dot_dimension_numbers<[1], [0], [0], [1], [0, 0, 1, 1], [], []>} : vector<64x16xbf16>, vector<16x32xbf16>, vector<64x32xf32> -> vector<64x32xf32>
    %160 = arith.addf %153, %159 : vector<64x32xf32>
    %c0_142 = arith.constant 0 : index
    %c0_143 = arith.constant 0 : index
    %161 = vector.load %arg7[%c0_142, %c0_143] : memref<1x32xf32, #tpu.memory_space<vmem>>, vector<1x32xf32>
    %162 = vector.broadcast %161 : vector<1x32xf32> to vector<64x32xf32>
    %163 = arith.addf %160, %162 : vector<64x32xf32>
    %cst_144 = arith.constant 0.000000e+00 : f32
    %164 = vector.broadcast %cst_144 : f32 to vector<64x32xf32>
    %165 = arith.maximumf %163, %164 : vector<64x32xf32>
    %166 = vector.shape_cast %165 : vector<64x32xf32> to vector<32x2x32xf32>
    %cst_145 = arith.constant dense<0xFF800000> : vector<32x32xf32>
    %167 = vector.multi_reduction <maximumf>, %166, %cst_145 [1] : vector<32x2x32xf32> to vector<32x32xf32>
    %168 = vector.shape_cast %167 : vector<32x32xf32> to vector<4x2x4x32xf32>
    %169 = vector.extract_strided_slice %168 {offsets = [0, 0, 0, 0], sizes = [4, 1, 4, 32], strides = [1, 1, 1, 1]} : vector<4x2x4x32xf32> to vector<4x1x4x32xf32>
    %170 = vector.shape_cast %169 : vector<4x1x4x32xf32> to vector<4x4x32xf32>
    %171 = vector.extract_strided_slice %168 {offsets = [0, 1, 0, 0], sizes = [4, 1, 4, 32], strides = [1, 1, 1, 1]} : vector<4x2x4x32xf32> to vector<4x1x4x32xf32>
    %172 = vector.shape_cast %171 : vector<4x1x4x32xf32> to vector<4x4x32xf32>
    %173 = arith.maximumf %170, %172 : vector<4x4x32xf32>
    %c0_146 = arith.constant 0 : index
    %c0_147 = arith.constant 0 : index
    %174 = vector.load %arg8[%c0_146, %c0_147] : memref<1x32xf32, #tpu.memory_space<vmem>>, vector<1x32xf32>
    %175 = vector.shape_cast %174 : vector<1x32xf32> to vector<1x1x32xf32>
    %176 = vector.broadcast %175 : vector<1x1x32xf32> to vector<4x4x32xf32>
    %177 = arith.mulf %173, %176 : vector<4x4x32xf32>
    %c0_148 = arith.constant 0 : index
    %c0_149 = arith.constant 0 : index
    %178 = vector.load %arg9[%c0_148, %c0_149] : memref<1x32xf32, #tpu.memory_space<vmem>>, vector<1x32xf32>
    %179 = vector.shape_cast %178 : vector<1x32xf32> to vector<1x1x32xf32>
    %180 = vector.broadcast %179 : vector<1x1x32xf32> to vector<4x4x32xf32>
    %181 = arith.addf %177, %180 : vector<4x4x32xf32>
    %cst_150 = arith.constant 0.000000e+00 : f32
    %182 = vector.broadcast %cst_150 : f32 to vector<6x6x32xf32>
    %c0_151 = arith.constant 0 : index
    %c0_152 = arith.constant 0 : index
    %c0_153 = arith.constant 0 : index
    %183 = vector.load %arg20[%c0_151, %c0_152, %c0_153] : memref<6x6x32xf32, #tpu.memory_space<vmem>>, vector<6x6x32xf32>
    tpu.vector_store %arg20[%c0_151, %c0_152, %c0_153], %182 {strides = array<i32>} : memref<6x6x32xf32, #tpu.memory_space<vmem>>, vector<6x6x32xf32>,
    %c1_154 = arith.constant 1 : index
    %c1_155 = arith.constant 1 : index
    %c0_156 = arith.constant 0 : index
    %184 = vector.load %arg20[%c1_154, %c1_155, %c0_156] : memref<6x6x32xf32, #tpu.memory_space<vmem>>, vector<4x4x32xf32>
    tpu.vector_store %arg20[%c1_154, %c1_155, %c0_156], %181 {strides = array<i32>} : memref<6x6x32xf32, #tpu.memory_space<vmem>>, vector<4x4x32xf32>,
    %cst_157 = arith.constant 0.000000e+00 : f32
    %185 = vector.broadcast %cst_157 : f32 to vector<16x64xf32>
    %c0_158 = arith.constant 0 : index
    %c0_159 = arith.constant 0 : index
    %c0_160 = arith.constant 0 : index
    %186 = vector.load %arg20[%c0_158, %c0_159, %c0_160] : memref<6x6x32xf32, #tpu.memory_space<vmem>>, vector<4x4x32xf32>
    %187 = vector.shape_cast %186 : vector<4x4x32xf32> to vector<16x32xf32>
    %188 = arith.truncf %187 : vector<16x32xf32> to vector<16x32xbf16>
    %c0_161 = arith.constant 0 : index
    %c0_162 = arith.constant 0 : index
    %c0_163 = arith.constant 0 : index
    %189 = vector.load %arg10[%c0_161, %c0_162, %c0_163] : memref<9x32x64xbf16, #tpu.memory_space<vmem>>, vector<1x32x64xbf16>
    %190 = vector.shape_cast %189 : vector<1x32x64xbf16> to vector<32x64xbf16>
    %cst_164 = arith.constant dense<0.000000e+00> : vector<16x64xf32>
    %191 = tpu.matmul %188, %190, %cst_164 {dimension_numbers = #tpu.dot_dimension_numbers<[1], [0], [0], [1], [0, 0, 1, 1], [], []>} : vector<16x32xbf16>, vector<32x64xbf16>, vector<16x64xf32> -> vector<16x64xf32>
    %192 = arith.addf %185, %191 : vector<16x64xf32>
    %c0_165 = arith.constant 0 : index
    %c1_166 = arith.constant 1 : index
    %c0_167 = arith.constant 0 : index
    %193 = vector.load %arg20[%c0_165, %c1_166, %c0_167] : memref<6x6x32xf32, #tpu.memory_space<vmem>>, vector<4x4x32xf32>
    %194 = vector.shape_cast %193 : vector<4x4x32xf32> to vector<16x32xf32>
    %195 = arith.truncf %194 : vector<16x32xf32> to vector<16x32xbf16>
    %c1_168 = arith.constant 1 : index
    %c0_169 = arith.constant 0 : index
    %c0_170 = arith.constant 0 : index
    %196 = vector.load %arg10[%c1_168, %c0_169, %c0_170] : memref<9x32x64xbf16, #tpu.memory_space<vmem>>, vector<1x32x64xbf16>
    %197 = vector.shape_cast %196 : vector<1x32x64xbf16> to vector<32x64xbf16>
    %cst_171 = arith.constant dense<0.000000e+00> : vector<16x64xf32>
    %198 = tpu.matmul %195, %197, %cst_171 {dimension_numbers = #tpu.dot_dimension_numbers<[1], [0], [0], [1], [0, 0, 1, 1], [], []>} : vector<16x32xbf16>, vector<32x64xbf16>, vector<16x64xf32> -> vector<16x64xf32>
    %199 = arith.addf %192, %198 : vector<16x64xf32>
    %c0_172 = arith.constant 0 : index
    %c2_173 = arith.constant 2 : index
    %c0_174 = arith.constant 0 : index
    %200 = vector.load %arg20[%c0_172, %c2_173, %c0_174] : memref<6x6x32xf32, #tpu.memory_space<vmem>>, vector<4x4x32xf32>
    %201 = vector.shape_cast %200 : vector<4x4x32xf32> to vector<16x32xf32>
    %202 = arith.truncf %201 : vector<16x32xf32> to vector<16x32xbf16>
    %c2_175 = arith.constant 2 : index
    %c0_176 = arith.constant 0 : index
    %c0_177 = arith.constant 0 : index
    %203 = vector.load %arg10[%c2_175, %c0_176, %c0_177] : memref<9x32x64xbf16, #tpu.memory_space<vmem>>, vector<1x32x64xbf16>
    %204 = vector.shape_cast %203 : vector<1x32x64xbf16> to vector<32x64xbf16>
    %cst_178 = arith.constant dense<0.000000e+00> : vector<16x64xf32>
    %205 = tpu.matmul %202, %204, %cst_178 {dimension_numbers = #tpu.dot_dimension_numbers<[1], [0], [0], [1], [0, 0, 1, 1], [], []>} : vector<16x32xbf16>, vector<32x64xbf16>, vector<16x64xf32> -> vector<16x64xf32>
    %206 = arith.addf %199, %205 : vector<16x64xf32>
    %c1_179 = arith.constant 1 : index
    %c0_180 = arith.constant 0 : index
    %c0_181 = arith.constant 0 : index
    %207 = vector.load %arg20[%c1_179, %c0_180, %c0_181] : memref<6x6x32xf32, #tpu.memory_space<vmem>>, vector<4x4x32xf32>
    %208 = vector.shape_cast %207 : vector<4x4x32xf32> to vector<16x32xf32>
    %209 = arith.truncf %208 : vector<16x32xf32> to vector<16x32xbf16>
    %c3_182 = arith.constant 3 : index
    %c0_183 = arith.constant 0 : index
    %c0_184 = arith.constant 0 : index
    %210 = vector.load %arg10[%c3_182, %c0_183, %c0_184] : memref<9x32x64xbf16, #tpu.memory_space<vmem>>, vector<1x32x64xbf16>
    %211 = vector.shape_cast %210 : vector<1x32x64xbf16> to vector<32x64xbf16>
    %cst_185 = arith.constant dense<0.000000e+00> : vector<16x64xf32>
    %212 = tpu.matmul %209, %211, %cst_185 {dimension_numbers = #tpu.dot_dimension_numbers<[1], [0], [0], [1], [0, 0, 1, 1], [], []>} : vector<16x32xbf16>, vector<32x64xbf16>, vector<16x64xf32> -> vector<16x64xf32>
    %213 = arith.addf %206, %212 : vector<16x64xf32>
    %c1_186 = arith.constant 1 : index
    %c1_187 = arith.constant 1 : index
    %c0_188 = arith.constant 0 : index
    %214 = vector.load %arg20[%c1_186, %c1_187, %c0_188] : memref<6x6x32xf32, #tpu.memory_space<vmem>>, vector<4x4x32xf32>
    %215 = vector.shape_cast %214 : vector<4x4x32xf32> to vector<16x32xf32>
    %216 = arith.truncf %215 : vector<16x32xf32> to vector<16x32xbf16>
    %c4_189 = arith.constant 4 : index
    %c0_190 = arith.constant 0 : index
    %c0_191 = arith.constant 0 : index
    %217 = vector.load %arg10[%c4_189, %c0_190, %c0_191] : memref<9x32x64xbf16, #tpu.memory_space<vmem>>, vector<1x32x64xbf16>
    %218 = vector.shape_cast %217 : vector<1x32x64xbf16> to vector<32x64xbf16>
    %cst_192 = arith.constant dense<0.000000e+00> : vector<16x64xf32>
    %219 = tpu.matmul %216, %218, %cst_192 {dimension_numbers = #tpu.dot_dimension_numbers<[1], [0], [0], [1], [0, 0, 1, 1], [], []>} : vector<16x32xbf16>, vector<32x64xbf16>, vector<16x64xf32> -> vector<16x64xf32>
    %220 = arith.addf %213, %219 : vector<16x64xf32>
    %c1_193 = arith.constant 1 : index
    %c2_194 = arith.constant 2 : index
    %c0_195 = arith.constant 0 : index
    %221 = vector.load %arg20[%c1_193, %c2_194, %c0_195] : memref<6x6x32xf32, #tpu.memory_space<vmem>>, vector<4x4x32xf32>
    %222 = vector.shape_cast %221 : vector<4x4x32xf32> to vector<16x32xf32>
    %223 = arith.truncf %222 : vector<16x32xf32> to vector<16x32xbf16>
    %c5_196 = arith.constant 5 : index
    %c0_197 = arith.constant 0 : index
    %c0_198 = arith.constant 0 : index
    %224 = vector.load %arg10[%c5_196, %c0_197, %c0_198] : memref<9x32x64xbf16, #tpu.memory_space<vmem>>, vector<1x32x64xbf16>
    %225 = vector.shape_cast %224 : vector<1x32x64xbf16> to vector<32x64xbf16>
    %cst_199 = arith.constant dense<0.000000e+00> : vector<16x64xf32>
    %226 = tpu.matmul %223, %225, %cst_199 {dimension_numbers = #tpu.dot_dimension_numbers<[1], [0], [0], [1], [0, 0, 1, 1], [], []>} : vector<16x32xbf16>, vector<32x64xbf16>, vector<16x64xf32> -> vector<16x64xf32>
    %227 = arith.addf %220, %226 : vector<16x64xf32>
    %c2_200 = arith.constant 2 : index
    %c0_201 = arith.constant 0 : index
    %c0_202 = arith.constant 0 : index
    %228 = vector.load %arg20[%c2_200, %c0_201, %c0_202] : memref<6x6x32xf32, #tpu.memory_space<vmem>>, vector<4x4x32xf32>
    %229 = vector.shape_cast %228 : vector<4x4x32xf32> to vector<16x32xf32>
    %230 = arith.truncf %229 : vector<16x32xf32> to vector<16x32xbf16>
    %c6_203 = arith.constant 6 : index
    %c0_204 = arith.constant 0 : index
    %c0_205 = arith.constant 0 : index
    %231 = vector.load %arg10[%c6_203, %c0_204, %c0_205] : memref<9x32x64xbf16, #tpu.memory_space<vmem>>, vector<1x32x64xbf16>
    %232 = vector.shape_cast %231 : vector<1x32x64xbf16> to vector<32x64xbf16>
    %cst_206 = arith.constant dense<0.000000e+00> : vector<16x64xf32>
    %233 = tpu.matmul %230, %232, %cst_206 {dimension_numbers = #tpu.dot_dimension_numbers<[1], [0], [0], [1], [0, 0, 1, 1], [], []>} : vector<16x32xbf16>, vector<32x64xbf16>, vector<16x64xf32> -> vector<16x64xf32>
    %234 = arith.addf %227, %233 : vector<16x64xf32>
    %c2_207 = arith.constant 2 : index
    %c1_208 = arith.constant 1 : index
    %c0_209 = arith.constant 0 : index
    %235 = vector.load %arg20[%c2_207, %c1_208, %c0_209] : memref<6x6x32xf32, #tpu.memory_space<vmem>>, vector<4x4x32xf32>
    %236 = vector.shape_cast %235 : vector<4x4x32xf32> to vector<16x32xf32>
    %237 = arith.truncf %236 : vector<16x32xf32> to vector<16x32xbf16>
    %c7_210 = arith.constant 7 : index
    %c0_211 = arith.constant 0 : index
    %c0_212 = arith.constant 0 : index
    %238 = vector.load %arg10[%c7_210, %c0_211, %c0_212] : memref<9x32x64xbf16, #tpu.memory_space<vmem>>, vector<1x32x64xbf16>
    %239 = vector.shape_cast %238 : vector<1x32x64xbf16> to vector<32x64xbf16>
    %cst_213 = arith.constant dense<0.000000e+00> : vector<16x64xf32>
    %240 = tpu.matmul %237, %239, %cst_213 {dimension_numbers = #tpu.dot_dimension_numbers<[1], [0], [0], [1], [0, 0, 1, 1], [], []>} : vector<16x32xbf16>, vector<32x64xbf16>, vector<16x64xf32> -> vector<16x64xf32>
    %241 = arith.addf %234, %240 : vector<16x64xf32>
    %c2_214 = arith.constant 2 : index
    %c2_215 = arith.constant 2 : index
    %c0_216 = arith.constant 0 : index
    %242 = vector.load %arg20[%c2_214, %c2_215, %c0_216] : memref<6x6x32xf32, #tpu.memory_space<vmem>>, vector<4x4x32xf32>
    %243 = vector.shape_cast %242 : vector<4x4x32xf32> to vector<16x32xf32>
    %244 = arith.truncf %243 : vector<16x32xf32> to vector<16x32xbf16>
    %c8_217 = arith.constant 8 : index
    %c0_218 = arith.constant 0 : index
    %c0_219 = arith.constant 0 : index
    %245 = vector.load %arg10[%c8_217, %c0_218, %c0_219] : memref<9x32x64xbf16, #tpu.memory_space<vmem>>, vector<1x32x64xbf16>
    %246 = vector.shape_cast %245 : vector<1x32x64xbf16> to vector<32x64xbf16>
    %cst_220 = arith.constant dense<0.000000e+00> : vector<16x64xf32>
    %247 = tpu.matmul %244, %246, %cst_220 {dimension_numbers = #tpu.dot_dimension_numbers<[1], [0], [0], [1], [0, 0, 1, 1], [], []>} : vector<16x32xbf16>, vector<32x64xbf16>, vector<16x64xf32> -> vector<16x64xf32>
    %248 = arith.addf %241, %247 : vector<16x64xf32>
    %c0_221 = arith.constant 0 : index
    %c0_222 = arith.constant 0 : index
    %249 = vector.load %arg11[%c0_221, %c0_222] : memref<1x64xf32, #tpu.memory_space<vmem>>, vector<1x64xf32>
    %250 = vector.broadcast %249 : vector<1x64xf32> to vector<16x64xf32>
    %251 = arith.addf %248, %250 : vector<16x64xf32>
    %cst_223 = arith.constant 0.000000e+00 : f32
    %252 = vector.broadcast %cst_223 : f32 to vector<16x64xf32>
    %253 = arith.maximumf %251, %252 : vector<16x64xf32>
    %254 = vector.shape_cast %253 : vector<16x64xf32> to vector<8x2x64xf32>
    %cst_224 = arith.constant dense<0xFF800000> : vector<8x64xf32>
    %255 = vector.multi_reduction <maximumf>, %254, %cst_224 [1] : vector<8x2x64xf32> to vector<8x64xf32>
    %256 = vector.shape_cast %255 : vector<8x64xf32> to vector<2x2x2x64xf32>
    %257 = vector.extract_strided_slice %256 {offsets = [0, 0, 0, 0], sizes = [2, 1, 2, 64], strides = [1, 1, 1, 1]} : vector<2x2x2x64xf32> to vector<2x1x2x64xf32>
    %258 = vector.shape_cast %257 : vector<2x1x2x64xf32> to vector<2x2x64xf32>
    %259 = vector.extract_strided_slice %256 {offsets = [0, 1, 0, 0], sizes = [2, 1, 2, 64], strides = [1, 1, 1, 1]} : vector<2x2x2x64xf32> to vector<2x1x2x64xf32>
    %260 = vector.shape_cast %259 : vector<2x1x2x64xf32> to vector<2x2x64xf32>
    %261 = arith.maximumf %258, %260 : vector<2x2x64xf32>
    %c0_225 = arith.constant 0 : index
    %c0_226 = arith.constant 0 : index
    %262 = vector.load %arg12[%c0_225, %c0_226] : memref<1x64xf32, #tpu.memory_space<vmem>>, vector<1x64xf32>
    %263 = vector.shape_cast %262 : vector<1x64xf32> to vector<1x1x64xf32>
    %264 = vector.broadcast %263 : vector<1x1x64xf32> to vector<2x2x64xf32>
    %265 = arith.mulf %261, %264 : vector<2x2x64xf32>
    %c0_227 = arith.constant 0 : index
    %c0_228 = arith.constant 0 : index
    %266 = vector.load %arg13[%c0_227, %c0_228] : memref<1x64xf32, #tpu.memory_space<vmem>>, vector<1x64xf32>
    %267 = vector.shape_cast %266 : vector<1x64xf32> to vector<1x1x64xf32>
    %268 = vector.broadcast %267 : vector<1x1x64xf32> to vector<2x2x64xf32>
    %269 = arith.addf %265, %268 : vector<2x2x64xf32>
    %cst_229 = arith.constant 0.000000e+00 : f32
    %270 = vector.broadcast %cst_229 : f32 to vector<1x10xf32>
    %271 = vector.extract_strided_slice %269 {offsets = [0, 0, 0], sizes = [1, 1, 64], strides = [1, 1, 1]} : vector<2x2x64xf32> to vector<1x1x64xf32>
    %272 = vector.shape_cast %271 : vector<1x1x64xf32> to vector<1x64xf32>
    %273 = arith.truncf %272 : vector<1x64xf32> to vector<1x64xbf16>
    %c0_230 = arith.constant 0 : index
    %c0_231 = arith.constant 0 : index
    %c0_232 = arith.constant 0 : index
    %274 = vector.load %arg14[%c0_230, %c0_231, %c0_232] : memref<4x64x10xbf16, #tpu.memory_space<vmem>>, vector<1x64x10xbf16>
    %275 = vector.shape_cast %274 : vector<1x64x10xbf16> to vector<64x10xbf16>
    %cst_233 = arith.constant dense<0.000000e+00> : vector<1x10xf32>
    %276 = tpu.matmul %273, %275, %cst_233 {dimension_numbers = #tpu.dot_dimension_numbers<[1], [0], [0], [1], [0, 0, 1, 1], [], []>} : vector<1x64xbf16>, vector<64x10xbf16>, vector<1x10xf32> -> vector<1x10xf32>
    %277 = arith.addf %270, %276 : vector<1x10xf32>
    %278 = vector.extract_strided_slice %269 {offsets = [0, 1, 0], sizes = [1, 1, 64], strides = [1, 1, 1]} : vector<2x2x64xf32> to vector<1x1x64xf32>
    %279 = vector.shape_cast %278 : vector<1x1x64xf32> to vector<1x64xf32>
    %280 = arith.truncf %279 : vector<1x64xf32> to vector<1x64xbf16>
    %c1_234 = arith.constant 1 : index
    %c0_235 = arith.constant 0 : index
    %c0_236 = arith.constant 0 : index
    %281 = vector.load %arg14[%c1_234, %c0_235, %c0_236] : memref<4x64x10xbf16, #tpu.memory_space<vmem>>, vector<1x64x10xbf16>
    %282 = vector.shape_cast %281 : vector<1x64x10xbf16> to vector<64x10xbf16>
    %cst_237 = arith.constant dense<0.000000e+00> : vector<1x10xf32>
    %283 = tpu.matmul %280, %282, %cst_237 {dimension_numbers = #tpu.dot_dimension_numbers<[1], [0], [0], [1], [0, 0, 1, 1], [], []>} : vector<1x64xbf16>, vector<64x10xbf16>, vector<1x10xf32> -> vector<1x10xf32>
    %284 = arith.addf %277, %283 : vector<1x10xf32>
    %285 = vector.extract_strided_slice %269 {offsets = [1, 0, 0], sizes = [1, 1, 64], strides = [1, 1, 1]} : vector<2x2x64xf32> to vector<1x1x64xf32>
    %286 = vector.shape_cast %285 : vector<1x1x64xf32> to vector<1x64xf32>
    %287 = arith.truncf %286 : vector<1x64xf32> to vector<1x64xbf16>
    %c2_238 = arith.constant 2 : index
    %c0_239 = arith.constant 0 : index
    %c0_240 = arith.constant 0 : index
    %288 = vector.load %arg14[%c2_238, %c0_239, %c0_240] : memref<4x64x10xbf16, #tpu.memory_space<vmem>>, vector<1x64x10xbf16>
    %289 = vector.shape_cast %288 : vector<1x64x10xbf16> to vector<64x10xbf16>
    %cst_241 = arith.constant dense<0.000000e+00> : vector<1x10xf32>
    %290 = tpu.matmul %287, %289, %cst_241 {dimension_numbers = #tpu.dot_dimension_numbers<[1], [0], [0], [1], [0, 0, 1, 1], [], []>} : vector<1x64xbf16>, vector<64x10xbf16>, vector<1x10xf32> -> vector<1x10xf32>
    %291 = arith.addf %284, %290 : vector<1x10xf32>
    %292 = vector.extract_strided_slice %269 {offsets = [1, 1, 0], sizes = [1, 1, 64], strides = [1, 1, 1]} : vector<2x2x64xf32> to vector<1x1x64xf32>
    %293 = vector.shape_cast %292 : vector<1x1x64xf32> to vector<1x64xf32>
    %294 = arith.truncf %293 : vector<1x64xf32> to vector<1x64xbf16>
    %c3_242 = arith.constant 3 : index
    %c0_243 = arith.constant 0 : index
    %c0_244 = arith.constant 0 : index
    %295 = vector.load %arg14[%c3_242, %c0_243, %c0_244] : memref<4x64x10xbf16, #tpu.memory_space<vmem>>, vector<1x64x10xbf16>
    %296 = vector.shape_cast %295 : vector<1x64x10xbf16> to vector<64x10xbf16>
    %cst_245 = arith.constant dense<0.000000e+00> : vector<1x10xf32>
    %297 = tpu.matmul %294, %296, %cst_245 {dimension_numbers = #tpu.dot_dimension_numbers<[1], [0], [0], [1], [0, 0, 1, 1], [], []>} : vector<1x64xbf16>, vector<64x10xbf16>, vector<1x10xf32> -> vector<1x10xf32>
    %298 = arith.addf %291, %297 : vector<1x10xf32>
    %c0_246 = arith.constant 0 : index
    %c0_247 = arith.constant 0 : index
    %299 = vector.load %arg15[%c0_246, %c0_247] : memref<1x10xf32, #tpu.memory_space<vmem>>, vector<1x10xf32>
    %300 = arith.addf %298, %299 : vector<1x10xf32>
    %cst_248 = arith.constant 0.000000e+00 : f32
    %301 = vector.broadcast %cst_248 : f32 to vector<1x10xf32>
    %302 = arith.maximumf %300, %301 : vector<1x10xf32>
    %303 = arith.truncf %302 : vector<1x10xf32> to vector<1x10xbf16>
    %c0_249 = arith.constant 0 : index
    %c0_250 = arith.constant 0 : index
    %304 = vector.load %arg16[%c0_249, %c0_250] : memref<10x1xbf16, #tpu.memory_space<vmem>>, vector<10x1xbf16>
    %cst_251 = arith.constant dense<0.000000e+00> : vector<1x1xf32>
    %305 = tpu.matmul %303, %304, %cst_251 {dimension_numbers = #tpu.dot_dimension_numbers<[1], [0], [0], [1], [0, 0, 1, 1], [], []>} : vector<1x10xbf16>, vector<10x1xbf16>, vector<1x1xf32> -> vector<1x1xf32>
    %c0_252 = arith.constant 0 : index
    %c0_253 = arith.constant 0 : index
    %306 = vector.load %arg17[%c0_252, %c0_253] : memref<1x1xf32, #tpu.memory_space<vmem>>, vector<1x1xf32>
    %307 = arith.addf %305, %306 : vector<1x1xf32>
    %308 = arith.negf %307 : vector<1x1xf32>
    %309 = math.exp %308 : vector<1x1xf32>
    %cst_254 = arith.constant 1.000000e+00 : f32
    %310 = vector.broadcast %cst_254 : f32 to vector<1x1xf32>
    %311 = arith.addf %310, %309 : vector<1x1xf32>
    %312 = arith.divf %310, %311 : vector<1x1xf32>
    %c0_255 = arith.constant 0 : index
    %c0_256 = arith.constant 0 : index
    %c0_257 = arith.constant 0 : index
    %313 = vector.load %arg18[%c0_255, %c0_256, %c0_257] : memref<1x1x1xf32, #tpu.memory_space<vmem>>, vector<1x1x1xf32>
    %314 = vector.shape_cast %313 : vector<1x1x1xf32> to vector<1x1xf32>
    %315 = vector.shape_cast %312 : vector<1x1xf32> to vector<1x1x1xf32>
    tpu.vector_store %arg18[%c0_255, %c0_256, %c0_257], %315 {strides = array<i32>} : memref<1x1x1xf32, #tpu.memory_space<vmem>>, vector<1x1x1xf32>,
    return
  }
  func.func @transform_0(%arg0: i32) -> (i32, i32, i32, i32) {
    %c0_i32 = arith.constant 0 : i32
    %c0_i32_0 = arith.constant 0 : i32
    %c0_i32_1 = arith.constant 0 : i32
    %c0_i32_2 = arith.constant 0 : i32
    return %arg0, %c0_i32, %c0_i32_0, %c0_i32_1 : i32, i32, i32, i32
  }
  func.func @transform_1(%arg0: i32) -> (i32, i32, i32) {
    %c0_i32 = arith.constant 0 : i32
    %c0_i32_0 = arith.constant 0 : i32
    %c0_i32_1 = arith.constant 0 : i32
    %c0_i32_2 = arith.constant 0 : i32
    return %c0_i32, %c0_i32_0, %c0_i32_1 : i32, i32, i32
  }
  func.func @transform_2(%arg0: i32) -> (i32, i32) {
    %c0_i32 = arith.constant 0 : i32
    %c0_i32_0 = arith.constant 0 : i32
    %c0_i32_1 = arith.constant 0 : i32
    return %c0_i32, %c0_i32_0 : i32, i32
  }
  func.func @transform_3(%arg0: i32) -> (i32, i32) {
    %c0_i32 = arith.constant 0 : i32
    %c0_i32_0 = arith.constant 0 : i32
    %c0_i32_1 = arith.constant 0 : i32
    return %c0_i32, %c0_i32_0 : i32, i32
  }
  func.func @transform_4(%arg0: i32) -> (i32, i32) {
    %c0_i32 = arith.constant 0 : i32
    %c0_i32_0 = arith.constant 0 : i32
    %c0_i32_1 = arith.constant 0 : i32
    return %c0_i32, %c0_i32_0 : i32, i32
  }
  func.func @transform_5(%arg0: i32) -> (i32, i32, i32) {
    %c0_i32 = arith.constant 0 : i32
    %c0_i32_0 = arith.constant 0 : i32
    %c0_i32_1 = arith.constant 0 : i32
    %c0_i32_2 = arith.constant 0 : i32
    return %c0_i32, %c0_i32_0, %c0_i32_1 : i32, i32, i32
  }
  func.func @transform_6(%arg0: i32) -> (i32, i32) {
    %c0_i32 = arith.constant 0 : i32
    %c0_i32_0 = arith.constant 0 : i32
    %c0_i32_1 = arith.constant 0 : i32
    return %c0_i32, %c0_i32_0 : i32, i32
  }
  func.func @transform_7(%arg0: i32) -> (i32, i32) {
    %c0_i32 = arith.constant 0 : i32
    %c0_i32_0 = arith.constant 0 : i32
    %c0_i32_1 = arith.constant 0 : i32
    return %c0_i32, %c0_i32_0 : i32, i32
  }
  func.func @transform_8(%arg0: i32) -> (i32, i32) {
    %c0_i32 = arith.constant 0 : i32
    %c0_i32_0 = arith.constant 0 : i32
    %c0_i32_1 = arith.constant 0 : i32
    return %c0_i32, %c0_i32_0 : i32, i32
  }
  func.func @transform_9(%arg0: i32) -> (i32, i32, i32) {
    %c0_i32 = arith.constant 0 : i32
    %c0_i32_0 = arith.constant 0 : i32
    %c0_i32_1 = arith.constant 0 : i32
    %c0_i32_2 = arith.constant 0 : i32
    return %c0_i32, %c0_i32_0, %c0_i32_1 : i32, i32, i32
  }
  func.func @transform_10(%arg0: i32) -> (i32, i32) {
    %c0_i32 = arith.constant 0 : i32
    %c0_i32_0 = arith.constant 0 : i32
    %c0_i32_1 = arith.constant 0 : i32
    return %c0_i32, %c0_i32_0 : i32, i32
  }
  func.func @transform_11(%arg0: i32) -> (i32, i32) {
    %c0_i32 = arith.constant 0 : i32
    %c0_i32_0 = arith.constant 0 : i32
    %c0_i32_1 = arith.constant 0 : i32
    return %c0_i32, %c0_i32_0 : i32, i32
  }
  func.func @transform_12(%arg0: i32) -> (i32, i32) {
    %c0_i32 = arith.constant 0 : i32
    %c0_i32_0 = arith.constant 0 : i32
    %c0_i32_1 = arith.constant 0 : i32
    return %c0_i32, %c0_i32_0 : i32, i32
  }
  func.func @transform_13(%arg0: i32) -> (i32, i32, i32) {
    %c0_i32 = arith.constant 0 : i32
    %c0_i32_0 = arith.constant 0 : i32
    %c0_i32_1 = arith.constant 0 : i32
    %c0_i32_2 = arith.constant 0 : i32
    return %c0_i32, %c0_i32_0, %c0_i32_1 : i32, i32, i32
  }
  func.func @transform_14(%arg0: i32) -> (i32, i32) {
    %c0_i32 = arith.constant 0 : i32
    %c0_i32_0 = arith.constant 0 : i32
    %c0_i32_1 = arith.constant 0 : i32
    return %c0_i32, %c0_i32_0 : i32, i32
  }
  func.func @transform_15(%arg0: i32) -> (i32, i32) {
    %c0_i32 = arith.constant 0 : i32
    %c0_i32_0 = arith.constant 0 : i32
    %c0_i32_1 = arith.constant 0 : i32
    return %c0_i32, %c0_i32_0 : i32, i32
  }
  func.func @transform_16(%arg0: i32) -> (i32, i32) {
    %c0_i32 = arith.constant 0 : i32
    %c0_i32_0 = arith.constant 0 : i32
    %c0_i32_1 = arith.constant 0 : i32
    return %c0_i32, %c0_i32_0 : i32, i32
  }
  func.func @transform_17(%arg0: i32) -> (i32, i32, i32) {
    %c0_i32 = arith.constant 0 : i32
    %c0_i32_0 = arith.constant 0 : i32
    %c0_i32_1 = arith.constant 0 : i32
    return %arg0, %c0_i32, %c0_i32_0 : i32, i32, i32
  }
}

</mosaic_0001>

<bundles_post_ra>
// kernel: patch_cnn_forward.1
= control target key start
LH: loop header
LB: loop body
LE: loop exit
PB: predicated region body
PF: predicated region fallthrough
CT: control target
= control target key end

     0   :  { %s9769_s26 = smov 0   ;;  %s11873_s0 = inlined_call_operand.vmem [shape: f32[2,18,18,3], index: 0, kind: input, shape index: {}]   ;;  %s11874_s1 = inlined_call_operand.vmem [shape: bf16[9,3,16], index: 1, kind: input, shape index: {}]   ;;  %s11875_s2 = inlined_call_operand.vmem [shape: f32[1,16], index: 2, kind: input, shape index: {}]   ;;  %s11876_s3 = inlined_call_operand.vmem [shape: f32[1,16], index: 3, kind: input, shape index: {}]   ;;  %s11877_s4 = inlined_call_operand.vmem [shape: f32[1,16], index: 4, kind: input, shape index: {}]   ;;  %s11878_s5 = inlined_call_operand.vmem [shape: bf16[9,16,32], index: 5, kind: input, shape index: {}]   ;;  %s11879_s6 = inlined_call_operand.vmem [shape: f32[1,32], index: 6, kind: input, shape index: {}]   ;;  %s11880_s7 = inlined_call_operand.vmem [shape: f32[1,32], index: 7, kind: input, shape index: {}]   ;;  %s11881_s8 = inlined_call_operand.vmem [shape: f32[1,32], index: 8, kind: input, shape index: {}]   ;;  %s11882_s9 = inlined_call_operand.vmem [shape: bf16[9,32,64], index: 9, kind: input, shape index: {}]   ;;  %s11883_s10 = inlined_call_operand.vmem [shape: f32[1,64], index: 10, kind: input, shape index: {}]   ;;  %s11884_s11 = inlined_call_operand.vmem [shape: f32[1,64], index: 11, kind: input, shape index: {}]   ;;  %s11885_s12 = inlined_call_operand.vmem [shape: f32[1,64], index: 12, kind: input, shape index: {}]   ;;  %s11886_s13 = inlined_call_operand.vmem [shape: bf16[4,64,10], index: 13, kind: input, shape index: {}]   ;;  %s11887_s14 = inlined_call_operand.vmem [shape: f32[1,10], index: 14, kind: input, shape index: {}]   ;;  %s11888_s15 = inlined_call_operand.vmem [shape: bf16[10,1], index: 15, kind: input, shape index: {}]   ;;  %s11889_s16 = inlined_call_operand.<no memory space> [shape: f32[1,1], index: 16, kind: input, shape index: {}]   ;;  %s11890_s17 = inlined_call_operand.vmem [shape: f32[2,1,1], index: 17, kind: output, shape index: {}]  }
   0x1   :  { %11894 = sst [smem:[#allocation18_spill]] %s11873_s0  ;;  %v22_v0 = vstv %s11889_s16 }
   0x2   :  { %11895 = sst [smem:[#allocation19_spill]] %s11874_s1  ;;  %23 = vst [vmem:[#allocation4] sm:$0x1] %v22_v0 }
   0x3 LB: > { %s7960_s27 = sadd.s32 4294967295, %s9670_s26   ;;  %p7964_p0 = scmp.ge.s32.totalorder %s9670_s26, 1  ;;  %s9670_s26 = sphi %s9769_s26, %s29_s26  }
   0x4   : > { %p489_p1 = scmp.lt.s32.totalorder %s9670_s26, 3 }
   0x6   : > { %p490_p2 = pnand %p7964_p0, %p489_p1 }
   0x8   : > { %493 = sbr.rel (%p490_p2) target bundleno = 2224 (0x8b0), region = 88 }
   0xf   : > { %vm696_vm0 = vcmask 1040384   ;;  %vm697_vm1 = vcmask 1041408   ;;  %s11896_s29 = sld [smem:[#allocation19_spill]]  ;;  %p539_p3 = scmp.lt.s32.totalorder %s7960_s27, 1  ;;  %v9672_v2 = vmov 65535   ;;  %vm647_vm2 = vcmask 23552  }
  0x10   : > { %v698_v3 = vsel %vm696_vm0, 4294967295, %v9672_v2  ;;  %s11897_s22 = sld [smem:[#allocation18_spill]]  ;;  %vm3911_vm3 = vcmask 123904   ;;  %vm5014_vm4 = vcmask 130048   ;;  %vm5100_vm5 = vcmask 1041409  }
  0x11   : > { %v9783_v5 = vsel %vm697_vm1, %v698_v3, 0  ;;  %s11927_s27 = smov (!%p539_p3, %s7960_s27), 1  ;;  %vm5103_vm6 = vcmask 1042434   ;;  %vm5106_vm7 = vcmask 1043459   ;;  %vm5109_vm8 = vcmask 1044484  }
  0x12   : > { %s9579_s18 = smul.u32 432, %s11927_s27  ;;  %vm5112_vm9 = vcmask 1045509   ;;  %vm5115_vm10 = vcmask 1046534   ;;  %vm5118_vm11 = vcmask 1047559   ;;  %vm6659_vm12 = vcmask 259072   ;;  %s546_s0 = scalar_lea.vmem %s11890_s17, %s11927_s27 }
  0x13   : > { %vm9675_vm13 = vmmov 0   ;;  %vm6372_vm14 = vcmask 254976   ;;  %vm6711_vm15 = vcmask 257024   ;;  %vm6763_vm0 = vcmask 261120  }
  0x14   : > { %vm7452_vm1 = vcmask 517120  }
  0x15   : > { %v7999_v1 = vld [vmem:[%s11896_s29 + $0x4] sm:$0x3]  ;;  %v8048_v4 = vld [vmem:[%s11896_s29 + $0x6] sm:$0x3]  ;;  %v8097_v8 = vld [vmem:[%s11896_s29 + $0x8] sm:$0x3] }
  0x16   : > { %v9788_v6 = vand.u32 %v7999_v1, %v9783_v5  ;;  %v1470_v7 = vand.u32 %v8048_v4, %v9783_v5  ;;  %s9800_s23 = scalar_lea.vmem %s11897_s22, %s9579_s18  ;;  %v1764_v18 = vand.u32 %v8097_v8, %v9783_v5  ;;  %v8146_v53 = vld [vmem:[%s11896_s29 + $0xa] sm:$0x3] }
  0x17   : > { %v1076_v9 = vld [vmem:[%s9800_s23 + $0x2] sm:$0xff]  ;;  %v1077_v10 = vld [vmem:[%s9800_s23 + $0xa] sm:$0xff]  ;;  %v1078_v11 = vld [vmem:[%s9800_s23 + $0x1a] sm:$0xff]  ;;  %v9890_v56 = vand.u32 %v8146_v53, %v9783_v5 }
  0x18   : > { %8803 = vmatprep.subr.bf16.mxu0 %v9788_v6  ;;  %v1108_v12 = vpack.c.bf16 %v1077_v10, %v1076_v9  ;;  %v1079_v13 = vld [vmem:[%s9800_s23 + $0x22] sm:$0xff]  ;;  %v1080_v14 = vld [vmem:[%s9800_s23 + $0x32] sm:$0xff]  ;;  %v1081_v15 = vld [vmem:[%s9800_s23 + $0x3a] sm:$0xff] }
  0x19   : > { %8804 = vmatpush3.bf16.msra.mxu0 %v9788_v6  ;;  %v9808_v16 = vpack.c.bf16 %v1079_v13, %v1078_v11  ;;  %v9810_v17 = vpack.c.bf16 %v1081_v15, %v1080_v14  ;;  %v1082_v19 = vld [vmem:[%s9800_s23 + $0x4a] sm:$0xff]  ;;  %v1083_v20 = vld [vmem:[%s9800_s23 + $0x52] sm:$0xff]  ;;  %v1084_v21 = vld [vmem:[%s9800_s23 + $0x62] sm:$0xff] }
  0x1a   : > { %8837 = vmatprep.subr.bf16.mxu0 %v1470_v7  ;;  %8805 = vmatprep.mubr.msk.bf16.mxu0 %vm647_vm2, %v1108_v12  ;;  %v1085_v22 = vld [vmem:[%s9800_s23 + $0x6a] sm:$0xff]  ;;  %v9822_v23 = vpack.c.bf16 %v1083_v20, %v1082_v19  ;;  %v1086_v25 = vld [vmem:[%s9800_s23 + $0x7a] sm:$0xff]  ;;  %v1087_v26 = vld [vmem:[%s9800_s23 + $0x82] sm:$0xff] }
  0x1b   : > { %v9824_v24 = vpack.c.bf16 %v1085_v22, %v1084_v21  ;;  %v1088_v27 = vld [vmem:[%s9800_s23 + $0x92] sm:$0xff]  ;;  %v1089_v28 = vld [vmem:[%s9800_s23 + $0x9a] sm:$0xff]  ;;  %v9834_v29 = vpack.c.bf16 %v1087_v26, %v1086_v25  ;;  %v1090_v31 = vld [vmem:[%s9800_s23 + $0xaa] sm:$0xff] }
  0x1c   : > { %8806 = vmatmul.mubr.msk.bf16.vlgmr.msra.gmra.mrb[0].mxu0 %vm647_vm2, %v9808_v16  ;;  %v9836_v30 = vpack.c.bf16 %v1089_v28, %v1088_v27  ;;  %v1091_v32 = vld [vmem:[%s9800_s23 + $0xb2] sm:$0xff]  ;;  %v1092_v33 = vld [vmem:[%s9800_s23 + $0xc2] sm:$0xff]  ;;  %v1093_v34 = vld [vmem:[%s9800_s23 + $0xca] sm:$0xff] }
  0x1d   : > { %8838 = vmatpush3.bf16.msra.mxu0 %v1470_v7  ;;  %8809 = vmatprep.mubr.msk.bf16.mxu0 %vm647_vm2, %v9810_v17  ;;  %v9846_v35 = vpack.c.bf16 %v1091_v32, %v1090_v31  ;;  %v9848_v36 = vpack.c.bf16 %v1093_v34, %v1092_v33  ;;  %v1094_v37 = vld [vmem:[%s9800_s23 + $0xda] sm:$0xff]  ;;  %v1095_v38 = vld [vmem:[%s9800_s23 + $0xe2] sm:$0xff]  ;;  %v1096_v39 = vld [vmem:[%s9800_s23 + $0xf2] sm:$0xff] }
  0x1e   : > { %8871 = vmatprep.subr.bf16.mxu0 %v1764_v18  ;;  %v1097_v40 = vld [vmem:[%s9800_s23 + $0xfa] sm:$0xff]  ;;  %v9858_v41 = vpack.c.bf16 %v1095_v38, %v1094_v37  ;;  %v1098_v43 = vld [vmem:[%s9800_s23 + $0x10a] sm:$0xff]  ;;  %v1099_v44 = vld [vmem:[%s9800_s23 + $0x112] sm:$0xff] }
  0x1f   : > { %v9860_v42 = vpack.c.bf16 %v1097_v40, %v1096_v39  ;;  %v8016_v45 = vld [vmem:[%s9800_s23 + $0x18] sm:$0xff]  ;;  %v8017_v46 = vld [vmem:[%s9800_s23 + $0x20] sm:$0xff]  ;;  %v9870_v47 = vpack.c.bf16 %v1099_v44, %v1098_v43  ;;  %v8018_v49 = vld [vmem:[%s9800_s23 + $0x30] sm:$0xff] }
  0x20   : > { %v9872_v48 = vpack.c.bf16 %v8017_v46, %v8016_v45  ;;  %v8019_v50 = vld [vmem:[%s9800_s23 + $0x38] sm:$0xff]  ;;  %v8020_v51 = vld [vmem:[%s9800_s23 + $0x48] sm:$0xff]  ;;  %v8021_v52 = vld [vmem:[%s9800_s23 + $0x50] sm:$0xff] }
  0x21   : > { %v9885_v54 = vpack.c.bf16 %v8019_v50, %v8018_v49  ;;  %v9887_v55 = vpack.c.bf16 %v8021_v52, %v8020_v51  ;;  %v8022_v57 = vld [vmem:[%s9800_s23 + $0x60] sm:$0xff]  ;;  %v8023_v58 = vld [vmem:[%s9800_s23 + $0x68] sm:$0xff]  ;;  %v8024_v59 = vld [vmem:[%s9800_s23 + $0x78] sm:$0xff] }
  0x22   : > { %v8025_v60 = vld [vmem:[%s9800_s23 + $0x80] sm:$0xff]  ;;  %v9901_v61 = vpack.c.bf16 %v8023_v58, %v8022_v57  ;;  %v8026_v63 = vld [vmem:[%s9800_s23 + $0x90] sm:$0xff]  ;;  %v8027_v0 = vld [vmem:[%s9800_s23 + $0x98] sm:$0xff] }
  0x23   : > { %v9903_v62 = vpack.c.bf16 %v8025_v60, %v8024_v59  ;;  %v8028_v1 = vld [vmem:[%s9800_s23 + $0xa8] sm:$0xff]  ;;  %v8029_v2 = vld [vmem:[%s9800_s23 + $0xb0] sm:$0xff]  ;;  %v9913_v3 = vpack.c.bf16 %v8027_v0, %v8026_v63  ;;  %v8030_v7 = vld [vmem:[%s9800_s23 + $0xc0] sm:$0xff] }
  0x24   : > { %8810 = vmatmul.mubr.msk.bf16.gmra.mrb[4].mxu0 %vm647_vm2, %v9822_v23  ;;  %v9915_v4 = vpack.c.bf16 %v8029_v2, %v8028_v1  ;;  %v8031_v8 = vld [vmem:[%s9800_s23 + $0xc8] sm:$0xff]  ;;  %v8032_v9 = vld [vmem:[%s9800_s23 + $0xd8] sm:$0xff]  ;;  %v8033_v10 = vld [vmem:[%s9800_s23 + $0xe0] sm:$0xff] }
  0x25   : > { %8813 = vmatprep.mubr.msk.bf16.mxu0 %vm647_vm2, %v9824_v24  ;;  %v9925_v11 = vpack.c.bf16 %v8031_v8, %v8030_v7  ;;  %v9927_v12 = vpack.c.bf16 %v8033_v10, %v8032_v9  ;;  %v7966_v13 = vld [vmem:[%s11896_s29 + $0x2] sm:$0x3]  ;;  %v8034_v14 = vld [vmem:[%s9800_s23 + $0xf0] sm:$0xff]  ;;  %v8065_v15 = vld [vmem:[%s9800_s23 + $0x19] sm:$0xff] }
  0x26   : > { %v8066_v19 = vld [vmem:[%s9800_s23 + $0x21] sm:$0xff]  ;;  %v598_v21 = vld [vmem:[%s9800_s23 + $0x9] sm:$0xff]  ;;  %v8035_v22 = vld [vmem:[%s9800_s23 + $0xf8] sm:$0xff] }
  0x27   : > { %v597_v20 = vld [vmem:[%s9800_s23 + $0x1] sm:$0xff]  ;;  %v8067_v25 = vld [vmem:[%s9800_s23 + $0x31] sm:$0xff]  ;;  %v8068_v26 = vld [vmem:[%s9800_s23 + $0x39] sm:$0xff]  ;;  %v1697_v32 = vpack.c.bf16 %v8066_v19, %v8065_v15  ;;  %v9948_v33 = vpack.c.bf16 %v8035_v22, %v8034_v14 }
  0x28   : > { %v629_v27 = vpack.c.bf16 %v598_v21, %v597_v20  ;;  %v8036_v28 = vld [vmem:[%s9800_s23 + $0x108] sm:$0xff]  ;;  %v8037_v31 = vld [vmem:[%s9800_s23 + $0x110] sm:$0xff]  ;;  %v9950_v34 = vpack.c.bf16 %v8068_v26, %v8067_v25  ;;  %v8038_v38 = vld [vmem:[%s9800_s23 + $0x120] sm:$0xff] }
  0x29   : > { %v9952_v37 = vpack.c.bf16 %v8037_v31, %v8036_v28  ;;  %v8069_v39 = vld [vmem:[%s9800_s23 + $0x49] sm:$0xff]  ;;  %v8070_v40 = vld [vmem:[%s9800_s23 + $0x51] sm:$0xff]  ;;  %v8071_v44 = vld [vmem:[%s9800_s23 + $0x61] sm:$0xff] }
  0x2a   : > { %8737 = vmatprep.mubr.msk.bf16.mxu1 %vm647_vm2, %v629_v27  ;;  %v8039_v43 = vld [vmem:[%s9800_s23 + $0x128] sm:$0xff]  ;;  %v8040_v46 = vld [vmem:[%s9800_s23 + $0x138] sm:$0xff]  ;;  %v8041_v49 = vld [vmem:[%s9800_s23 + $0x140] sm:$0xff]  ;;  %v9969_v50 = vpack.c.bf16 %v8070_v40, %v8069_v39 }
  0x2b   : > { %v8072_v45 = vld [vmem:[%s9800_s23 + $0x69] sm:$0xff]  ;;  %v9971_v51 = vpack.c.bf16 %v8039_v43, %v8038_v38  ;;  %v9975_v53 = vpack.c.bf16 %v8041_v49, %v8040_v46  ;;  %v8073_v58 = vld [vmem:[%s9800_s23 + $0x79] sm:$0xff]  ;;  %v8074_v59 = vld [vmem:[%s9800_s23 + $0x81] sm:$0xff] }
  0x2c   : > { %8814 = vmatmul.mubr.msk.bf16.gmra.mrb[8].mxu0 %vm647_vm2, %v9834_v29  ;;  %v9973_v52 = vpack.c.bf16 %v8072_v45, %v8071_v44  ;;  %v8042_v57 = vld [vmem:[%s9800_s23 + $0x150] sm:$0xff]  ;;  %v8043_v60 = vld [vmem:[%s9800_s23 + $0x158] sm:$0xff]  ;;  %v8044_v1 = vld [vmem:[%s9800_s23 + $0x168] sm:$0xff]  ;;  %v9993_v7 = vpack.c.bf16 %v8074_v59, %v8073_v58 }
  0x2d   : > { %8817 = vmatprep.mubr.msk.bf16.mxu0 %vm647_vm2, %v9836_v30  ;;  %v8075_v63 = vld [vmem:[%s9800_s23 + $0x91] sm:$0xff]  ;;  %v8076_v0 = vld [vmem:[%s9800_s23 + $0x99] sm:$0xff]  ;;  %v9995_v8 = vpack.c.bf16 %v8043_v60, %v8042_v57  ;;  %v8077_v14 = vld [vmem:[%s9800_s23 + $0xa9] sm:$0xff] }
  0x2e   : > { %v8045_v2 = vld [vmem:[%s9800_s23 + $0x170] sm:$0xff]  ;;  %v9997_v9 = vpack.c.bf16 %v8076_v0, %v8075_v63  ;;  %v8079_v19 = vld [vmem:[%s9800_s23 + $0xc1] sm:$0xff]  ;;  %v8081_v26 = vld [vmem:[%s9800_s23 + $0xd9] sm:$0xff] }
  0x2f   : > { %v9999_v10 = vpack.c.bf16 %v8045_v2, %v8044_v1  ;;  %v8078_v15 = vld [vmem:[%s9800_s23 + $0xb1] sm:$0xff]  ;;  %v8080_v20 = vld [vmem:[%s9800_s23 + $0xc9] sm:$0xff]  ;;  %v8082_v27 = vld [vmem:[%s9800_s23 + $0xe1] sm:$0xff] }
  0x30   : > { %v10015_v21 = vpack.c.bf16 %v8078_v15, %v8077_v14  ;;  %v10019_v25 = vpack.c.bf16 %v8080_v20, %v8079_v19  ;;  %v8083_v28 = vld [vmem:[%s9800_s23 + $0xf1] sm:$0xff]  ;;  %v8084_v31 = vld [vmem:[%s9800_s23 + $0xf9] sm:$0xff]  ;;  %v10032_v38 = vpack.c.bf16 %v8082_v27, %v8081_v26  ;;  %v8195_v39 = vld [vmem:[%s11896_s29 + $0xc] sm:$0x3] }
  0x31   : > { %v10037_v40 = vpack.c.bf16 %v8084_v31, %v8083_v28  ;;  %v10042_v43 = vand.u32 %v8195_v39, %v9783_v5  ;;  %v8086_v44 = vld [vmem:[%s9800_s23 + $0x111] sm:$0xff]  ;;  %v8087_v45 = vld [vmem:[%s9800_s23 + $0x121] sm:$0xff]  ;;  %v8088_v46 = vld [vmem:[%s9800_s23 + $0x129] sm:$0xff] }
  0x32   : > { %v10058_v57 = vpack.c.bf16 %v8088_v46, %v8087_v45  ;;  %v8090_v58 = vld [vmem:[%s9800_s23 + $0x141] sm:$0xff]  ;;  %v8091_v59 = vld [vmem:[%s9800_s23 + $0x151] sm:$0xff]  ;;  %v8092_v60 = vld [vmem:[%s9800_s23 + $0x159] sm:$0xff] }
  0x33   : > { %v10074_v0 = vpack.c.bf16 %v8092_v60, %v8091_v59  ;;  %v8093_v1 = vld [vmem:[%s9800_s23 + $0x169] sm:$0xff]  ;;  %v8094_v2 = vld [vmem:[%s9800_s23 + $0x171] sm:$0xff]  ;;  %v596_v14 = vld [vmem:[%s11896_s29] sm:$0x3] }
  0x34   : > { %8818 = vmatmul.mubr.msk.bf16.gmra.mrb[12].mxu0 %vm647_vm2, %v9846_v35  ;;  %v913_v15 = vand.u32 %v9783_v5, %v596_v14  ;;  %v549_v19 = vld [vmem:[%s9800_s23 + $0x8] sm:$0xff] }
  0x35   : > { %8821 = vmatprep.mubr.msk.bf16.mxu0 %vm647_vm2, %v9848_v36  ;;  %v8244_v27 = vld [vmem:[%s11896_s29 + $0xe] sm:$0x3]  ;;  %v8268_v46 = vld [vmem:[%s9800_s23 + $0x82] sm:$0xff] }
  0x36   : > { %v2647_v28 = vand.u32 %v8244_v27, %v9783_v5  ;;  %v8273_v14 = vld [vmem:[%s9800_s23 + $0xc2] sm:$0xff] }
  0x37   : > { %v8276_v27 = vld [vmem:[%s9800_s23 + $0xe2] sm:$0xff] }
  0x3c   : > { %8822 = vmatmul.mubr.msk.bf16.gmra.mrb[16].mxu0 %vm647_vm2, %v9858_v41 }
  0x3d   : > { %8825 = vmatprep.mubr.msk.bf16.mxu0 %vm647_vm2, %v9860_v42 }
  0x44   : > { %8826 = vmatmul.mubr.msk.bf16.gmra.mrb[20].mxu0 %vm647_vm2, %v9870_v47 }
  0x45   : > { %8839 = vmatprep.mubr.msk.bf16.mxu0 %vm647_vm2, %v9872_v48 }
  0x4c   : > { %8840 = vmatmul.mubr.msk.bf16.vlgmr.msra.gmra.mrb[0].mxu0 %vm647_vm2, %v9885_v54 }
  0x4d   : > { %8872 = vmatpush3.bf16.msra.mxu0 %v1764_v18  ;;  %8843 = vmatprep.mubr.msk.bf16.mxu0 %vm647_vm2, %v9887_v55  ;;  %v701_v18 = vand.u32 %v7966_v13, %v9783_v5  ;;  %v8046_v13 = vld [vmem:[%s9800_s23 + $0x180] sm:$0xff] }
  0x4e   : > { %8905 = vmatprep.subr.bf16.mxu0 %v9890_v56 }
  0x4f   : > { %8735 = vmatprep.subr.bf16.mxu1 %v701_v18 }
  0x50   : > { %8736 = vmatpush3.bf16.msra.mxu1 %v701_v18  ;;  %v8047_v18 = vld [vmem:[%s9800_s23 + $0x188] sm:$0xff] }
  0x51   : > { %v10017_v22 = vpack.c.bf16 %v8047_v18, %v8046_v13  ;;  %v10086_v13 = vpack.c.bf16 %v8094_v2, %v8093_v1  ;;  %v548_v18 = vld [vmem:[%s9800_s23] sm:$0xff]  ;;  %8769 = vmatprep.subr.bf16.mxu1 %v913_v15  ;;  %v8271_v1 = vld [vmem:[%s9800_s23 + $0xaa] sm:$0xff]  ;;  %v8272_v2 = vld [vmem:[%s9800_s23 + $0xb2] sm:$0xff] }
  0x52   : > { %v580_v20 = vpack.c.bf16 %v549_v19, %v548_v18 }
  0x53   : > { %8738 = vmatmul.mubr.msk.bf16.vlgmr.msra.gmra.mrb[0].mxu1 %vm647_vm2, %v1697_v32 }
  0x54   : > { %8844 = vmatmul.mubr.msk.bf16.gmra.mrb[4].mxu0 %vm647_vm2, %v9901_v61  ;;  %8741 = vmatprep.mubr.msk.bf16.mxu1 %vm647_vm2, %v9950_v34 }
  0x55   : > { %8847 = vmatprep.mubr.msk.bf16.mxu0 %vm647_vm2, %v9903_v62  ;;  %8770 = vmatpush3.bf16.msra.mxu1 %v913_v15  ;;  %v8274_v15 = vld [vmem:[%s9800_s23 + $0xca] sm:$0xff] }
  0x56   : > { %9257 = vmatprep.subr.bf16.mxu1 %v9788_v6 }
  0x5b   : > { %8742 = vmatmul.mubr.msk.bf16.gmra.mrb[4].mxu1 %vm647_vm2, %v9969_v50 }
  0x5c   : > { %8848 = vmatmul.mubr.msk.bf16.gmra.mrb[8].mxu0 %vm647_vm2, %v9913_v3  ;;  %8745 = vmatprep.mubr.msk.bf16.mxu1 %vm647_vm2, %v9973_v52 }
  0x5d   : > { %8851 = vmatprep.mubr.msk.bf16.mxu0 %vm647_vm2, %v9915_v4 }
  0x63   : > { %8746 = vmatmul.mubr.msk.bf16.gmra.mrb[8].mxu1 %vm647_vm2, %v9993_v7 }
  0x64   : > { %8852 = vmatmul.mubr.msk.bf16.gmra.mrb[12].mxu0 %vm647_vm2, %v9925_v11  ;;  %8749 = vmatprep.mubr.msk.bf16.mxu1 %vm647_vm2, %v9997_v9 }
  0x65   : > { %8855 = vmatprep.mubr.msk.bf16.mxu0 %vm647_vm2, %v9927_v12 }
  0x6b   : > { %8750 = vmatmul.mubr.msk.bf16.gmra.mrb[12].mxu1 %vm647_vm2, %v10015_v21 }
  0x6c   : > { %8856 = vmatmul.mubr.msk.bf16.gmra.mrb[16].mxu0 %vm647_vm2, %v9948_v33  ;;  %8753 = vmatprep.mubr.msk.bf16.mxu1 %vm647_vm2, %v10019_v25 }
  0x6d   : > { %8859 = vmatprep.mubr.msk.bf16.mxu0 %vm647_vm2, %v9952_v37 }
  0x73   : > { %8754 = vmatmul.mubr.msk.bf16.gmra.mrb[16].mxu1 %vm647_vm2, %v10032_v38 }
  0x74   : > { %8860 = vmatmul.mubr.msk.bf16.gmra.mrb[20].mxu0 %vm647_vm2, %v9971_v51  ;;  %8757 = vmatprep.mubr.msk.bf16.mxu1 %vm647_vm2, %v10037_v40 }
  0x75   : > { %8863 = vmatprep.mubr.msk.bf16.mxu0 %vm647_vm2, %v9975_v53 }
  0x7c   : > { %8864 = vmatmul.mubr.msk.bf16.gmra.mrb[24].mxu0 %vm647_vm2, %v9995_v8 }
  0x7d   : > { %8867 = vmatprep.mubr.msk.bf16.mxu0 %vm647_vm2, %v9999_v10 }
  0x84   : > { %8868 = vmatmul.mubr.msk.bf16.gmra.mrb[28].mxu0 %vm647_vm2, %v10017_v22 }
  0x85   : > { %8873 = vmatprep.mubr.msk.bf16.mxu0 %vm647_vm2, %v1697_v32  ;;  %v8085_v32 = vld [vmem:[%s9800_s23 + $0x109] sm:$0xff] }
  0x86   : > { %v10056_v49 = vpack.c.bf16 %v8086_v44, %v8085_v32  ;;  %v8145_v32 = vld [vmem:[%s9800_s23 + $0x18a] sm:$0xff] }
  0x87   : > { %v8293_v44 = vld [vmem:[%s11896_s29 + $0x10] sm:$0x3] }
  0x88   : > { %8758 = vmatmul.mubr.msk.bf16.gmra.mrb[20].mxu1 %vm647_vm2, %v10056_v49  ;;  %v2941_v45 = vand.u32 %v8293_v44, %v9783_v5  ;;  %v8193_v5 = vld [vmem:[%s9800_s23 + $0x198] sm:$0xff] }
  0x89   : > { %8761 = vmatprep.mubr.msk.bf16.mxu1 %vm647_vm2, %v10058_v57 }
  0x8c   : > { %8874 = vmatmul.mubr.msk.bf16.vlgmr.msra.gmra.mrb[0].mxu0 %vm647_vm2, %v9950_v34 }
  0x8d   : > { %8906 = vmatpush3.bf16.msra.mxu0 %v9890_v56  ;;  %8877 = vmatprep.mubr.msk.bf16.mxu0 %vm647_vm2, %v9969_v50  ;;  %v8089_v56 = vld [vmem:[%s9800_s23 + $0x139] sm:$0xff] }
  0x8e   : > { %8939 = vmatprep.subr.bf16.mxu0 %v10042_v43  ;;  %v10072_v63 = vpack.c.bf16 %v8090_v58, %v8089_v56  ;;  %v8270_v56 = vld [vmem:[%s9800_s23 + $0x9a] sm:$0xff] }
  0x90   : > { %8762 = vmatmul.mubr.msk.bf16.gmra.mrb[24].mxu1 %vm647_vm2, %v10072_v63 }
  0x91   : > { %8765 = vmatprep.mubr.msk.bf16.mxu1 %vm647_vm2, %v10074_v0 }
  0x94   : > { %8878 = vmatmul.mubr.msk.bf16.gmra.mrb[4].mxu0 %vm647_vm2, %v9973_v52 }
  0x95   : > { %8881 = vmatprep.mubr.msk.bf16.mxu0 %vm647_vm2, %v9993_v7 }
  0x98   : > { %8766 = vmatmul.mubr.msk.bf16.gmra.mrb[28].mxu1 %vm647_vm2, %v10086_v13 }
  0x99   : > { %8771 = vmatprep.mubr.msk.bf16.mxu1 %vm647_vm2, %v580_v20  ;;  %v2879_v20 = vpack.c.bf16 %v8272_v2, %v8271_v1 }
  0x9c   : > { %8882 = vmatmul.mubr.msk.bf16.gmra.mrb[8].mxu0 %vm647_vm2, %v9997_v9 }
  0x9d   : > { %8885 = vmatprep.mubr.msk.bf16.mxu0 %vm647_vm2, %v10015_v21 }
  0xa0   : > { %8772 = vmatmul.mubr.msk.bf16.vlgmr.msra.gmra.mrb[0].mxu1 %vm647_vm2, %v9872_v48  ;;  %v8096_v48 = vld [vmem:[%s9800_s23 + $0x189] sm:$0xff] }
  0xa1   : > { %8775 = vmatprep.mubr.msk.bf16.mxu1 %vm647_vm2, %v9885_v54  ;;  %9258 = vmatpush3.bf16.msra.mxu1 %v9788_v6  ;;  %v8095_v6 = vld [vmem:[%s9800_s23 + $0x181] sm:$0xff] }
  0xa2   : > { %v10129_v26 = vpack.c.bf16 %v8096_v48, %v8095_v6  ;;  %v2880_v6 = vpack.c.bf16 %v8274_v15, %v8273_v14 }
  0xa4   : > { %8886 = vmatmul.mubr.msk.bf16.gmra.mrb[12].mxu0 %vm647_vm2, %v10019_v25 }
  0xa5   : > { %8889 = vmatprep.mubr.msk.bf16.mxu0 %vm647_vm2, %v10032_v38 }
  0xa8   : > { %8776 = vmatmul.mubr.msk.bf16.gmra.mrb[4].mxu1 %vm647_vm2, %v9887_v55 }
  0xa9   : > { %8779 = vmatprep.mubr.msk.bf16.mxu1 %vm647_vm2, %v9901_v61 }
  0xac   : > { %8890 = vmatmul.mubr.msk.bf16.gmra.mrb[16].mxu0 %vm647_vm2, %v10037_v40 }
  0xad   : > { %8893 = vmatprep.mubr.msk.bf16.mxu0 %vm647_vm2, %v10056_v49 }
  0xb0   : > { %8780 = vmatmul.mubr.msk.bf16.gmra.mrb[8].mxu1 %vm647_vm2, %v9903_v62 }
  0xb1   : > { %8783 = vmatprep.mubr.msk.bf16.mxu1 %vm647_vm2, %v9913_v3 }
  0xb4   : > { %8894 = vmatmul.mubr.msk.bf16.gmra.mrb[20].mxu0 %vm647_vm2, %v10058_v57 }
  0xb5   : > { %8897 = vmatprep.mubr.msk.bf16.mxu0 %vm647_vm2, %v10072_v63 }
  0xb8   : > { %8784 = vmatmul.mubr.msk.bf16.gmra.mrb[12].mxu1 %vm647_vm2, %v9915_v4 }
  0xb9   : > { %8787 = vmatprep.mubr.msk.bf16.mxu1 %vm647_vm2, %v9925_v11 }
  0xbc   : > { %8898 = vmatmul.mubr.msk.bf16.gmra.mrb[24].mxu0 %vm647_vm2, %v10074_v0 }
  0xbd   : > { %8901 = vmatprep.mubr.msk.bf16.mxu0 %vm647_vm2, %v10086_v13 }
  0xc0   : > { %8788 = vmatmul.mubr.msk.bf16.gmra.mrb[16].mxu1 %vm647_vm2, %v9927_v12 }
  0xc1   : > { %8791 = vmatprep.mubr.msk.bf16.mxu1 %vm647_vm2, %v9948_v33 }
  0xc4   : > { %8902 = vmatmul.mubr.msk.bf16.gmra.mrb[28].mxu0 %vm647_vm2, %v10129_v26 }
  0xc5   : > { %8907 = vmatprep.mubr.msk.bf16.mxu0 %vm647_vm2, %v9808_v16  ;;  %v8136_v16 = vld [vmem:[%s9800_s23 + $0x122] sm:$0xff] }
  0xc8   : > { %8792 = vmatmul.mubr.msk.bf16.gmra.mrb[20].mxu1 %vm647_vm2, %v9952_v37 }
  0xc9   : > { %8795 = vmatprep.mubr.msk.bf16.mxu1 %vm647_vm2, %v9971_v51 }
  0xcc   : > { %8908 = vmatmul.mubr.msk.bf16.vlgmr.msra.gmra.mrb[0].mxu0 %vm647_vm2, %v9810_v17  ;;  %v8137_v17 = vld [vmem:[%s9800_s23 + $0x12a] sm:$0xff] }
  0xcd   : > { %8940 = vmatpush3.bf16.msra.mxu0 %v10042_v43  ;;  %8911 = vmatprep.mubr.msk.bf16.mxu0 %vm647_vm2, %v9822_v23  ;;  %v10170_v23 = vpack.c.bf16 %v8137_v17, %v8136_v16  ;;  %v8143_v43 = vld [vmem:[%s9800_s23 + $0x172] sm:$0xff]  ;;  %v8278_v17 = vld [vmem:[%s9800_s23 + $0xfa] sm:$0xff] }
  0xce   : > { %8973 = vmatprep.subr.bf16.mxu0 %v2647_v28  ;;  %v8277_v16 = vld [vmem:[%s9800_s23 + $0xf2] sm:$0xff] }
  0xd0   : > { %8796 = vmatmul.mubr.msk.bf16.gmra.mrb[24].mxu1 %vm647_vm2, %v9975_v53 }
  0xd1   : > { %8799 = vmatprep.mubr.msk.bf16.mxu1 %vm647_vm2, %v9995_v8 }
  0xd4   : > { %8912 = vmatmul.mubr.msk.bf16.gmra.mrb[4].mxu0 %vm647_vm2, %v9824_v24  ;;  %v8138_v24 = vld [vmem:[%s9800_s23 + $0x13a] sm:$0xff] }
  0xd5   : > { %8915 = vmatprep.mubr.msk.bf16.mxu0 %vm647_vm2, %v9834_v29  ;;  %v8139_v29 = vld [vmem:[%s9800_s23 + $0x142] sm:$0xff] }
  0xd6   : > { %v10184_v31 = vpack.c.bf16 %v8139_v29, %v8138_v24 }
  0xd8   : > { %8800 = vmatmul.mubr.msk.bf16.gmra.mrb[28].mxu1 %vm647_vm2, %v9999_v10 }
  0xd9   : > { %8829 = vmatprep.mubr.msk.bf16.mxu1 %vm647_vm2, %v10170_v23 }
  0xdc   : > { %8916 = vmatmul.mubr.msk.bf16.gmra.mrb[8].mxu0 %vm647_vm2, %v9836_v30  ;;  %v8140_v30 = vld [vmem:[%s9800_s23 + $0x152] sm:$0xff] }
  0xdd   : > { %8919 = vmatprep.mubr.msk.bf16.mxu0 %vm647_vm2, %v9846_v35  ;;  %v8141_v35 = vld [vmem:[%s9800_s23 + $0x15a] sm:$0xff] }
  0xde   : > { %v10186_v39 = vpack.c.bf16 %v8141_v35, %v8140_v30  ;;  %v2882_v35 = vpack.c.bf16 %v8278_v17, %v8277_v16 }
  0xe0   : > { %8830 = vmatmul.mubr.msk.bf16.vlgmr.msra.gmra.mrb[24].mxu1 %vm647_vm2, %v10184_v31 }
  0xe1   : > { %8833 = vmatprep.mubr.msk.bf16.mxu1 %vm647_vm2, %v10186_v39 }
  0xe4   : > { %8920 = vmatmul.mubr.msk.bf16.gmra.mrb[12].mxu0 %vm647_vm2, %v9848_v36  ;;  %v8142_v36 = vld [vmem:[%s9800_s23 + $0x16a] sm:$0xff] }
  0xe5   : > { %8923 = vmatprep.mubr.msk.bf16.mxu0 %vm647_vm2, %v9858_v41  ;;  %v10198_v41 = vpack.c.bf16 %v8143_v43, %v8142_v36  ;;  %v8279_v43 = vld [vmem:[%s9800_s23 + $0x10a] sm:$0xff] }
  0xe8   : > { %8834 = vmatmul.mubr.msk.bf16.gmra.mrb[28].mxu1 %vm647_vm2, %v10198_v41 }
  0xec   : > { %8924 = vmatmul.mubr.msk.bf16.gmra.mrb[16].mxu0 %vm647_vm2, %v9860_v42  ;;  %v8144_v42 = vld [vmem:[%s9800_s23 + $0x182] sm:$0xff] }
  0xed   : > { %8927 = vmatprep.mubr.msk.bf16.mxu0 %vm647_vm2, %v9870_v47  ;;  %v10212_v47 = vpack.c.bf16 %v8145_v32, %v8144_v42  ;;  %v8280_v42 = vld [vmem:[%s9800_s23 + $0x112] sm:$0xff] }
  0xf4   : > { %8928 = vmatmul.mubr.msk.bf16.gmra.mrb[20].mxu0 %vm647_vm2, %v10170_v23 }
  0xf5   : > { %8931 = vmatprep.mubr.msk.bf16.mxu0 %vm647_vm2, %v10184_v31 }
  0xfc   : > { %8932 = vmatmul.mubr.msk.bf16.gmra.mrb[24].mxu0 %vm647_vm2, %v10186_v39 }
  0xfd   : > { %8935 = vmatprep.mubr.msk.bf16.mxu0 %vm647_vm2, %v10198_v41 }
 0x104   : > { %8936 = vmatmul.mubr.msk.bf16.gmra.mrb[28].mxu0 %vm647_vm2, %v10212_v47 }
 0x105   : > { %8941 = vmatprep.mubr.msk.bf16.mxu0 %vm647_vm2, %v9885_v54  ;;  %v8194_v54 = vld [vmem:[%s9800_s23 + $0x1a0] sm:$0xff] }
 0x10c   : > { %8942 = vmatmul.mubr.msk.bf16.vlgmr.msra.gmra.mrb[0].mxu0 %vm647_vm2, %v9887_v55  ;;  %v2301_v55 = vpack.c.bf16 %v8194_v54, %v8193_v5  ;;  %v2883_v5 = vpack.c.bf16 %v8280_v42, %v8279_v43 }
 0x10d   : > { %8974 = vmatpush3.bf16.msra.mxu0 %v2647_v28  ;;  %8945 = vmatprep.mubr.msk.bf16.mxu0 %vm647_vm2, %v9901_v61 }
 0x10e   : > { %9007 = vmatprep.subr.bf16.mxu0 %v2941_v45 }
 0x114   : > { %8946 = vmatmul.mubr.msk.bf16.gmra.mrb[4].mxu0 %vm647_vm2, %v9903_v62  ;;  %v8242_v62 = vld [vmem:[%s9800_s23 + $0x199] sm:$0xff] }
 0x115   : > { %8949 = vmatprep.mubr.msk.bf16.mxu0 %vm647_vm2, %v9913_v3  ;;  %v8243_v3 = vld [vmem:[%s9800_s23 + $0x1a1] sm:$0xff] }
 0x11c   : > { %8950 = vmatmul.mubr.msk.bf16.gmra.mrb[8].mxu0 %vm647_vm2, %v9915_v4 }
 0x11d   : > { %8953 = vmatprep.mubr.msk.bf16.mxu0 %vm647_vm2, %v9925_v11  ;;  %v8261_v11 = vld [vmem:[%s9800_s23 + $0x32] sm:$0xff] }
 0x124   : > { %8954 = vmatmul.mubr.msk.bf16.gmra.mrb[12].mxu0 %vm647_vm2, %v9927_v12  ;;  %v8262_v12 = vld [vmem:[%s9800_s23 + $0x3a] sm:$0xff] }
 0x125   : > { %8957 = vmatprep.mubr.msk.bf16.mxu0 %vm647_vm2, %v9948_v33 }
 0x12c   : > { %8958 = vmatmul.mubr.msk.bf16.gmra.mrb[16].mxu0 %vm647_vm2, %v9952_v37  ;;  %v2595_v37 = vpack.c.bf16 %v8243_v3, %v8242_v62  ;;  %v8292_v62 = vld [vmem:[%s9800_s23 + $0x1a2] sm:$0xff] }
 0x12d   : > { %8961 = vmatprep.mubr.msk.bf16.mxu0 %vm647_vm2, %v9971_v51 }
 0x134   : > { %8962 = vmatmul.mubr.msk.bf16.gmra.mrb[20].mxu0 %vm647_vm2, %v9975_v53  ;;  %v8264_v53 = vld [vmem:[%s9800_s23 + $0x52] sm:$0xff] }
 0x135   : > { %8965 = vmatprep.mubr.msk.bf16.mxu0 %vm647_vm2, %v9995_v8  ;;  %v8265_v8 = vld [vmem:[%s9800_s23 + $0x62] sm:$0xff] }
 0x13c   : > { %8966 = vmatmul.mubr.msk.bf16.gmra.mrb[24].mxu0 %vm647_vm2, %v9999_v10 }
 0x13d   : > { %8969 = vmatprep.mubr.msk.bf16.mxu0 %vm647_vm2, %v10017_v22 }
 0x144   : > { %8970 = vmatmul.mubr.msk.bf16.gmra.mrb[28].mxu0 %vm647_vm2, %v2301_v55  ;;  %v8291_v55 = vld [vmem:[%s9800_s23 + $0x19a] sm:$0xff] }
 0x145   : > { %8975 = vmatprep.mubr.msk.bf16.mxu0 %vm647_vm2, %v9950_v34 }
 0x14c   : > { %8976 = vmatmul.mubr.msk.bf16.vlgmr.msra.gmra.mrb[0].mxu0 %vm647_vm2, %v9969_v50  ;;  %v2874_v50 = vpack.c.bf16 %v8262_v12, %v8261_v11 }
 0x14d   : > { %9008 = vmatpush3.bf16.msra.mxu0 %v2941_v45  ;;  %8979 = vmatprep.mubr.msk.bf16.mxu0 %vm647_vm2, %v9973_v52  ;;  %v8263_v52 = vld [vmem:[%s9800_s23 + $0x4a] sm:$0xff] }
 0x14e   : > { %v2875_v22 = vpack.c.bf16 %v8264_v53, %v8263_v52  ;;  %v3243_v53 = vlaneseq }
 0x154   : > { %8980 = vmatmul.mubr.msk.bf16.gmra.mrb[4].mxu0 %vm647_vm2, %v9993_v7 }
 0x155   : > { %8983 = vmatprep.mubr.msk.bf16.mxu0 %vm647_vm2, %v9997_v9  ;;  %v8266_v9 = vld [vmem:[%s9800_s23 + $0x6a] sm:$0xff] }
 0x15c   : > { %8984 = vmatmul.mubr.msk.bf16.gmra.mrb[8].mxu0 %vm647_vm2, %v10015_v21 }
 0x15d   : > { %8987 = vmatprep.mubr.msk.bf16.mxu0 %vm647_vm2, %v10019_v25  ;;  %v2876_v25 = vpack.c.bf16 %v8266_v9, %v8265_v8  ;;  %v3244_v9 = vshrl.u32 %v3243_v53, 7 }
 0x164   : > { %8988 = vmatmul.mubr.msk.bf16.gmra.mrb[12].mxu0 %vm647_vm2, %v10032_v38 }
 0x165   : > { %8991 = vmatprep.mubr.msk.bf16.mxu0 %vm647_vm2, %v10037_v40  ;;  %v8267_v40 = vld [vmem:[%s9800_s23 + $0x7a] sm:$0xff] }
 0x166   : > { %v2877_v60 = vpack.c.bf16 %v8268_v46, %v8267_v40 }
 0x16c   : > { %8992 = vmatmul.mubr.msk.bf16.gmra.mrb[16].mxu0 %vm647_vm2, %v10056_v49 }
 0x16d   : > { %8995 = vmatprep.mubr.msk.bf16.mxu0 %vm647_vm2, %v10058_v57  ;;  %v8269_v57 = vld [vmem:[%s9800_s23 + $0x92] sm:$0xff] }
 0x173   : > { %v10281_v61 = vpop.f32.mrb[0].mxu1 }
 0x174   : > { %8996 = vmatmul.mubr.msk.bf16.gmra.mrb[20].mxu0 %vm647_vm2, %v10072_v63  ;;  %v10287_v4 = vpop.f32.mrb[1].mxu1  ;;  %v2878_v63 = vpack.c.bf16 %v8270_v56, %v8269_v57 }
 0x175   : > { %8999 = vmatprep.mubr.msk.bf16.mxu0 %vm647_vm2, %v10074_v0  ;;  %v10291_v33 = vpop.f32.mrb[2].mxu1 }
 0x176   : > { %v10293_v34 = vpop.f32.mrb[3].mxu1 }
 0x17b   : > { %v10296_v51 = vpop.f32.mrb[4].mxu1 }
 0x17c   : > { %9000 = vmatmul.mubr.msk.bf16.gmra.mrb[24].mxu0 %vm647_vm2, %v10086_v13  ;;  %v10301_v7 = vpop.f32.mrb[5].mxu1 }
 0x17d   : > { %9003 = vmatprep.mubr.msk.bf16.mxu0 %vm647_vm2, %v10129_v26  ;;  %v10305_v10 = vpop.f32.mrb[6].mxu1  ;;  %v8275_v26 = vld [vmem:[%s9800_s23 + $0xda] sm:$0xff] }
 0x17e   : > { %v10307_v21 = vpop.f32.mrb[7].mxu1  ;;  %v2881_v30 = vpack.c.bf16 %v8276_v27, %v8275_v26 }
 0x183   : > { %v10310_v38 = vpop.f32.mrb[8].mxu1 }
 0x184   : > { %9004 = vmatmul.mubr.msk.bf16.gmra.mrb[28].mxu0 %vm647_vm2, %v2595_v37  ;;  %v10315_v49 = vpop.f32.mrb[9].mxu1 }
 0x185   : > { %9009 = vmatprep.mubr.msk.bf16.mxu0 %vm647_vm2, %v2874_v50  ;;  %v10319_v58 = vpop.f32.mrb[10].mxu1  ;;  %v9674_v50 = vmov 1983009808  }
 0x186   : > { %v10321_v59 = vpop.f32.mrb[11].mxu1  ;;  %v3241_v52 = vunpack.c.l.s4 %v9674_v50 }
 0x188   : > { %v3242_v8 = vunpack.c.0.s8 %v3241_v52 }
 0x18b   : > { %v10324_v0 = vpop.f32.mrb[12].mxu1 }
 0x18c   : > { %9010 = vmatmul.mubr.msk.bf16.vlgmr.msra.gmra.mrb[0].mxu0 %vm647_vm2, %v2875_v22  ;;  %v10329_v13 = vpop.f32.mrb[13].mxu1 }
 0x18d   : > { %9013 = vmatprep.mubr.msk.bf16.mxu0 %vm647_vm2, %v2876_v25  ;;  %v10333_v18 = vpop.f32.mrb[14].mxu1  ;;  %v10436_v25 = vld [vmem:[%s11875_s2] ss:$0 sm:$0xff] }
 0x18e   : > { %v10335_v19 = vpop.f32.mrb[15].mxu1 }
 0x193   : > { %v10338_v48 = vpop.f32.mrb[16].mxu1 }
 0x194   : > { %9014 = vmatmul.mubr.msk.bf16.gmra.mrb[4].mxu0 %vm647_vm2, %v2877_v60  ;;  %v10343_v28 = vpop.f32.mrb[17].mxu1 }
 0x195   : > { %9017 = vmatprep.mubr.msk.bf16.mxu0 %vm647_vm2, %v2878_v63  ;;  %v10347_v24 = vpop.f32.mrb[18].mxu1  ;;  %v10441_v63 = vsub.s32 %v3242_v8, %v3244_v9 }
 0x196   : > { %v10349_v29 = vpop.f32.mrb[19].mxu1 }
 0x197   : > { %11898 = vst [vmem:[#allocation5_spill] sm:$0xff] %v10349_v29 }
 0x19b   : > { %v10352_v36 = vpop.f32.mrb[20].mxu1 }
 0x19c   : > { %9018 = vmatmul.mubr.msk.bf16.gmra.mrb[8].mxu0 %vm647_vm2, %v2879_v20  ;;  %11899 = vst [vmem:[#allocation6_spill] sm:$0xff] %v10352_v36  ;;  %v10357_v32 = vpop.f32.mrb[21].mxu1 }
 0x19d   : > { %9021 = vmatprep.mubr.msk.bf16.mxu0 %vm647_vm2, %v2880_v6  ;;  %11900 = vst [vmem:[#allocation7_spill] sm:$0xff] %v10357_v32  ;;  %v10359_v44 = vpop.f32.mrb[22].mxu1 }
 0x19e   : > { %11901 = vst [vmem:[#allocation8_spill] sm:$0xff] %v10359_v44  ;;  %v10361_v45 = vpop.f32.mrb[23].mxu1 }
 0x19f   : > { %11902 = vst [vmem:[#allocation9_spill] sm:$0xff] %v10361_v45 }
 0x1a4   : > { %9022 = vmatmul.mubr.msk.bf16.gmra.mrb[12].mxu0 %vm647_vm2, %v2881_v30 }
 0x1a5   : > { %9025 = vmatprep.mubr.msk.bf16.mxu0 %vm647_vm2, %v2882_v35 }
 0x1ac   : > { %9026 = vmatmul.mubr.msk.bf16.gmra.mrb[16].mxu0 %vm647_vm2, %v2883_v5 }
 0x1ad   : > { %9029 = vmatprep.mubr.msk.bf16.mxu0 %vm647_vm2, %v10170_v23 }
 0x1b3   : > { %v10372_v54 = vpop.f32.mrb[24].mxu1 }
 0x1b4   : > { %9030 = vmatmul.mubr.msk.bf16.gmra.mrb[20].mxu0 %vm647_vm2, %v10184_v31  ;;  %11903 = vst [vmem:[#allocation10_spill] sm:$0xff] %v10372_v54  ;;  %v10378_v3 = vpop.f32.mrb[25].mxu1  ;;  %v2889_v31 = vpack.c.bf16 %v8292_v62, %v8291_v55 }
 0x1b5   : > { %9033 = vmatprep.mubr.msk.bf16.mxu0 %vm647_vm2, %v10186_v39  ;;  %11904 = vst [vmem:[#allocation11_spill] sm:$0xff] %v10378_v3  ;;  %v10380_v11 = vpop.f32.mrb[26].mxu1 }
 0x1b6   : > { %11905 = vst [vmem:[#allocation12_spill] sm:$0xff] %v10380_v11  ;;  %v10382_v23 = vpop.f32.mrb[27].mxu1 }
 0x1b7   : > { %11906 = vst [vmem:[#allocation13_spill] sm:$0xff] %v10382_v23 }
 0x1bb   : > { %v10385_v39 = vpop.f32.mrb[28].mxu1 }
 0x1bc   : > { %9034 = vmatmul.mubr.msk.bf16.gmra.mrb[24].mxu0 %vm647_vm2, %v10198_v41  ;;  %11907 = vst [vmem:[#allocation14_spill] sm:$0xff] %v10385_v39  ;;  %v10387_v12 = vpop.f32.mrb[29].mxu1 }
 0x1bd   : > { %9037 = vmatprep.mubr.msk.bf16.mxu0 %vm647_vm2, %v10212_v47  ;;  %11908 = vst [vmem:[#allocation15_spill] sm:$0xff] %v10387_v12  ;;  %v10389_v41 = vpop.f32.mrb[30].mxu1  ;;  %v11892_v47 = vmov 0.0  }
 0x1be   : > { %11909 = vst [vmem:[#allocation16_spill] sm:$0xff] %v10389_v41  ;;  %v10391_v37 = vpop.f32.mrb[31].mxu1  ;;  %5017 = vst.msk [vmem:[#allocation2 + $0x10] sm:$0xff] %vm5014_vm4, %v11892_v47 }
 0x1bf   : > { %11910 = vst [vmem:[#allocation17_spill] sm:$0xff] %v10391_v37  ;;  %5018 = vst.msk [vmem:[#allocation2 + $0x18] sm:$0x3] %vm3911_vm3, %v11892_v47 }
 0x1c0   : > { %5015 = vst.msk [vmem:[#allocation2] sm:$0xff] %vm5014_vm4, %v11892_v47  ;;  %5019 = vst.msk [vmem:[#allocation2 + $0x20] sm:$0xff] %vm5014_vm4, %v11892_v47 }
 0x1c1   : > { %5016 = vst.msk [vmem:[#allocation2 + $0x8] sm:$0x3] %vm3911_vm3, %v11892_v47  ;;  %5020 = vst.msk [vmem:[#allocation2 + $0x28] sm:$0x3] %vm3911_vm3, %v11892_v47 }
 0x1c2   : > { %5021 = vst.msk [vmem:[#allocation2 + $0x30] sm:$0xff] %vm5014_vm4, %v11892_v47  ;;  %5023 = vst.msk [vmem:[#allocation2 + $0x40] sm:$0xff] %vm5014_vm4, %v11892_v47 }
 0x1c3   : > { %5022 = vst.msk [vmem:[#allocation2 + $0x38] sm:$0x3] %vm3911_vm3, %v11892_v47  ;;  %5024 = vst.msk [vmem:[#allocation2 + $0x48] sm:$0x3] %vm3911_vm3, %v11892_v47 }
 0x1c4   : > { %9038 = vmatmul.mubr.msk.bf16.gmra.mrb[28].mxu0 %vm647_vm2, %v2889_v31  ;;  %5025 = vst.msk [vmem:[#allocation2 + $0x50] sm:$0xff] %vm5014_vm4, %v11892_v47  ;;  %5027 = vst.msk [vmem:[#allocation2 + $0x60] sm:$0xff] %vm5014_vm4, %v11892_v47  ;;  %vm7578_vm2 = vcmask 523264  }
 0x1c5   : > { %5026 = vst.msk [vmem:[#allocation2 + $0x58] sm:$0x3] %vm3911_vm3, %v11892_v47  ;;  %5028 = vst.msk [vmem:[#allocation2 + $0x68] sm:$0x3] %vm3911_vm3, %v11892_v47 }
 0x1c6   : > { %5029 = vst.msk [vmem:[#allocation2 + $0x70] sm:$0xff] %vm5014_vm4, %v11892_v47  ;;  %5031 = vst.msk [vmem:[#allocation2 + $0x80] sm:$0xff] %vm5014_vm4, %v11892_v47 }
 0x1c7   : > { %5030 = vst.msk [vmem:[#allocation2 + $0x78] sm:$0x3] %vm3911_vm3, %v11892_v47  ;;  %5032 = vst.msk [vmem:[#allocation2 + $0x88] sm:$0x3] %vm3911_vm3, %v11892_v47 }
 0x1c8   : > { %5033 = vst.msk [vmem:[#allocation2 + $0x90] sm:$0xff] %vm5014_vm4, %v11892_v47 }
 0x1c9   : > { %5034 = vst.msk [vmem:[#allocation2 + $0x98] sm:$0x3] %vm3911_vm3, %v11892_v47 }
 0x25f   : > { %v9011_v22 = vpop.f32.mrb[0].mxu0 }
 0x260   : > { %v9259_v40 = vadd.f32 %v9011_v22, %v10281_v61  ;;  %v2977_v46 = vpop.f32.mrb[1].mxu0 }
 0x261   : > { %v9260_v57 = vadd.f32 %v2977_v46, %v10287_v4  ;;  %v9012_v56 = vpop.f32.mrb[2].mxu0 }
 0x262   : > { %v3145_v60 = vadd.f32 %v9259_v40, %v10436_v25  ;;  %v9261_v1 = vadd.f32 %v9012_v56, %v10291_v33  ;;  %v2980_v2 = vpop.f32.mrb[3].mxu0 }
 0x263   : > { %v3143_v14 = vadd.f32 %v9260_v57, %v10436_v25  ;;  %v9262_v15 = vadd.f32 %v2980_v2, %v10293_v34 }
 0x264   : > { %v3177_v20 = vmax.f32 %v3145_v60, 0.0  ;;  %v3146_v6 = vadd.f32 %v9261_v1, %v10436_v25 }
 0x265   : > { %v3175_v26 = vmax.f32 %v3143_v14, 0.0  ;;  %v3144_v61 = vadd.f32 %v9262_v15, %v10436_v25 }
 0x266   : > { %v3273_v27 = vcombine.high %v3177_v20, %v3177_v20  ;;  %v3280_v4 = vrot.slane %v3177_v20, %v10441_v63  ;;  %v10449_v16 = vmax.f32 %v3146_v6, 0.0 }
 0x267   : > { %v3239_v17 = vcombine.high %v3175_v26, %v3175_v26  ;;  %v3246_v30 = vrot.slane %v3175_v26, %v10441_v63  ;;  %v10452_v33 = vmax.f32 %v3144_v61, 0.0  ;;  %v10454_v35 = vpop.f32.mrb[4].mxu0 }
 0x268   : > { %v3287_v34 = vrot.slane %v3273_v27, %v10441_v63  ;;  %v3288_v43 = vcombine.high %v3280_v4, %v3280_v4  ;;  %v3968_v42 = vsel %vm3911_vm3, %v3280_v4, -inf  ;;  %v10460_v55 = vpop.f32.mrb[5].mxu0 }
 0x269   : > { %v3969_v62 = vrot.slane %v3968_v42, 4  ;;  %v3253_v31 = vrot.slane %v3239_v17, %v10441_v63  ;;  %v3254_v50 = vcombine.high %v3246_v30, %v3246_v30  ;;  %v3912_v52 = vsel %vm3911_vm3, %v3246_v30, -inf  ;;  %v10464_v53 = vpop.f32.mrb[6].mxu0 }
 0x26a   : > { %v3289_v8 = vcombine.high %v3287_v34, %v3287_v34  ;;  %v3975_v9 = vsel %vm3911_vm3, %v3288_v43, -inf  ;;  %v3982_v22 = vsel %vm3911_vm3, %v3287_v34, -inf  ;;  %v3913_v40 = vrot.slane %v3912_v52, 4  ;;  %v10468_v46 = vpop.f32.mrb[7].mxu0 }
 0x26b   : > { %v3970_v57 = vmax.f32 %v3968_v42, %v3969_v62  ;;  %v3976_v56 = vrot.slane %v3975_v9, 4  ;;  %v3983_v60 = vrot.slane %v3982_v22, 4  ;;  %v3255_v1 = vcombine.high %v3253_v31, %v3253_v31 }
 0x26c   : > { %v3989_v2 = vsel %vm3911_vm3, %v3289_v8, -inf  ;;  %v3914_v14 = vmax.f32 %v3912_v52, %v3913_v40  ;;  %v3919_v15 = vsel %vm3911_vm3, %v3254_v50, -inf  ;;  %v3926_v20 = vsel %vm3911_vm3, %v3253_v31, -inf }
 0x26d   : > { %v3971_v6 = vrot.slane %v3970_v57, 2  ;;  %v3977_v26 = vmax.f32 %v3975_v9, %v3976_v56  ;;  %v3984_v61 = vmax.f32 %v3982_v22, %v3983_v60  ;;  %v3990_v27 = vrot.slane %v3989_v2, 4 }
 0x26e   : > { %v3915_v4 = vrot.slane %v3914_v14, 2  ;;  %v3920_v17 = vrot.slane %v3919_v15, 4  ;;  %v3927_v30 = vrot.slane %v3926_v20, 4  ;;  %v3933_v34 = vsel %vm3911_vm3, %v3255_v1, -inf }
 0x26f   : > { %v3972_v43 = vmax.f32 %v3970_v57, %v3971_v6  ;;  %v3978_v42 = vrot.slane %v3977_v26, 2  ;;  %v3985_v62 = vrot.slane %v3984_v61, 2  ;;  %v3991_v47 = vmax.f32 %v3989_v2, %v3990_v27  ;;  %v10474_v5 = vpop.f32.mrb[8].mxu0 }
 0x270   : > { %v3916_v52 = vmax.f32 %v3914_v14, %v3915_v4  ;;  %v3921_v8 = vmax.f32 %v3919_v15, %v3920_v17  ;;  %v3928_v50 = vmax.f32 %v3926_v20, %v3927_v30  ;;  %v3934_v40 = vrot.slane %v3933_v34, 4  ;;  %v10476_v31 = vpop.f32.mrb[9].mxu0 }
 0x271   : > { %v3973_v9 = vrot.slane %v3972_v43, 1  ;;  %v3979_v22 = vmax.f32 %v3977_v26, %v3978_v42  ;;  %v3986_v56 = vmax.f32 %v3984_v61, %v3985_v62  ;;  %v3992_v60 = vrot.slane %v3991_v47, 2  ;;  %v10478_v37 = vpop.f32.mrb[10].mxu0  ;;  %v10485_v42 = vld [vmem:[%s11876_s3] ss:$0 sm:$0xff] }
 0x272   : > { %v3917_v41 = vrot.slane %v3916_v52, 1  ;;  %v3922_v1 = vrot.slane %v3921_v8, 2  ;;  %v3929_v57 = vrot.slane %v3928_v50, 2  ;;  %v3935_v6 = vmax.f32 %v3933_v34, %v3934_v40  ;;  %v10480_v12 = vpop.f32.mrb[11].mxu0 }
 0x273   : > { %v3974_v2 = vmax.f32 %v3972_v43, %v3973_v9  ;;  %v3980_v27 = vrot.slane %v3979_v22, 1  ;;  %v3987_v14 = vrot.slane %v3986_v56, 1  ;;  %v3993_v15 = vmax.f32 %v3991_v47, %v3992_v60 }
 0x274   : > { %v3918_v20 = vmax.f32 %v3916_v52, %v3917_v41  ;;  %v3923_v4 = vmax.f32 %v3921_v8, %v3922_v1  ;;  %v3930_v17 = vmax.f32 %v3928_v50, %v3929_v57  ;;  %v3936_v30 = vrot.slane %v3935_v6, 2  ;;  %v10492_v41 = vld [vmem:[%s11877_s4] ss:$0 sm:$0xff] }
 0x275   : > { %v3981_v39 = vmax.f32 %v3979_v22, %v3980_v27  ;;  %v3988_v26 = vmax.f32 %v3986_v56, %v3987_v14  ;;  %v3994_v61 = vrot.slane %v3993_v15, 1  ;;  %v3297_v34 = vrot.slane %v10449_v16, %v10441_v63 }
 0x276   : > { %v3924_v62 = vrot.slane %v3923_v4, 1  ;;  %v3931_v43 = vrot.slane %v3930_v17, 1  ;;  %v3937_v40 = vmax.f32 %v3935_v6, %v3936_v30  ;;  %v4808_v9 = vmax.f32 %v3918_v20, %v3974_v2 }
 0x277   : > { %v3995_v47 = vmax.f32 %v3993_v15, %v3994_v61  ;;  %v11911_v52 = vcombine.high %v10449_v16, %v10449_v16  ;;  %v3305_v50 = vcombine.high %v3297_v34, %v3297_v34  ;;  %v3996_v22 = vsel %vm3911_vm3, %v3297_v34, -inf  ;;  %v10499_v56 = vpop.f32.mrb[12].mxu0 }
 0x278   : > { %v3925_v60 = vmax.f32 %v3923_v4, %v3924_v62  ;;  %v3932_v1 = vmax.f32 %v3930_v17, %v3931_v43  ;;  %v3938_v57 = vrot.slane %v3937_v40, 1  ;;  %v4879_v6 = vmul.f32 %v10485_v42, %v4808_v9  ;;  %v10502_v2 = vpop.f32.mrb[13].mxu0 }
 0x279   : > { %v3304_v8 = vrot.slane %v11911_v52, %v10441_v63  ;;  %v3997_v14 = vrot.slane %v3996_v22, 4  ;;  %v4003_v15 = vsel %vm3911_vm3, %v3305_v50, -inf  ;;  %v10506_v20 = vpop.f32.mrb[14].mxu0 }
 0x27a   : > { %v3939_v30 = vmax.f32 %v3937_v40, %v3938_v57  ;;  %v4809_v61 = vmax.f32 %v3925_v60, %v3981_v39  ;;  %v4810_v34 = vmax.f32 %v3932_v1, %v3988_v26  ;;  %v4950_v4 = vadd.f32 %v10492_v41, %v4879_v6  ;;  %v10509_v17 = vpop.f32.mrb[15].mxu0 }
 0x27b   : > { %v3306_v27 = vcombine.high %v3304_v8, %v3304_v8  ;;  %v4010_v16 = vsel %vm3911_vm3, %v3304_v8, -inf  ;;  %v3998_v62 = vmax.f32 %v3996_v22, %v3997_v14  ;;  %v4004_v43 = vrot.slane %v4003_v15, 4 }
 0x27c   : > { %v4011_v9 = vrot.slane %v4010_v16, 4  ;;  %v4811_v23 = vmax.f32 %v3939_v30, %v3995_v47  ;;  %v4880_v50 = vmul.f32 %v10485_v42, %v4809_v61  ;;  %v4881_v8 = vmul.f32 %v10485_v42, %v4810_v34 }
 0x27d   : > { %v4017_v52 = vsel %vm3911_vm3, %v3306_v27, -inf  ;;  %v3999_v3 = vrot.slane %v3998_v62, 2  ;;  %v4005_v40 = vmax.f32 %v4003_v15, %v4004_v43  ;;  %v3256_v26 = vcombine.high %v10452_v33, %v10452_v33 }
 0x27e   : > { %v4018_v11 = vrot.slane %v4017_v52, 4  ;;  %v4012_v39 = vmax.f32 %v4010_v16, %v4011_v9  ;;  %v4882_v60 = vmul.f32 %v10485_v42, %v4811_v23  ;;  %v4951_v22 = vadd.f32 %v10492_v41, %v4880_v50 }
 0x27f   : > { %v4952_v1 = vadd.f32 %v10492_v41, %v4881_v8  ;;  %v4000_v6 = vmax.f32 %v3998_v62, %v3999_v3  ;;  %v4006_v47 = vrot.slane %v4005_v40, 2  ;;  %v3263_v14 = vrot.slane %v10452_v33, %v10441_v63 }
 0x280   : > { %v4019_v57 = vmax.f32 %v4017_v52, %v4018_v11  ;;  %v4013_v27 = vrot.slane %v4012_v39, 2  ;;  %v4953_v30 = vadd.f32 %v10492_v41, %v4882_v60  ;;  %v5099_v15 = vrot.slane %v4951_v22, 7 }
 0x281   : > { %v5102_v16 = vrot.slane %v4952_v1, 6  ;;  %v4001_v34 = vrot.slane %v4000_v6, 1  ;;  %v4007_v43 = vmax.f32 %v4005_v40, %v4006_v47  ;;  %v3270_v23 = vrot.slane %v3256_v26, %v10441_v63 }
 0x282   : > { %v4020_v61 = vrot.slane %v4019_v57, 2  ;;  %v4014_v9 = vmax.f32 %v4012_v39, %v4013_v27  ;;  %v5101_v50 = vsel %vm5100_vm5, %v5099_v15, %v4950_v4  ;;  %v5105_v8 = vrot.slane %v4953_v30, 5 }
 0x283   : > { %v3271_v3 = vcombine.high %v3263_v14, %v3263_v14  ;;  %v5104_v62 = vsel %vm5103_vm6, %v5102_v16, %v5101_v50  ;;  %v10525_v52 = vmax.f32 %v4000_v6, %v4001_v34  ;;  %v4008_v33 = vrot.slane %v4007_v43, 1 }
 0x284   : > { %v4021_v11 = vmax.f32 %v4019_v57, %v4020_v61  ;;  %v4015_v54 = vrot.slane %v4014_v9, 1  ;;  %v3272_v22 = vcombine.high %v3270_v23, %v3270_v23  ;;  %v3940_v1 = vsel %vm3911_vm3, %v3263_v14, -inf }
 0x285   : > { %v3947_v40 = vsel %vm3911_vm3, %v3271_v3, -inf  ;;  %v10529_v39 = vmax.f32 %v4007_v43, %v4008_v33  ;;  %v3941_v4 = vrot.slane %v3940_v1, 4  ;;  %v3954_v27 = vsel %vm3911_vm3, %v3270_v23, -inf }
 0x286   : > { %v4022_v60 = vrot.slane %v4021_v11, 1  ;;  %v10531_v26 = vmax.f32 %v4014_v9, %v4015_v54  ;;  %v3948_v47 = vrot.slane %v3947_v40, 4  ;;  %v3961_v6 = vsel %vm3911_vm3, %v3272_v22, -inf }
 0x287   : > { %v10538_v30 = vsel %vm5106_vm7, %v5105_v8, %v5104_v62  ;;  %v3942_v15 = vmax.f32 %v3940_v1, %v3941_v4  ;;  %v3955_v14 = vrot.slane %v3954_v27, 4  ;;  %v3962_v61 = vrot.slane %v3961_v6, 4 }
 0x288   : > { %v10533_v57 = vmax.f32 %v4021_v11, %v4022_v60  ;;  %v3949_v16 = vmax.f32 %v3947_v40, %v3948_v47  ;;  %v9263_v34 = vadd.f32 %v10454_v35, %v10296_v51  ;;  %v9264_v54 = vadd.f32 %v10460_v55, %v10301_v7  ;;  %v10552_v35 = vpop.f32.mrb[16].mxu0 }
 0x289   : > { %v9265_v43 = vadd.f32 %v10464_v53, %v10305_v10  ;;  %v9266_v9 = vadd.f32 %v10468_v46, %v10307_v21  ;;  %v3943_v23 = vrot.slane %v3942_v15, 2  ;;  %v3956_v8 = vmax.f32 %v3954_v27, %v3955_v14  ;;  %v10558_v1 = vpop.f32.mrb[17].mxu0 }
 0x28a   : > { %v3950_v50 = vrot.slane %v3949_v16, 2  ;;  %v3963_v11 = vmax.f32 %v3961_v6, %v3962_v61  ;;  %v3149_v3 = vadd.f32 %v9263_v34, %v10436_v25  ;;  %v3147_v62 = vadd.f32 %v9264_v54, %v10436_v25 }
 0x28b   : > { %v3150_v33 = vadd.f32 %v9265_v43, %v10436_v25  ;;  %v3148_v51 = vadd.f32 %v9266_v9, %v10436_v25  ;;  %v3944_v7 = vmax.f32 %v3942_v15, %v3943_v23  ;;  %v3957_v10 = vrot.slane %v3956_v8, 2 }
 0x28c   : > { %v3951_v55 = vmax.f32 %v3949_v16, %v3950_v50  ;;  %v3964_v53 = vrot.slane %v3963_v11, 2  ;;  %v3181_v60 = vmax.f32 %v3149_v3, 0.0  ;;  %v3179_v21 = vmax.f32 %v3147_v62, 0.0 }
 0x28d   : > { %v10554_v46 = vmax.f32 %v3150_v33, 0.0  ;;  %v10556_v22 = vmax.f32 %v3148_v51, 0.0  ;;  %v3945_v40 = vrot.slane %v3944_v7, 1  ;;  %v3958_v47 = vmax.f32 %v3956_v8, %v3957_v10 }
 0x28e   : > { %v3952_v4 = vrot.slane %v3951_v55, 1  ;;  %v3965_v27 = vmax.f32 %v3963_v11, %v3964_v53  ;;  %v3341_v6 = vcombine.high %v3181_v60, %v3181_v60  ;;  %v3348_v14 = vrot.slane %v3181_v60, %v10441_v63 }
 0x28f   : > { %v3307_v15 = vcombine.high %v3179_v21, %v3179_v21  ;;  %v10562_v16 = vrot.slane %v3179_v21, %v10441_v63  ;;  %v3946_v61 = vmax.f32 %v3944_v7, %v3945_v40  ;;  %v3959_v54 = vrot.slane %v3958_v47, 1 }
 0x290   : > { %v3953_v34 = vmax.f32 %v3951_v55, %v3952_v4  ;;  %v3966_v43 = vrot.slane %v3965_v27, 1  ;;  %v3355_v9 = vrot.slane %v3341_v6, %v10441_v63  ;;  %v3356_v23 = vcombine.high %v3348_v14, %v3348_v14 }
 0x291   : > { %v4080_v50 = vsel %vm3911_vm3, %v3348_v14, -inf  ;;  %v10567_v8 = vrot.slane %v3307_v15, %v10441_v63  ;;  %v3960_v11 = vmax.f32 %v3958_v47, %v3959_v54  ;;  %v4812_v62 = vmax.f32 %v3946_v61, %v10525_v52 }
 0x292   : > { %v3967_v3 = vmax.f32 %v3965_v27, %v3966_v43  ;;  %v4813_v33 = vmax.f32 %v3953_v34, %v10529_v39  ;;  %v3357_v51 = vcombine.high %v3355_v9, %v3355_v9  ;;  %v4081_v7 = vrot.slane %v4080_v50, 4 }
 0x293   : > { %v4087_v55 = vsel %vm3911_vm3, %v3356_v23, -inf  ;;  %v4094_v10 = vsel %vm3911_vm3, %v3355_v9, -inf  ;;  %v4814_v53 = vmax.f32 %v3960_v11, %v10531_v26  ;;  %v4883_v21 = vmul.f32 %v10485_v42, %v4812_v62 }
 0x294   : > { %v4815_v60 = vmax.f32 %v3967_v3, %v10533_v57  ;;  %v4884_v40 = vmul.f32 %v10485_v42, %v4813_v33  ;;  %v4082_v4 = vmax.f32 %v4080_v50, %v4081_v7  ;;  %v4088_v47 = vrot.slane %v4087_v55, 4 }
 0x295   : > { %v4095_v52 = vrot.slane %v4094_v10, 4  ;;  %v4101_v39 = vsel %vm3911_vm3, %v3357_v51, -inf  ;;  %v4885_v27 = vmul.f32 %v10485_v42, %v4814_v53  ;;  %v4954_v14 = vadd.f32 %v10492_v41, %v4883_v21 }
 0x296   : > { %v4886_v6 = vmul.f32 %v10485_v42, %v4815_v60  ;;  %v4955_v15 = vadd.f32 %v10492_v41, %v4884_v40  ;;  %v4083_v26 = vrot.slane %v4082_v4, 2  ;;  %v4089_v61 = vmax.f32 %v4087_v55, %v4088_v47 }
 0x297   : > { %v4096_v57 = vmax.f32 %v4094_v10, %v4095_v52  ;;  %v4102_v34 = vrot.slane %v4101_v39, 4  ;;  %v4956_v54 = vadd.f32 %v10492_v41, %v4885_v27  ;;  %v5108_v9 = vrot.slane %v4954_v14, 4  ;;  %v10597_v14 = vpop.f32.mrb[18].mxu0 }
 0x298   : > { %v4957_v43 = vadd.f32 %v10492_v41, %v4886_v6  ;;  %v5111_v23 = vrot.slane %v4955_v15, 3  ;;  %v4084_v50 = vmax.f32 %v4082_v4, %v4083_v26  ;;  %v4090_v11 = vrot.slane %v4089_v61, 2 }
 0x299   : > { %v4097_v3 = vrot.slane %v4096_v57, 2  ;;  %v4103_v62 = vmax.f32 %v4101_v39, %v4102_v34  ;;  %v5110_v33 = vsel %vm5109_vm8, %v5108_v9, %v10538_v30  ;;  %v5114_v51 = vrot.slane %v4956_v54, 2 }
 0x29a   : > { %v5117_v7 = vrot.slane %v4957_v43, 1  ;;  %v3322_v55 = vcombine.high %v10562_v16, %v10562_v16  ;;  %v5113_v10 = vsel %vm5112_vm9, %v5111_v23, %v5110_v33  ;;  %v4085_v53 = vrot.slane %v4084_v50, 1 }
 0x29b   : > { %v4091_v60 = vmax.f32 %v4089_v61, %v4090_v11  ;;  %v4098_v21 = vmax.f32 %v4096_v57, %v4097_v3  ;;  %v5116_v40 = vsel %vm5115_vm10, %v5114_v51, %v5113_v10  ;;  %v4104_v47 = vrot.slane %v4103_v62, 2 }
 0x29c   : > { %v3323_v4 = vcombine.high %v10567_v8, %v10567_v8  ;;  %v4024_v52 = vsel %vm3911_vm3, %v10562_v16, -inf  ;;  %v5119_v30 = vsel %vm5118_vm11, %v5117_v7, %v5116_v40  ;;  %v10595_v39 = vmax.f32 %v4084_v50, %v4085_v53 }
 0x29d   : > { %v4092_v27 = vrot.slane %v4091_v60, 1  ;;  %v4099_v6 = vrot.slane %v4098_v21, 1  ;;  %5227 = vst.msk [vmem:[#allocation2 + $0x11] sm:$0xff] %vm5014_vm4, %v5119_v30  ;;  %v4105_v15 = vmax.f32 %v4103_v62, %v4104_v47  ;;  %v4025_v26 = vrot.slane %v4024_v52, 4 }
 0x29e   : > { %v4031_v61 = vsel %vm3911_vm3, %v3322_v55, -inf  ;;  %v4038_v57 = vsel %vm3911_vm3, %v10567_v8, -inf  ;;  %v4045_v50 = vsel %vm3911_vm3, %v3323_v4, -inf  ;;  %v3358_v11 = vcombine.high %v10554_v46, %v10554_v46 }
 0x29f   : > { %v4093_v34 = vmax.f32 %v4091_v60, %v4092_v27  ;;  %v4100_v54 = vmax.f32 %v4098_v21, %v4099_v6  ;;  %v4032_v16 = vrot.slane %v4031_v61, 4  ;;  %v4039_v43 = vrot.slane %v4038_v57, 4 }
 0x2a0   : > { %v4106_v9 = vrot.slane %v4105_v15, 1  ;;  %v4026_v23 = vmax.f32 %v4024_v52, %v4025_v26  ;;  %v4046_v62 = vrot.slane %v4045_v50, 4  ;;  %v3365_v51 = vrot.slane %v10554_v46, %v10441_v63 }
 0x2a1   : > { %v4033_v3 = vmax.f32 %v4031_v61, %v4032_v16  ;;  %v4040_v33 = vmax.f32 %v4038_v57, %v4039_v43  ;;  %v3372_v8 = vrot.slane %v3358_v11, %v10441_v63  ;;  %v3324_v10 = vcombine.high %v10556_v22, %v10556_v22 }
 0x2a2   : > { %v4107_v7 = vmax.f32 %v4105_v15, %v4106_v9  ;;  %v4027_v55 = vrot.slane %v4026_v23, 2  ;;  %v4047_v21 = vmax.f32 %v4045_v50, %v4046_v62  ;;  %v3373_v40 = vcombine.high %v3365_v51, %v3365_v51 }
 0x2a3   : > { %v4034_v53 = vrot.slane %v4033_v3, 2  ;;  %v4041_v60 = vrot.slane %v4040_v33, 2  ;;  %v3374_v4 = vcombine.high %v3372_v8, %v3372_v8  ;;  %v4108_v52 = vsel %vm3911_vm3, %v3365_v51, -inf }
 0x2a4   : > { %v4028_v47 = vmax.f32 %v4026_v23, %v4027_v55  ;;  %v4122_v30 = vsel %vm3911_vm3, %v3372_v8, -inf  ;;  %v4048_v46 = vrot.slane %v4047_v21, 2  ;;  %v4109_v15 = vrot.slane %v4108_v52, 4  ;;  %v10615_v23 = vpop.f32.mrb[19].mxu0 }
 0x2a5   : > { %v4035_v27 = vmax.f32 %v4033_v3, %v4034_v53  ;;  %v4042_v6 = vmax.f32 %v4040_v33, %v4041_v60  ;;  %v4115_v61 = vsel %vm3911_vm3, %v3373_v40, -inf  ;;  %v4123_v57 = vrot.slane %v4122_v30, 4 }
 0x2a6   : > { %v4029_v26 = vrot.slane %v4028_v47, 1  ;;  %v4129_v16 = vsel %vm3911_vm3, %v3374_v4, -inf  ;;  %v4049_v50 = vmax.f32 %v4047_v21, %v4048_v46  ;;  %v4110_v11 = vmax.f32 %v4108_v52, %v4109_v15 }
 0x2a7   : > { %v4036_v43 = vrot.slane %v4035_v27, 1  ;;  %v4043_v9 = vrot.slane %v4042_v6, 1  ;;  %v4116_v51 = vrot.slane %v4115_v61, 4  ;;  %v4124_v55 = vmax.f32 %v4122_v30, %v4123_v57 }
 0x2a8   : > { %v4030_v62 = vmax.f32 %v4028_v47, %v4029_v26  ;;  %v4130_v8 = vrot.slane %v4129_v16, 4  ;;  %v4050_v53 = vrot.slane %v4049_v50, 1  ;;  %v4111_v60 = vrot.slane %v4110_v11, 2 }
 0x2a9   : > { %v4037_v3 = vmax.f32 %v4035_v27, %v4036_v43  ;;  %v4044_v33 = vmax.f32 %v4042_v6, %v4043_v9  ;;  %v4117_v40 = vmax.f32 %v4115_v61, %v4116_v51  ;;  %v4125_v44 = vrot.slane %v4124_v55, 2 }
 0x2aa   : > { %v4816_v45 = vmax.f32 %v4030_v62, %v10595_v39  ;;  %v4131_v32 = vmax.f32 %v4129_v16, %v4130_v8  ;;  %v4051_v4 = vmax.f32 %v4049_v50, %v4050_v53  ;;  %v4112_v21 = vmax.f32 %v4110_v11, %v4111_v60 }
 0x2ab   : > { %v4817_v36 = vmax.f32 %v4037_v3, %v4093_v34  ;;  %v4818_v29 = vmax.f32 %v4044_v33, %v4100_v54  ;;  %v4118_v46 = vrot.slane %v4117_v40, 2  ;;  %v4126_v47 = vmax.f32 %v4124_v55, %v4125_v44 }
 0x2ac   : > { %v4887_v52 = vmul.f32 %v10485_v42, %v4816_v45  ;;  %v4132_v15 = vrot.slane %v4131_v32, 2  ;;  %v4819_v30 = vmax.f32 %v4051_v4, %v4107_v7  ;;  %v4113_v26 = vrot.slane %v4112_v21, 1 }
 0x2ad   : > { %v4888_v27 = vmul.f32 %v10485_v42, %v4817_v36  ;;  %v4889_v6 = vmul.f32 %v10485_v42, %v4818_v29  ;;  %v4119_v61 = vmax.f32 %v4117_v40, %v4118_v46  ;;  %v4127_v57 = vrot.slane %v4126_v47, 1 }
 0x2ae   : > { %v4958_v39 = vadd.f32 %v10492_v41, %v4887_v52  ;;  %v4133_v16 = vmax.f32 %v4131_v32, %v4132_v15  ;;  %v4890_v34 = vmul.f32 %v10485_v42, %v4819_v30  ;;  %v10625_v43 = vmax.f32 %v4112_v21, %v4113_v26 }
 0x2af   : > { %v4959_v54 = vadd.f32 %v10492_v41, %v4888_v27  ;;  %v4960_v45 = vadd.f32 %v10492_v41, %v4889_v6  ;;  %v4120_v44 = vrot.slane %v4119_v61, 1  ;;  %v10627_v7 = vmax.f32 %v4126_v47, %v4127_v57 }
 0x2b0   : > { %v4134_v36 = vrot.slane %v4133_v16, 1  ;;  %v3331_v29 = vrot.slane %v10556_v22, %v10441_v63  ;;  %v4961_v9 = vadd.f32 %v10492_v41, %v4890_v34  ;;  %v3338_v32 = vrot.slane %v3324_v10, %v10441_v63 }
 0x2b1   : > { %v5120_v50 = vrot.slane %v4959_v54, 7  ;;  %v5122_v11 = vrot.slane %v4960_v45, 6  ;;  %v10633_v62 = vmax.f32 %v4119_v61, %v4120_v44  ;;  %v9267_v10 = vadd.f32 %v10474_v5, %v10310_v38  ;;  %v10653_v5 = vpop.f32.mrb[20].mxu0 }
 0x2b2   : > { %v10635_v51 = vmax.f32 %v4133_v16, %v4134_v36  ;;  %v3339_v55 = vcombine.high %v3331_v29, %v3331_v29  ;;  %v4052_v8 = vsel %vm3911_vm3, %v3331_v29, -inf  ;;  %v5124_v33 = vrot.slane %v4961_v9, 5 }
 0x2b3   : > { %v5121_v3 = vsel %vm5100_vm5, %v5120_v50, %v4958_v39  ;;  %v3340_v53 = vcombine.high %v3338_v32, %v3338_v32  ;;  %v4053_v60 = vrot.slane %v4052_v8, 4  ;;  %v4066_v4 = vsel %vm3911_vm3, %v3338_v32, -inf }
 0x2b4   : > { %v5123_v22 = vsel %vm5103_vm6, %v5122_v11, %v5121_v3  ;;  %v4059_v40 = vsel %vm3911_vm3, %v3339_v55, -inf  ;;  %v4067_v46 = vrot.slane %v4066_v4, 4  ;;  %v3153_v27 = vadd.f32 %v9267_v10, %v10436_v25 }
 0x2b5   : > { %v4054_v21 = vmax.f32 %v4052_v8, %v4053_v60  ;;  %v4060_v52 = vrot.slane %v4059_v40, 4  ;;  %v4073_v47 = vsel %vm3911_vm3, %v3340_v53, -inf  ;;  %v10646_v30 = vsel %vm5106_vm7, %v5124_v33, %v5123_v22 }
 0x2b6   : > { %v4074_v15 = vrot.slane %v4073_v47, 4  ;;  %v9268_v6 = vadd.f32 %v10476_v31, %v10315_v49  ;;  %v4068_v61 = vmax.f32 %v4066_v4, %v4067_v46  ;;  %v9269_v38 = vadd.f32 %v10478_v37, %v10319_v58 }
 0x2b7   : > { %v4055_v26 = vrot.slane %v4054_v21, 2  ;;  %v4061_v39 = vmax.f32 %v4059_v40, %v4060_v52  ;;  %v3185_v16 = vmax.f32 %v3153_v27, 0.0  ;;  %v10658_v54 = vadd.f32 %v10480_v12, %v10321_v59 }
 0x2b8   : > { %v4075_v57 = vmax.f32 %v4073_v47, %v4074_v15  ;;  %v3151_v34 = vadd.f32 %v9268_v6, %v10436_v25  ;;  %v4069_v36 = vrot.slane %v4068_v61, 2  ;;  %v3154_v49 = vadd.f32 %v9269_v38, %v10436_v25 }
 0x2b9   : > { %v4056_v45 = vmax.f32 %v4054_v21, %v4055_v26  ;;  %v4062_v44 = vrot.slane %v4061_v39, 2  ;;  %v3409_v29 = vcombine.high %v3185_v16, %v3185_v16  ;;  %v3416_v9 = vrot.slane %v3185_v16, %v10441_v63  ;;  %v10670_v21 = vpop.f32.mrb[21].mxu0 }
 0x2ba   : > { %v4076_v31 = vrot.slane %v4075_v57, 2  ;;  %v10662_v58 = vmax.f32 %v3151_v34, 0.0  ;;  %v4070_v11 = vmax.f32 %v4068_v61, %v4069_v36  ;;  %v10664_v32 = vmax.f32 %v3154_v49, 0.0 }
 0x2bb   : > { %v4057_v37 = vrot.slane %v4056_v45, 1  ;;  %v4063_v50 = vmax.f32 %v4061_v39, %v4062_v44  ;;  %v3423_v59 = vrot.slane %v3409_v29, %v10441_v63  ;;  %v3424_v12 = vcombine.high %v3416_v9, %v3416_v9 }
 0x2bc   : > { %v4077_v55 = vmax.f32 %v4075_v57, %v4076_v31  ;;  %v4192_v8 = vsel %vm3911_vm3, %v3416_v9, -inf  ;;  %v4071_v53 = vrot.slane %v4070_v11, 1 }
 0x2bd   : > { %v4058_v3 = vmax.f32 %v4056_v45, %v4057_v37  ;;  %v4064_v33 = vrot.slane %v4063_v50, 1  ;;  %v4193_v60 = vrot.slane %v4192_v8, 4  ;;  %v3425_v40 = vcombine.high %v3423_v59, %v3423_v59 }
 0x2be   : > { %v4078_v22 = vrot.slane %v4077_v55, 1  ;;  %v4199_v4 = vsel %vm3911_vm3, %v3424_v12, -inf  ;;  %v4206_v10 = vsel %vm3911_vm3, %v3423_v59, -inf  ;;  %v4072_v46 = vmax.f32 %v4070_v11, %v4071_v53 }
 0x2bf   : > { %v4065_v52 = vmax.f32 %v4063_v50, %v4064_v33  ;;  %v4820_v47 = vmax.f32 %v4058_v3, %v10625_v43  ;;  %v4194_v15 = vmax.f32 %v4192_v8, %v4193_v60  ;;  %v4200_v6 = vrot.slane %v4199_v4, 4 }
 0x2c0   : > { %v4079_v27 = vmax.f32 %v4077_v55, %v4078_v22  ;;  %v4207_v26 = vrot.slane %v4206_v10, 4  ;;  %v4213_v39 = vsel %vm3911_vm3, %v3425_v40, -inf  ;;  %v4822_v38 = vmax.f32 %v4072_v46, %v10627_v7 }
 0x2c1   : > { %v4821_v61 = vmax.f32 %v4065_v52, %v10633_v62  ;;  %v4891_v57 = vmul.f32 %v10485_v42, %v4820_v47  ;;  %v4195_v16 = vrot.slane %v4194_v15, 2  ;;  %v4201_v45 = vmax.f32 %v4199_v4, %v4200_v6 }
 0x2c2   : > { %v4823_v34 = vmax.f32 %v4079_v27, %v10635_v51  ;;  %v4208_v44 = vmax.f32 %v4206_v10, %v4207_v26  ;;  %v4214_v36 = vrot.slane %v4213_v39, 4  ;;  %v4893_v49 = vmul.f32 %v10485_v42, %v4822_v38 }
 0x2c3   : > { %v4892_v43 = vmul.f32 %v10485_v42, %v4821_v61  ;;  %v4962_v31 = vadd.f32 %v10492_v41, %v4891_v57  ;;  %v4196_v29 = vmax.f32 %v4194_v15, %v4195_v16  ;;  %v4202_v62 = vrot.slane %v4201_v45, 2 }
 0x2c4   : > { %v4894_v9 = vmul.f32 %v10485_v42, %v4823_v34  ;;  %v4209_v37 = vrot.slane %v4208_v44, 2  ;;  %v4215_v7 = vmax.f32 %v4213_v39, %v4214_v36  ;;  %v4964_v11 = vadd.f32 %v10492_v41, %v4893_v49  ;;  %v10704_v34 = vpop.f32.mrb[22].mxu0 }
 0x2c5   : > { %v4963_v50 = vadd.f32 %v10492_v41, %v4892_v43  ;;  %v5126_v51 = vrot.slane %v4962_v31, 4  ;;  %v4197_v55 = vrot.slane %v4196_v29, 1  ;;  %v4203_v12 = vmax.f32 %v4201_v45, %v4202_v62 }
 0x2c6   : > { %v4965_v59 = vadd.f32 %v10492_v41, %v4894_v9  ;;  %v4210_v8 = vmax.f32 %v4208_v44, %v4209_v37  ;;  %v4216_v3 = vrot.slane %v4215_v7, 2  ;;  %v5130_v60 = vrot.slane %v4964_v11, 2 }
 0x2c7   : > { %v5127_v33 = vsel %vm5109_vm8, %v5126_v51, %v10646_v30  ;;  %v5128_v53 = vrot.slane %v4963_v50, 3  ;;  %v10687_v22 = vmax.f32 %v4196_v29, %v4197_v55  ;;  %v4204_v4 = vrot.slane %v4203_v12, 1 }
 0x2c8   : > { %v5132_v40 = vrot.slane %v4965_v59, 1  ;;  %v4211_v10 = vrot.slane %v4210_v8, 1  ;;  %v4217_v52 = vmax.f32 %v4215_v7, %v4216_v3  ;;  %v3375_v47 = vcombine.high %v10662_v58, %v10662_v58 }
 0x2c9   : > { %v5129_v46 = vsel %vm5112_vm9, %v5128_v53, %v5127_v33  ;;  %v3382_v15 = vrot.slane %v10662_v58, %v10441_v63  ;;  %v3426_v27 = vcombine.high %v10664_v32, %v10664_v32  ;;  %v10697_v6 = vmax.f32 %v4203_v12, %v4204_v4 }
 0x2ca   : > { %v5131_v30 = vsel %vm5115_vm10, %v5130_v60, %v5129_v46  ;;  %v10699_v26 = vmax.f32 %v4210_v8, %v4211_v10  ;;  %v4218_v39 = vrot.slane %v4217_v52, 1  ;;  %v3389_v38 = vrot.slane %v3375_v47, %v10441_v63 }
 0x2cb   : > { %v5133_v61 = vsel %vm5118_vm11, %v5132_v40, %v5131_v30  ;;  %v3390_v57 = vcombine.high %v3382_v15, %v3382_v15  ;;  %v4136_v16 = vsel %vm3911_vm3, %v3382_v15, -inf  ;;  %v3433_v44 = vrot.slane %v10664_v32, %v10441_v63  ;;  %v10723_v15 = vpop.f32.mrb[23].mxu0 }
 0x2cc   : > { %5228 = vst.msk [vmem:[#allocation2 + $0x21] sm:$0xff] %vm5014_vm4, %v5133_v61  ;;  %v10707_v58 = vmax.f32 %v4217_v52, %v4218_v39  ;;  %v4137_v45 = vrot.slane %v4136_v16, 4  ;;  %v3440_v36 = vrot.slane %v3426_v27, %v10441_v63  ;;  %v3391_v43 = vcombine.high %v3389_v38, %v3389_v38 }
 0x2cd   : > { %v4143_v49 = vsel %vm3911_vm3, %v3390_v57, -inf  ;;  %v4150_v31 = vsel %vm3911_vm3, %v3389_v38, -inf  ;;  %v10716_v29 = vadd.f32 %v10658_v54, %v10436_v25  ;;  %v3441_v7 = vcombine.high %v3433_v44, %v3433_v44 }
 0x2ce   : > { %v4138_v9 = vmax.f32 %v4136_v16, %v4137_v45  ;;  %v4144_v62 = vrot.slane %v4143_v49, 4  ;;  %v4151_v37 = vrot.slane %v4150_v31, 4  ;;  %v4157_v50 = vsel %vm3911_vm3, %v3391_v43, -inf }
 0x2cf   : > { %v3442_v11 = vcombine.high %v3440_v36, %v3440_v36  ;;  %v4220_v32 = vsel %vm3911_vm3, %v3433_v44, -inf  ;;  %v4234_v51 = vsel %vm3911_vm3, %v3440_v36, -inf  ;;  %v4158_v8 = vrot.slane %v4157_v50, 4 }
 0x2d0   : > { %v4139_v55 = vrot.slane %v4138_v9, 2  ;;  %v4145_v59 = vmax.f32 %v4143_v49, %v4144_v62  ;;  %v4152_v12 = vmax.f32 %v4150_v31, %v4151_v37  ;;  %v4221_v3 = vrot.slane %v4220_v32, 4 }
 0x2d1   : > { %v4227_v33 = vsel %vm3911_vm3, %v3441_v7, -inf  ;;  %v4235_v25 = vrot.slane %v4234_v51, 4  ;;  %v4241_v54 = vsel %vm3911_vm3, %v3442_v11, -inf  ;;  %v4159_v4 = vmax.f32 %v4157_v50, %v4158_v8 }
 0x2d2   : > { %v4140_v53 = vmax.f32 %v4138_v9, %v4139_v55  ;;  %v4146_v60 = vrot.slane %v4145_v59, 2  ;;  %v4153_v40 = vrot.slane %v4152_v12, 2  ;;  %v4222_v10 = vmax.f32 %v4220_v32, %v4221_v3 }
 0x2d3   : > { %v4228_v52 = vrot.slane %v4227_v33, 4  ;;  %v4236_v46 = vmax.f32 %v4234_v51, %v4235_v25  ;;  %v4242_v47 = vrot.slane %v4241_v54, 4  ;;  %v4160_v61 = vrot.slane %v4159_v4, 2 }
 0x2d4   : > { %v4141_v27 = vrot.slane %v4140_v53, 1  ;;  %v4147_v30 = vmax.f32 %v4145_v59, %v4146_v60  ;;  %v4154_v39 = vmax.f32 %v4152_v12, %v4153_v40  ;;  %v4223_v38 = vrot.slane %v4222_v10, 2 }
 0x2d5   : > { %v4229_v57 = vmax.f32 %v4227_v33, %v4228_v52  ;;  %v4237_v16 = vrot.slane %v4236_v46, 2  ;;  %v4243_v45 = vmax.f32 %v4241_v54, %v4242_v47  ;;  %v4161_v49 = vmax.f32 %v4159_v4, %v4160_v61 }
 0x2d6   : > { %v4142_v44 = vmax.f32 %v4140_v53, %v4141_v27  ;;  %v4148_v36 = vrot.slane %v4147_v30, 1  ;;  %v4155_v43 = vrot.slane %v4154_v39, 1  ;;  %v4224_v31 = vmax.f32 %v4222_v10, %v4223_v38 }
 0x2d7   : > { %v4230_v9 = vrot.slane %v4229_v57, 2  ;;  %v4238_v62 = vmax.f32 %v4236_v46, %v4237_v16  ;;  %v4244_v37 = vrot.slane %v4243_v45, 2  ;;  %v4162_v11 = vrot.slane %v4161_v49, 1 }
 0x2d8   : > { %v4149_v7 = vmax.f32 %v4147_v30, %v4148_v36  ;;  %v4156_v50 = vmax.f32 %v4154_v39, %v4155_v43  ;;  %v4824_v32 = vmax.f32 %v4142_v44, %v10687_v22  ;;  %v4225_v51 = vrot.slane %v4224_v31, 1 }
 0x2d9   : > { %v4231_v55 = vmax.f32 %v4229_v57, %v4230_v9  ;;  %v4239_v59 = vrot.slane %v4238_v62, 1  ;;  %v4245_v12 = vmax.f32 %v4243_v45, %v4244_v37  ;;  %v4163_v8 = vmax.f32 %v4161_v49, %v4162_v11  ;;  %v10753_v57 = vld [vmem:[%s11875_s2] ss:$0 sm:$0xff] }
 0x2da   : > { %v4825_v3 = vmax.f32 %v4149_v7, %v10697_v6  ;;  %v4826_v33 = vmax.f32 %v4156_v50, %v10699_v26  ;;  %v4895_v25 = vmul.f32 %v10485_v42, %v4824_v32  ;;  %v10729_v54 = vmax.f32 %v4224_v31, %v4225_v51 }
 0x2db   : > { %v4232_v53 = vrot.slane %v4231_v55, 1  ;;  %v10731_v60 = vmax.f32 %v4238_v62, %v4239_v59  ;;  %v4246_v40 = vrot.slane %v4245_v12, 1  ;;  %v4827_v4 = vmax.f32 %v4163_v8, %v10707_v58 }
 0x2dc   : > { %v4896_v22 = vmul.f32 %v10485_v42, %v4825_v3  ;;  %v4897_v10 = vmul.f32 %v10485_v42, %v4826_v33  ;;  %v4966_v52 = vadd.f32 %v10492_v41, %v4895_v25  ;;  %v3184_v26 = vmax.f32 %v10716_v29, 0.0 }
 0x2dd   : > { %v10737_v46 = vmax.f32 %v4231_v55, %v4232_v53  ;;  %v10739_v6 = vmax.f32 %v4245_v12, %v4246_v40  ;;  %v9271_v47 = vadd.f32 %v10499_v56, %v10324_v0  ;;  %v4898_v27 = vmul.f32 %v10485_v42, %v4827_v4  ;;  %v10777_v12 = vpop.f32.mrb[24].mxu0 }
 0x2de   : > { %v4967_v30 = vadd.f32 %v10492_v41, %v4896_v22  ;;  %v4968_v58 = vadd.f32 %v10492_v41, %v4897_v10  ;;  %v9272_v39 = vadd.f32 %v10502_v2, %v10329_v13  ;;  %v3392_v61 = vcombine.high %v3184_v26, %v3184_v26 }
 0x2df   : > { %v3399_v38 = vrot.slane %v3184_v26, %v10441_v63  ;;  %v3157_v29 = vadd.f32 %v10753_v57, %v9271_v47  ;;  %v10758_v0 = vadd.f32 %v10506_v20, %v10333_v18  ;;  %v4969_v42 = vadd.f32 %v10492_v41, %v4898_v27  ;;  %v10785_v27 = vpop.f32.mrb[25].mxu0 }
 0x2e0   : > { %v5134_v56 = vrot.slane %v4967_v30, 7  ;;  %v5136_v16 = vrot.slane %v4968_v58, 6  ;;  %v3155_v13 = vadd.f32 %v10753_v57, %v9272_v39  ;;  %v3406_v2 = vrot.slane %v3392_v61, %v10441_v63 }
 0x2e1   : > { %v3407_v45 = vcombine.high %v3399_v38, %v3399_v38  ;;  %v4164_v44 = vsel %vm3911_vm3, %v3399_v38, -inf  ;;  %v3189_v36 = vmax.f32 %v3157_v29, 0.0  ;;  %v5138_v49 = vrot.slane %v4969_v42, 5 }
 0x2e2   : > { %v5135_v43 = vsel %vm5100_vm5, %v5134_v56, %v4966_v52  ;;  %v4165_v31 = vrot.slane %v4164_v44, 4  ;;  %v10765_v9 = vmax.f32 %v3155_v13, 0.0  ;;  %v3408_v20 = vcombine.high %v3406_v2, %v3406_v2 }
 0x2e3   : > { %v5137_v18 = vsel %vm5103_vm6, %v5136_v16, %v5135_v43  ;;  %v4171_v41 = vsel %vm3911_vm3, %v3407_v45, -inf  ;;  %v4178_v62 = vsel %vm3911_vm3, %v3406_v2, -inf  ;;  %v3477_v51 = vcombine.high %v3189_v36, %v3189_v36 }
 0x2e4   : > { %v4166_v37 = vmax.f32 %v4164_v44, %v4165_v31  ;;  %v4172_v7 = vrot.slane %v4171_v41, 4  ;;  %v4179_v50 = vrot.slane %v4178_v62, 4  ;;  %v10771_v11 = vsel %vm5106_vm7, %v5138_v49, %v5137_v18 }
 0x2e5   : > { %v4185_v32 = vsel %vm3911_vm3, %v3408_v20, -inf  ;;  %v3484_v55 = vrot.slane %v3189_v36, %v10441_v63  ;;  %v3443_v59 = vcombine.high %v10765_v9, %v10765_v9  ;;  %v3491_v53 = vrot.slane %v3477_v51, %v10441_v63 }
 0x2e6   : > { %v4167_v8 = vrot.slane %v4166_v37, 2  ;;  %v4173_v3 = vmax.f32 %v4171_v41, %v4172_v7  ;;  %v4180_v33 = vmax.f32 %v4178_v62, %v4179_v50  ;;  %v4186_v25 = vrot.slane %v4185_v32, 4 }
 0x2e7   : > { %v3492_v40 = vcombine.high %v3484_v55, %v3484_v55  ;;  %v4304_v4 = vsel %vm3911_vm3, %v3484_v55, -inf  ;;  %v10783_v22 = vrot.slane %v10765_v9, %v10441_v63  ;;  %v3493_v30 = vcombine.high %v3491_v53, %v3491_v53 }
 0x2e8   : > { %v4168_v10 = vmax.f32 %v4166_v37, %v4167_v8  ;;  %v4174_v52 = vrot.slane %v4173_v3, 2  ;;  %v4181_v26 = vrot.slane %v4180_v33, 2  ;;  %v4187_v47 = vmax.f32 %v4185_v32, %v4186_v25 }
 0x2e9   : > { %v4305_v58 = vrot.slane %v4304_v4, 4  ;;  %v4311_v39 = vsel %vm3911_vm3, %v3492_v40, -inf  ;;  %v4318_v61 = vsel %vm3911_vm3, %v3491_v53, -inf  ;;  %v4325_v45 = vsel %vm3911_vm3, %v3493_v30, -inf  ;;  %v10796_v53 = vld [vmem:[%s11876_s3] ss:$0 sm:$0xff] }
 0x2ea   : > { %v4169_v38 = vrot.slane %v4168_v10, 1  ;;  %v4175_v29 = vmax.f32 %v4173_v3, %v4174_v52  ;;  %v4182_v42 = vmax.f32 %v4180_v33, %v4181_v26  ;;  %v4188_v56 = vrot.slane %v4187_v47, 2 }
 0x2eb   : > { %v4306_v16 = vmax.f32 %v4304_v4, %v4305_v58  ;;  %v4312_v13 = vrot.slane %v4311_v39, 4  ;;  %v4319_v2 = vrot.slane %v4318_v61, 4  ;;  %v4326_v41 = vrot.slane %v4325_v45, 4 }
 0x2ec   : > { %v4170_v44 = vmax.f32 %v4168_v10, %v4169_v38  ;;  %v4176_v36 = vrot.slane %v4175_v29, 1  ;;  %v4183_v43 = vrot.slane %v4182_v42, 1  ;;  %v4189_v49 = vmax.f32 %v4187_v47, %v4188_v56 }
 0x2ed   : > { %v4307_v31 = vrot.slane %v4306_v16, 2  ;;  %v4313_v18 = vmax.f32 %v4311_v39, %v4312_v13  ;;  %v4320_v20 = vmax.f32 %v4318_v61, %v4319_v2  ;;  %v4327_v8 = vmax.f32 %v4325_v45, %v4326_v41 }
 0x2ee   : > { %v4177_v62 = vmax.f32 %v4175_v29, %v4176_v36  ;;  %v4184_v37 = vmax.f32 %v4182_v42, %v4183_v43  ;;  %v4190_v7 = vrot.slane %v4189_v49, 1  ;;  %v4828_v50 = vmax.f32 %v4170_v44, %v10729_v54 }
 0x2ef   : > { %v4308_v32 = vmax.f32 %v4306_v16, %v4307_v31  ;;  %v4314_v51 = vrot.slane %v4313_v18, 2  ;;  %v4321_v55 = vrot.slane %v4320_v20, 2  ;;  %v4328_v54 = vrot.slane %v4327_v8, 2 }
 0x2f0   : > { %v4191_v3 = vmax.f32 %v4189_v49, %v4190_v7  ;;  %v4829_v33 = vmax.f32 %v4177_v62, %v10737_v46  ;;  %v4830_v25 = vmax.f32 %v4184_v37, %v10731_v60  ;;  %v4899_v40 = vmul.f32 %v10796_v53, %v4828_v50  ;;  %v10805_v60 = vld [vmem:[%s11877_s4] ss:$0 sm:$0xff] }
 0x2f1   : > { %v4309_v4 = vrot.slane %v4308_v32, 1  ;;  %v4315_v10 = vmax.f32 %v4313_v18, %v4314_v51  ;;  %v4322_v52 = vmax.f32 %v4320_v20, %v4321_v55  ;;  %v4329_v38 = vmax.f32 %v4327_v8, %v4328_v54 }
 0x2f2   : > { %v4831_v26 = vmax.f32 %v4191_v3, %v10739_v6  ;;  %v4900_v47 = vmul.f32 %v10796_v53, %v4829_v33  ;;  %v4901_v30 = vmul.f32 %v10796_v53, %v4830_v25  ;;  %v4970_v46 = vadd.f32 %v10805_v60, %v4899_v40  ;;  %v10836_v33 = vpop.f32.mrb[26].mxu0 }
 0x2f3   : > { %v10808_v58 = vmax.f32 %v4308_v32, %v4309_v4  ;;  %v4316_v39 = vrot.slane %v4315_v10, 1  ;;  %v4323_v61 = vrot.slane %v4322_v52, 1  ;;  %v4330_v2 = vrot.slane %v4329_v38, 1 }
 0x2f4   : > { %v4902_v29 = vmul.f32 %v10796_v53, %v4831_v26  ;;  %v4971_v6 = vadd.f32 %v10805_v60, %v4900_v47  ;;  %v4972_v42 = vadd.f32 %v10805_v60, %v4901_v30  ;;  %v5140_v56 = vrot.slane %v4970_v46, 4 }
 0x2f5   : > { %v10813_v16 = vmax.f32 %v4315_v10, %v4316_v39  ;;  %v10815_v13 = vmax.f32 %v4322_v52, %v4323_v61  ;;  %v3457_v45 = vrot.slane %v3443_v59, %v10441_v63  ;;  %v10824_v31 = vmax.f32 %v4329_v38, %v4330_v2 }
 0x2f6   : > { %v4973_v44 = vadd.f32 %v10805_v60, %v4902_v29  ;;  %v5141_v36 = vsel %vm5109_vm8, %v5140_v56, %v10771_v11  ;;  %v5142_v43 = vrot.slane %v4971_v6, 3  ;;  %v5144_v49 = vrot.slane %v4972_v42, 2 }
 0x2f7   : > { %v3458_v18 = vcombine.high %v10783_v22, %v10783_v22  ;;  %v3459_v20 = vcombine.high %v3457_v45, %v3457_v45  ;;  %v4248_v41 = vsel %vm3911_vm3, %v10783_v22, -inf  ;;  %v4262_v37 = vsel %vm3911_vm3, %v3457_v45, -inf }
 0x2f8   : > { %v5143_v62 = vsel %vm5112_vm9, %v5142_v43, %v5141_v36  ;;  %v5146_v9 = vrot.slane %v4973_v44, 1  ;;  %v4249_v59 = vrot.slane %v4248_v41, 4  ;;  %v4263_v50 = vrot.slane %v4262_v37, 4 }
 0x2f9   : > { %v5145_v7 = vsel %vm5115_vm10, %v5144_v49, %v5143_v62  ;;  %v4255_v11 = vsel %vm3911_vm3, %v3458_v18, -inf  ;;  %v4269_v32 = vsel %vm3911_vm3, %v3459_v20, -inf  ;;  %v3158_v25 = vadd.f32 %v10753_v57, %v10758_v0  ;;  %v10857_v20 = vpop.f32.mrb[27].mxu0 }
 0x2fa   : > { %v5147_v51 = vsel %vm5118_vm11, %v5146_v9, %v5145_v7  ;;  %v4250_v55 = vmax.f32 %v4248_v41, %v4249_v59  ;;  %v4256_v8 = vrot.slane %v4255_v11, 4  ;;  %v4270_v3 = vrot.slane %v4269_v32, 4 }
 0x2fb   : > { %5229 = vst.msk [vmem:[#allocation2 + $0x31] sm:$0xff] %vm5014_vm4, %v5147_v51  ;;  %v4264_v22 = vmax.f32 %v4262_v37, %v4263_v50  ;;  %v9274_v40 = vadd.f32 %v10509_v17, %v10335_v19  ;;  %v9275_v4 = vadd.f32 %v10552_v35, %v10338_v48  ;;  %v9276_v26 = vadd.f32 %v10558_v1, %v10343_v28 }
 0x2fc   : > { %v4251_v10 = vrot.slane %v4250_v55, 2  ;;  %v4257_v52 = vmax.f32 %v4255_v11, %v4256_v8  ;;  %v4271_v54 = vmax.f32 %v4269_v32, %v4270_v3  ;;  %v3190_v30 = vmax.f32 %v3158_v25, 0.0 }
 0x2fd   : > { %v4265_v47 = vrot.slane %v4264_v22, 2  ;;  %v3156_v46 = vadd.f32 %v10753_v57, %v9274_v40  ;;  %v3161_v39 = vadd.f32 %v10753_v57, %v9275_v4  ;;  %v10850_v19 = vadd.f32 %v10753_v57, %v9276_v26 }
 0x2fe   : > { %v4252_v61 = vmax.f32 %v4250_v55, %v4251_v10  ;;  %v4258_v0 = vrot.slane %v4257_v52, 2  ;;  %v4272_v38 = vrot.slane %v4271_v54, 2  ;;  %v3494_v48 = vcombine.high %v3190_v30, %v3190_v30 }
 0x2ff   : > { %v4266_v17 = vmax.f32 %v4264_v22, %v4265_v47  ;;  %v3501_v35 = vrot.slane %v3190_v30, %v10441_v63  ;;  %v3188_v29 = vmax.f32 %v3156_v46, 0.0  ;;  %v10853_v1 = vmax.f32 %v3161_v39, 0.0 }
 0x300   : > { %v4253_v6 = vrot.slane %v4252_v61, 1  ;;  %v4259_v42 = vmax.f32 %v4257_v52, %v4258_v0  ;;  %v4273_v28 = vmax.f32 %v4271_v54, %v4272_v38  ;;  %v3508_v2 = vrot.slane %v3494_v48, %v10441_v63 }
 0x301   : > { %v4267_v56 = vrot.slane %v4266_v17, 1  ;;  %v3509_v45 = vcombine.high %v3501_v35, %v3501_v35  ;;  %v4332_v44 = vsel %vm3911_vm3, %v3501_v35, -inf  ;;  %v3460_v38 = vcombine.high %v3188_v29, %v3188_v29 }
 0x302   : > { %v4254_v36 = vmax.f32 %v4252_v61, %v4253_v6  ;;  %v4260_v43 = vrot.slane %v4259_v42, 1  ;;  %v4274_v49 = vrot.slane %v4273_v28, 1  ;;  %v4333_v18 = vrot.slane %v4332_v44, 4 }
 0x303   : > { %v4268_v41 = vmax.f32 %v4266_v17, %v4267_v56  ;;  %v3510_v62 = vcombine.high %v3508_v2, %v3508_v2  ;;  %v4339_v9 = vsel %vm3911_vm3, %v3509_v45, -inf  ;;  %v4346_v59 = vsel %vm3911_vm3, %v3508_v2, -inf }
 0x304   : > { %v4261_v37 = vmax.f32 %v4259_v42, %v4260_v43  ;;  %v4275_v7 = vmax.f32 %v4273_v28, %v4274_v49  ;;  %v4832_v11 = vmax.f32 %v4254_v36, %v10808_v58  ;;  %v4334_v50 = vmax.f32 %v4332_v44, %v4333_v18 }
 0x305   : > { %v4834_v32 = vmax.f32 %v4268_v41, %v10815_v13  ;;  %v4340_v51 = vrot.slane %v4339_v9, 4  ;;  %v4347_v55 = vrot.slane %v4346_v59, 4  ;;  %v4353_v8 = vsel %vm3911_vm3, %v3510_v62, -inf }
 0x306   : > { %v4833_v3 = vmax.f32 %v4261_v37, %v10813_v16  ;;  %v4835_v22 = vmax.f32 %v4275_v7, %v10824_v31  ;;  %v4903_v25 = vmul.f32 %v10796_v53, %v4832_v11  ;;  %v4335_v40 = vrot.slane %v4334_v50, 2 }
 0x307   : > { %v4905_v4 = vmul.f32 %v10796_v53, %v4834_v32  ;;  %v4341_v10 = vmax.f32 %v4339_v9, %v4340_v51  ;;  %v4348_v52 = vmax.f32 %v4346_v59, %v4347_v55  ;;  %v4354_v54 = vrot.slane %v4353_v8, 4 }
 0x308   : > { %v4904_v58 = vmul.f32 %v10796_v53, %v4833_v3  ;;  %v4906_v13 = vmul.f32 %v10796_v53, %v4835_v22  ;;  %v4974_v26 = vadd.f32 %v10805_v60, %v4903_v25  ;;  %v4336_v47 = vmax.f32 %v4334_v50, %v4335_v40 }
 0x309   : > { %v4976_v30 = vadd.f32 %v10805_v60, %v4905_v4  ;;  %v4342_v16 = vrot.slane %v4341_v10, 2  ;;  %v4349_v46 = vrot.slane %v4348_v52, 2  ;;  %v4355_v31 = vmax.f32 %v4353_v8, %v4354_v54 }
 0x30a   : > { %v4975_v39 = vadd.f32 %v10805_v60, %v4904_v58  ;;  %v4977_v61 = vadd.f32 %v10805_v60, %v4906_v13  ;;  %v4337_v0 = vrot.slane %v4336_v47, 1  ;;  %v3467_v2 = vrot.slane %v3188_v29, %v10441_v63  ;;  %v10901_v13 = vpop.f32.mrb[28].mxu0 }
 0x30b   : > { %v5150_v17 = vrot.slane %v4976_v30, 6  ;;  %v4343_v48 = vmax.f32 %v4341_v10, %v4342_v16  ;;  %v4350_v35 = vmax.f32 %v4348_v52, %v4349_v46  ;;  %v4356_v6 = vrot.slane %v4355_v31, 2 }
 0x30c   : > { %v5148_v42 = vrot.slane %v4975_v39, 7  ;;  %v5152_v28 = vrot.slane %v4977_v61, 5  ;;  %v10874_v56 = vmax.f32 %v4336_v47, %v4337_v0  ;;  %v3474_v43 = vrot.slane %v3460_v38, %v10441_v63 }
 0x30d   : > { %v4344_v45 = vrot.slane %v4343_v48, 1  ;;  %v4351_v44 = vrot.slane %v4350_v35, 1  ;;  %v4357_v36 = vmax.f32 %v4355_v31, %v4356_v6  ;;  %v3475_v18 = vcombine.high %v3467_v2, %v3467_v2 }
 0x30e   : > { %v5149_v49 = vsel %vm5100_vm5, %v5148_v42, %v4974_v26  ;;  %v4276_v41 = vsel %vm3911_vm3, %v3467_v2, -inf  ;;  %v3545_v62 = vcombine.high %v10853_v1, %v10853_v1  ;;  %v3476_v7 = vcombine.high %v3474_v43, %v3474_v43 }
 0x30f   : > { %v5151_v9 = vsel %vm5103_vm6, %v5150_v17, %v5149_v49  ;;  %v10883_v59 = vmax.f32 %v4343_v48, %v4344_v45  ;;  %v10885_v37 = vmax.f32 %v4350_v35, %v4351_v44  ;;  %v4358_v29 = vrot.slane %v4357_v36, 1 }
 0x310   : > { %v4277_v11 = vrot.slane %v4276_v41, 4  ;;  %v4283_v50 = vsel %vm3911_vm3, %v3475_v18, -inf  ;;  %v4290_v32 = vsel %vm3911_vm3, %v3474_v43, -inf  ;;  %v10892_v3 = vsel %vm5106_vm7, %v5152_v28, %v5151_v9 }
 0x311   : > { %v10889_v51 = vmax.f32 %v4357_v36, %v4358_v29  ;;  %v4284_v55 = vrot.slane %v4283_v50, 4  ;;  %v4291_v8 = vrot.slane %v4290_v32, 4  ;;  %v4297_v25 = vsel %vm3911_vm3, %v3476_v7, -inf }
 0x312   : > { %v4278_v22 = vmax.f32 %v4276_v41, %v4277_v11  ;;  %v3552_v40 = vrot.slane %v10853_v1, %v10441_v63  ;;  %v3559_v4 = vrot.slane %v3545_v62, %v10441_v63  ;;  %v4298_v54 = vrot.slane %v4297_v25, 4  ;;  %v10904_v1 = vpop.f32.mrb[29].mxu0 }
 0x313   : > { %v4285_v10 = vmax.f32 %v4283_v50, %v4284_v55  ;;  %v4292_v52 = vmax.f32 %v4290_v32, %v4291_v8  ;;  %v10899_v58 = vmax.f32 %v10850_v19, 0.0 }
 0x314   : > { %v4279_v26 = vrot.slane %v4278_v22, 2  ;;  %v3560_v47 = vcombine.high %v3552_v40, %v3552_v40  ;;  %v3561_v30 = vcombine.high %v3559_v4, %v3559_v4  ;;  %v4416_v16 = vsel %vm3911_vm3, %v3552_v40, -inf }
 0x315   : > { %v4286_v46 = vrot.slane %v4285_v10, 2  ;;  %v4293_v31 = vrot.slane %v4292_v52, 2  ;;  %v4299_v39 = vmax.f32 %v4297_v25, %v4298_v54  ;;  %v4417_v61 = vrot.slane %v4416_v16, 4 }
 0x316   : > { %v4280_v0 = vmax.f32 %v4278_v22, %v4279_v26  ;;  %v4423_v38 = vsel %vm3911_vm3, %v3560_v47, -inf  ;;  %v4430_v17 = vsel %vm3911_vm3, %v3559_v4, -inf  ;;  %v4437_v19 = vsel %vm3911_vm3, %v3561_v30, -inf }
 0x317   : > { %v4287_v48 = vmax.f32 %v4285_v10, %v4286_v46  ;;  %v4294_v35 = vmax.f32 %v4292_v52, %v4293_v31  ;;  %v4300_v6 = vrot.slane %v4299_v39, 2  ;;  %v4418_v42 = vmax.f32 %v4416_v16, %v4417_v61 }
 0x318   : > { %v4281_v28 = vrot.slane %v4280_v0, 1  ;;  %v4424_v2 = vrot.slane %v4423_v38, 4  ;;  %v4431_v45 = vrot.slane %v4430_v17, 4  ;;  %v4438_v44 = vrot.slane %v4437_v19, 4 }
 0x319   : > { %v4288_v36 = vrot.slane %v4287_v48, 1  ;;  %v4295_v43 = vrot.slane %v4294_v35, 1  ;;  %v4301_v49 = vmax.f32 %v4299_v39, %v4300_v6  ;;  %v4419_v18 = vrot.slane %v4418_v42, 2 }
 0x31a   : > { %v4282_v41 = vmax.f32 %v4280_v0, %v4281_v28  ;;  %v4425_v62 = vmax.f32 %v4423_v38, %v4424_v2  ;;  %v4432_v9 = vmax.f32 %v4430_v17, %v4431_v45  ;;  %v4439_v29 = vmax.f32 %v4437_v19, %v4438_v44 }
 0x31b   : > { %v4289_v7 = vmax.f32 %v4287_v48, %v4288_v36  ;;  %v4296_v11 = vmax.f32 %v4294_v35, %v4295_v43  ;;  %v4302_v50 = vrot.slane %v4301_v49, 1  ;;  %v4420_v32 = vmax.f32 %v4418_v42, %v4419_v18 }
 0x31c   : > { %v4836_v55 = vmax.f32 %v4282_v41, %v10874_v56  ;;  %v4426_v8 = vrot.slane %v4425_v62, 2  ;;  %v4433_v22 = vrot.slane %v4432_v9, 2  ;;  %v4440_v25 = vrot.slane %v4439_v29, 2 }
 0x31d   : > { %v4303_v40 = vmax.f32 %v4301_v49, %v4302_v50  ;;  %v4837_v4 = vmax.f32 %v4289_v7, %v10883_v59  ;;  %v4838_v10 = vmax.f32 %v4296_v11, %v10885_v37  ;;  %v4421_v52 = vrot.slane %v4420_v32, 1  ;;  %v11912_v49 = vld [vmem:[#allocation5_spill] sm:$0xff] }
 0x31e   : > { %v4907_v54 = vmul.f32 %v10796_v53, %v4836_v55  ;;  %v4427_v26 = vmax.f32 %v4425_v62, %v4426_v8  ;;  %v4434_v47 = vmax.f32 %v4432_v9, %v4433_v22  ;;  %v4441_v30 = vmax.f32 %v4439_v29, %v4440_v25 }
 0x31f   : > { %v4839_v16 = vmax.f32 %v4303_v40, %v10889_v51  ;;  %v4908_v46 = vmul.f32 %v10796_v53, %v4837_v4  ;;  %v4909_v56 = vmul.f32 %v10796_v53, %v4838_v10  ;;  %v10916_v31 = vmax.f32 %v4420_v32, %v4421_v52  ;;  %v11913_v52 = vld [vmem:[#allocation6_spill] sm:$0xff] }
 0x320   : > { %v4978_v39 = vadd.f32 %v10805_v60, %v4907_v54  ;;  %v4428_v61 = vrot.slane %v4427_v26, 1  ;;  %v4435_v59 = vrot.slane %v4434_v47, 1  ;;  %v4442_v0 = vrot.slane %v4441_v30, 1 }
 0x321   : > { %v4910_v37 = vmul.f32 %v10796_v53, %v4839_v16  ;;  %v4979_v38 = vadd.f32 %v10805_v60, %v4908_v46  ;;  %v4980_v17 = vadd.f32 %v10805_v60, %v4909_v56  ;;  %v3511_v51 = vcombine.high %v10899_v58, %v10899_v58  ;;  %v11914_v16 = vld [vmem:[#allocation7_spill] sm:$0xff] }
 0x322   : > { %v5154_v19 = vrot.slane %v4978_v39, 4  ;;  %v10924_v48 = vmax.f32 %v4427_v26, %v4428_v61  ;;  %v10926_v35 = vmax.f32 %v4434_v47, %v4435_v59  ;;  %v10928_v6 = vmax.f32 %v4441_v30, %v4442_v0 }
 0x323   : > { %v4981_v42 = vadd.f32 %v10805_v60, %v4910_v37  ;;  %v5156_v28 = vrot.slane %v4979_v38, 3  ;;  %v5158_v2 = vrot.slane %v4980_v17, 2  ;;  %v3518_v45 = vrot.slane %v10899_v58, %v10441_v63 }
 0x324   : > { %v5155_v44 = vsel %vm5109_vm8, %v5154_v19, %v10892_v3  ;;  %v3525_v36 = vrot.slane %v3511_v51, %v10441_v63  ;;  %v9277_v43 = vadd.f32 %v10597_v14, %v10347_v24  ;;  %v9278_v18 = vadd.f32 %v10615_v23, %v11912_v49  ;;  %v10947_v23 = vpop.f32.mrb[30].mxu0 }
 0x325   : > { %v5157_v41 = vsel %vm5112_vm9, %v5156_v28, %v5155_v44  ;;  %v5160_v62 = vrot.slane %v4981_v42, 1  ;;  %v3526_v9 = vcombine.high %v3518_v45, %v3518_v45  ;;  %v4360_v29 = vsel %vm3911_vm3, %v3518_v45, -inf  ;;  %v10967_v44 = vpop.f32.mrb[31].mxu0 }
 0x326   : > { %v5159_v7 = vsel %vm5115_vm10, %v5158_v2, %v5157_v41  ;;  %v3527_v58 = vcombine.high %v3525_v36, %v3525_v36  ;;  %v4361_v11 = vrot.slane %v4360_v29, 4  ;;  %v4374_v3 = vsel %vm3911_vm3, %v3525_v36, -inf }
 0x327   : > { %v5161_v50 = vsel %vm5118_vm11, %v5160_v62, %v5159_v7  ;;  %v4367_v32 = vsel %vm3911_vm3, %v3526_v9, -inf  ;;  %v4375_v24 = vrot.slane %v4374_v3, 4  ;;  %v3162_v14 = vadd.f32 %v10753_v57, %v9277_v43 }
 0x328   : > { %5230 = vst.msk [vmem:[#allocation2 + $0x41] sm:$0xff] %vm5014_vm4, %v5161_v50  ;;  %v4362_v55 = vmax.f32 %v4360_v29, %v4361_v11  ;;  %v4368_v8 = vrot.slane %v4367_v32, 4  ;;  %v4381_v22 = vsel %vm3911_vm3, %v3527_v58, -inf  ;;  %v3160_v25 = vadd.f32 %v10753_v57, %v9278_v18 }
 0x329   : > { %v4376_v40 = vmax.f32 %v4374_v3, %v4375_v24  ;;  %v4382_v4 = vrot.slane %v4381_v22, 4  ;;  %v3194_v10 = vmax.f32 %v3162_v14, 0.0  ;;  %v10954_v54 = vadd.f32 %v10653_v5, %v11913_v52 }
 0x32a   : > { %v4363_v26 = vrot.slane %v4362_v55, 2  ;;  %v4369_v47 = vmax.f32 %v4367_v32, %v4368_v8  ;;  %v3192_v30 = vmax.f32 %v3160_v25, 0.0  ;;  %v10958_v46 = vadd.f32 %v10670_v21, %v11914_v16 }
 0x32b   : > { %v4377_v56 = vrot.slane %v4376_v40, 2  ;;  %v4383_v39 = vmax.f32 %v4381_v22, %v4382_v4  ;;  %v3562_v61 = vcombine.high %v3194_v10, %v3194_v10  ;;  %v3569_v59 = vrot.slane %v3194_v10, %v10441_v63 }
 0x32c   : > { %v4364_v0 = vmax.f32 %v4362_v55, %v4363_v26  ;;  %v4370_v37 = vrot.slane %v4369_v47, 2  ;;  %v3528_v38 = vcombine.high %v3192_v30, %v3192_v30  ;;  %v3535_v17 = vrot.slane %v3192_v30, %v10441_v63 }
 0x32d   : > { %v4378_v51 = vmax.f32 %v4376_v40, %v4377_v56  ;;  %v4384_v5 = vrot.slane %v4383_v39, 2  ;;  %v3576_v19 = vrot.slane %v3562_v61, %v10441_v63  ;;  %v3577_v42 = vcombine.high %v3569_v59, %v3569_v59 }
 0x32e   : > { %v4365_v28 = vrot.slane %v4364_v0, 1  ;;  %v4371_v2 = vmax.f32 %v4369_v47, %v4370_v37  ;;  %v4444_v21 = vsel %vm3911_vm3, %v3569_v59, -inf  ;;  %v10965_v45 = vrot.slane %v3528_v38, %v10441_v63 }
 0x32f   : > { %v4379_v36 = vrot.slane %v4378_v51, 1  ;;  %v4385_v43 = vmax.f32 %v4383_v39, %v4384_v5  ;;  %v3578_v49 = vcombine.high %v3576_v19, %v3576_v19  ;;  %v4445_v18 = vrot.slane %v4444_v21, 4 }
 0x330   : > { %v4366_v41 = vmax.f32 %v4364_v0, %v4365_v28  ;;  %v4372_v62 = vrot.slane %v4371_v2, 1  ;;  %v4451_v9 = vsel %vm3911_vm3, %v3577_v42, -inf  ;;  %v4458_v29 = vsel %vm3911_vm3, %v3576_v19, -inf }
 0x331   : > { %v4380_v7 = vmax.f32 %v4378_v51, %v4379_v36  ;;  %v4386_v58 = vrot.slane %v4385_v43, 1  ;;  %v4446_v11 = vmax.f32 %v4444_v21, %v4445_v18  ;;  %v4452_v3 = vrot.slane %v4451_v9, 4 }
 0x332   : > { %v4373_v50 = vmax.f32 %v4371_v2, %v4372_v62  ;;  %v4840_v32 = vmax.f32 %v4366_v41, %v10916_v31  ;;  %v4459_v24 = vrot.slane %v4458_v29, 4  ;;  %v4465_v14 = vsel %vm3911_vm3, %v3578_v49, -inf }
 0x333   : > { %v4387_v55 = vmax.f32 %v4385_v43, %v4386_v58  ;;  %v4842_v8 = vmax.f32 %v4380_v7, %v10926_v35  ;;  %v4447_v22 = vrot.slane %v4446_v11, 2  ;;  %v4453_v25 = vmax.f32 %v4451_v9, %v4452_v3 }
 0x334   : > { %v4841_v40 = vmax.f32 %v4373_v50, %v10924_v48  ;;  %v4911_v4 = vmul.f32 %v10796_v53, %v4840_v32  ;;  %v4460_v10 = vmax.f32 %v4458_v29, %v4459_v24  ;;  %v4466_v52 = vrot.slane %v4465_v14, 4 }
 0x335   : > { %v4843_v26 = vmax.f32 %v4387_v55, %v10928_v6  ;;  %v4913_v47 = vmul.f32 %v10796_v53, %v4842_v8  ;;  %v4448_v30 = vmax.f32 %v4446_v11, %v4447_v22  ;;  %v4454_v31 = vrot.slane %v4453_v25, 2  ;;  %v9592_v11 = vld [vmem:[%s11878_s5 + $0x8] sm:$0xff]  }
 0x336   : > { %v4912_v16 = vmul.f32 %v10796_v53, %v4841_v40  ;;  %v4982_v56 = vadd.f32 %v10805_v60, %v4911_v4  ;;  %v4461_v39 = vrot.slane %v4460_v10, 2  ;;  %v4467_v35 = vmax.f32 %v4465_v14, %v4466_v52  ;;  %9041 = vmatprep.subr.bf16.mxu1 %v9592_v11 }
 0x337   : > { %v4914_v61 = vmul.f32 %v10796_v53, %v4843_v26  ;;  %v4984_v48 = vadd.f32 %v10805_v60, %v4913_v47  ;;  %v4449_v59 = vrot.slane %v4448_v30, 1  ;;  %v4455_v0 = vmax.f32 %v4453_v25, %v4454_v31  ;;  %9042 = vmatpush3.bf16.msra.mxu1 %v9592_v11  ;;  %v11915_v26 = vld [vmem:[#allocation8_spill] sm:$0xff] }
 0x338   : > { %v4983_v37 = vadd.f32 %v10805_v60, %v4912_v16  ;;  %v4462_v38 = vmax.f32 %v4460_v10, %v4461_v39  ;;  %v4468_v6 = vrot.slane %v4467_v35, 2  ;;  %v3543_v51 = vcombine.high %v3535_v17, %v3535_v17 }
 0x339   : > { %v4985_v5 = vadd.f32 %v10805_v60, %v4914_v61  ;;  %v5164_v19 = vrot.slane %v4984_v48, 6  ;;  %v10984_v42 = vmax.f32 %v4448_v30, %v4449_v59  ;;  %v4456_v28 = vrot.slane %v4455_v0, 1 }
 0x33a   : > { %v5162_v2 = vrot.slane %v4983_v37, 7  ;;  %v4463_v21 = vrot.slane %v4462_v38, 1  ;;  %v4469_v36 = vmax.f32 %v4467_v35, %v4468_v6  ;;  %v3544_v43 = vcombine.high %v10965_v45, %v10965_v45 }
 0x33b   : > { %v5166_v49 = vrot.slane %v4985_v5, 5  ;;  %v10988_v18 = vmax.f32 %v4455_v0, %v4456_v28  ;;  %v4388_v41 = vsel %vm3911_vm3, %v3535_v17, -inf  ;;  %v4395_v62 = vsel %vm3911_vm3, %v3543_v51, -inf }
 0x33c   : > { %v5163_v9 = vsel %vm5100_vm5, %v5162_v2, %v4982_v56  ;;  %v10993_v29 = vmax.f32 %v4462_v38, %v4463_v21  ;;  %v4470_v7 = vrot.slane %v4469_v36, 1  ;;  %v4389_v58 = vrot.slane %v4388_v41, 4  ;;  %v11916_v56 = vld [vmem:[#allocation9_spill] sm:$0xff] }
 0x33d   : > { %v5165_v3 = vsel %vm5103_vm6, %v5164_v19, %v5163_v9  ;;  %v4396_v50 = vrot.slane %v4395_v62, 4  ;;  %v4402_v32 = vsel %vm3911_vm3, %v10965_v45, -inf  ;;  %v4409_v17 = vsel %vm3911_vm3, %v3544_v43, -inf }
 0x33e   : > { %v4471_v24 = vmax.f32 %v4469_v36, %v4470_v7  ;;  %v4390_v14 = vmax.f32 %v4388_v41, %v4389_v58  ;;  %v4403_v55 = vrot.slane %v4402_v32, 4  ;;  %v4410_v8 = vrot.slane %v4409_v17, 4 }
 0x33f   : > { %v4397_v22 = vmax.f32 %v4395_v62, %v4396_v50  ;;  %v11003_v25 = vsel %vm5106_vm7, %v5166_v49, %v5165_v3  ;;  %v3165_v40 = vadd.f32 %v10753_v57, %v10954_v54  ;;  %v3163_v4 = vadd.f32 %v10753_v57, %v10958_v46 }
 0x340   : > { %v4391_v10 = vrot.slane %v4390_v14, 2  ;;  %v4404_v45 = vmax.f32 %v4402_v32, %v4403_v55  ;;  %v4411_v52 = vmax.f32 %v4409_v17, %v4410_v8  ;;  %v9281_v47 = vadd.f32 %v10704_v34, %v11915_v26 }
 0x341   : > { %v4398_v30 = vrot.slane %v4397_v22, 2  ;;  %v3197_v31 = vmax.f32 %v3165_v40, 0.0  ;;  %v11011_v16 = vmax.f32 %v3163_v4, 0.0  ;;  %v11015_v39 = vadd.f32 %v10723_v15, %v11916_v56 }
 0x342   : > { %v4392_v35 = vmax.f32 %v4390_v14, %v4391_v10  ;;  %v4405_v54 = vrot.slane %v4404_v45, 2  ;;  %v4412_v61 = vrot.slane %v4411_v52, 2  ;;  %v11018_v46 = vadd.f32 %v10753_v57, %v9281_v47 }
 0x343   : > { %v4399_v48 = vmax.f32 %v4397_v22, %v4398_v30  ;;  %v3613_v59 = vcombine.high %v3197_v31, %v3197_v31  ;;  %v3620_v0 = vrot.slane %v3197_v31, %v10441_v63  ;;  %v3579_v34 = vcombine.high %v11011_v16, %v11011_v16 }
 0x344   : > { %v4393_v37 = vrot.slane %v4392_v35, 1  ;;  %v4406_v38 = vmax.f32 %v4404_v45, %v4405_v54  ;;  %v4413_v6 = vmax.f32 %v4411_v52, %v4412_v61  ;;  %v11025_v15 = vrot.slane %v11011_v16, %v10441_v63 }
 0x345   : > { %v4400_v51 = vrot.slane %v4399_v48, 1  ;;  %v3627_v5 = vrot.slane %v3613_v59, %v10441_v63  ;;  %v3628_v19 = vcombine.high %v3620_v0, %v3620_v0  ;;  %v4528_v28 = vsel %vm3911_vm3, %v3620_v0, -inf }
 0x346   : > { %v4394_v2 = vmax.f32 %v4392_v35, %v4393_v37  ;;  %v4407_v21 = vrot.slane %v4406_v38, 1  ;;  %v4414_v36 = vrot.slane %v4413_v6, 1  ;;  %v4529_v43 = vrot.slane %v4528_v28, 4 }
 0x347   : > { %v4401_v49 = vmax.f32 %v4399_v48, %v4400_v51  ;;  %v3629_v41 = vcombine.high %v3627_v5, %v3627_v5  ;;  %v4535_v62 = vsel %vm3911_vm3, %v3628_v19, -inf  ;;  %v4542_v9 = vsel %vm3911_vm3, %v3627_v5, -inf }
 0x348   : > { %v4408_v7 = vmax.f32 %v4406_v38, %v4407_v21  ;;  %v4415_v58 = vmax.f32 %v4413_v6, %v4414_v36  ;;  %v4844_v11 = vmax.f32 %v4394_v2, %v10984_v42  ;;  %v4530_v3 = vmax.f32 %v4528_v28, %v4529_v43 }
 0x349   : > { %v4845_v50 = vmax.f32 %v4401_v49, %v10988_v18  ;;  %v4536_v32 = vrot.slane %v4535_v62, 4  ;;  %v4543_v17 = vrot.slane %v4542_v9, 4  ;;  %v4549_v14 = vsel %vm3911_vm3, %v3629_v41, -inf }
 0x34a   : > { %v4846_v55 = vmax.f32 %v4408_v7, %v10993_v29  ;;  %v4847_v8 = vmax.f32 %v4415_v58, %v4471_v24  ;;  %v4915_v22 = vmul.f32 %v10796_v53, %v4844_v11  ;;  %v4531_v40 = vrot.slane %v4530_v3, 2 }
 0x34b   : > { %v4916_v4 = vmul.f32 %v10796_v53, %v4845_v50  ;;  %v4537_v10 = vmax.f32 %v4535_v62, %v4536_v32  ;;  %v4544_v45 = vmax.f32 %v4542_v9, %v4543_v17  ;;  %v4550_v52 = vrot.slane %v4549_v14, 4 }
 0x34c   : > { %v4917_v42 = vmul.f32 %v10796_v53, %v4846_v55  ;;  %v4918_v26 = vmul.f32 %v10796_v53, %v4847_v8  ;;  %v4986_v18 = vadd.f32 %v10805_v60, %v4915_v22  ;;  %v4532_v47 = vmax.f32 %v4530_v3, %v4531_v40  ;;  %v11917_v8 = vld [vmem:[#allocation10_spill] sm:$0xff] }
 0x34d   : > { %v4987_v30 = vadd.f32 %v10805_v60, %v4916_v4  ;;  %v4538_v31 = vrot.slane %v4537_v10, 2  ;;  %v4545_v29 = vrot.slane %v4544_v45, 2  ;;  %v4551_v24 = vmax.f32 %v4549_v14, %v4550_v52 }
 0x34e   : > { %v4988_v16 = vadd.f32 %v10805_v60, %v4917_v42  ;;  %v4989_v56 = vadd.f32 %v10805_v60, %v4918_v26  ;;  %v5168_v35 = vrot.slane %v4986_v18, 4  ;;  %v4533_v54 = vrot.slane %v4532_v47, 1 }
 0x34f   : > { %v5170_v61 = vrot.slane %v4987_v30, 3  ;;  %v4539_v48 = vmax.f32 %v4537_v10, %v4538_v31  ;;  %v4546_v59 = vmax.f32 %v4544_v45, %v4545_v29  ;;  %v4552_v0 = vrot.slane %v4551_v24, 2 }
 0x350   : > { %v5169_v37 = vsel %vm5109_vm8, %v5168_v35, %v11003_v25  ;;  %v5172_v38 = vrot.slane %v4988_v16, 2  ;;  %v5174_v6 = vrot.slane %v4989_v56, 1  ;;  %v11045_v51 = vmax.f32 %v4532_v47, %v4533_v54 }
 0x351   : > { %v5171_v5 = vsel %vm5112_vm9, %v5170_v61, %v5169_v37  ;;  %v4540_v19 = vrot.slane %v4539_v48, 1  ;;  %v4547_v28 = vrot.slane %v4546_v59, 1  ;;  %v4553_v2 = vmax.f32 %v4551_v24, %v4552_v0 }
 0x352   : > { %v5173_v21 = vsel %vm5115_vm10, %v5172_v38, %v5171_v5  ;;  %v3593_v36 = vrot.slane %v3579_v34, %v10441_v63  ;;  %v3594_v43 = vcombine.high %v11025_v15, %v11025_v15  ;;  %v4472_v49 = vsel %vm3911_vm3, %v11025_v15, -inf  ;;  %v11085_v5 = vld [vmem:[%s11878_s5] sm:$0xff]  }
 0x353   : > { %v5175_v25 = vsel %vm5118_vm11, %v5174_v6, %v5173_v21  ;;  %v11055_v41 = vmax.f32 %v4539_v48, %v4540_v19  ;;  %v11057_v62 = vmax.f32 %v4546_v59, %v4547_v28  ;;  %v4554_v9 = vrot.slane %v4553_v2, 1  ;;  %9051 = vmatprep.subr.bf16.mxu1 %v11085_v5 }
 0x354   : > { %5231 = vst.msk [vmem:[#allocation2 + $0x51] sm:$0xff] %vm5014_vm4, %v5175_v25  ;;  %v3595_v7 = vcombine.high %v3593_v36, %v3593_v36  ;;  %v4473_v58 = vrot.slane %v4472_v49, 4  ;;  %v4479_v11 = vsel %vm3911_vm3, %v3594_v43, -inf  ;;  %v4486_v34 = vsel %vm3911_vm3, %v3593_v36, -inf }
 0x355   : > { %v11062_v3 = vmax.f32 %v4553_v2, %v4554_v9  ;;  %v4480_v50 = vrot.slane %v4479_v11, 4  ;;  %v4487_v32 = vrot.slane %v4486_v34, 4  ;;  %v3198_v15 = vmax.f32 %v11018_v46, 0.0 }
 0x356   : > { %v4474_v17 = vmax.f32 %v4472_v49, %v4473_v58  ;;  %v4493_v14 = vsel %vm3911_vm3, %v3595_v7, -inf  ;;  %v3164_v55 = vadd.f32 %v10753_v57, %v11015_v39  ;;  %v9283_v22 = vadd.f32 %v10777_v12, %v11917_v8 }
 0x357   : > { %v4481_v40 = vmax.f32 %v4479_v11, %v4480_v50  ;;  %v4488_v4 = vmax.f32 %v4486_v34, %v4487_v32  ;;  %v4494_v10 = vrot.slane %v4493_v14, 4  ;;  %v3630_v45 = vcombine.high %v3198_v15, %v3198_v15 }
 0x358   : > { %v4475_v52 = vrot.slane %v4474_v17, 2  ;;  %v3637_v42 = vrot.slane %v3198_v15, %v10441_v63  ;;  %v11071_v26 = vmax.f32 %v3164_v55, 0.0  ;;  %v11074_v46 = vadd.f32 %v10753_v57, %v9283_v22 }
 0x359   : > { %v4482_v18 = vrot.slane %v4481_v40, 2  ;;  %v4489_v47 = vrot.slane %v4488_v4, 2  ;;  %v4495_v30 = vmax.f32 %v4493_v14, %v4494_v10  ;;  %v3644_v39 = vrot.slane %v3630_v45, %v10441_v63 }
 0x35a   : > { %v4476_v31 = vmax.f32 %v4474_v17, %v4475_v52  ;;  %v3645_v29 = vcombine.high %v3637_v42, %v3637_v42  ;;  %v4556_v12 = vsel %vm3911_vm3, %v3637_v42, -inf  ;;  %v3596_v24 = vcombine.high %v11071_v26, %v11071_v26 }
 0x35b   : > { %v4483_v16 = vmax.f32 %v4481_v40, %v4482_v18  ;;  %v4490_v56 = vmax.f32 %v4488_v4, %v4489_v47  ;;  %v4496_v35 = vrot.slane %v4495_v30, 2  ;;  %v3646_v54 = vcombine.high %v3644_v39, %v3644_v39 }
 0x35c   : > { %v4477_v61 = vrot.slane %v4476_v31, 1  ;;  %v4557_v48 = vrot.slane %v4556_v12, 4  ;;  %v4563_v57 = vsel %vm3911_vm3, %v3645_v29, -inf  ;;  %v4570_v59 = vsel %vm3911_vm3, %v3644_v39, -inf }
 0x35d   : > { %v4484_v0 = vrot.slane %v4483_v16, 1  ;;  %v4491_v37 = vrot.slane %v4490_v56, 1  ;;  %v4497_v38 = vmax.f32 %v4495_v30, %v4496_v35  ;;  %v4564_v6 = vrot.slane %v4563_v57, 4 }
 0x35e   : > { %v4478_v19 = vmax.f32 %v4476_v31, %v4477_v61  ;;  %v4558_v28 = vmax.f32 %v4556_v12, %v4557_v48  ;;  %v4571_v2 = vrot.slane %v4570_v59, 4  ;;  %v4577_v21 = vsel %vm3911_vm3, %v3646_v54, -inf }
 0x35f   : > { %v4485_v36 = vmax.f32 %v4483_v16, %v4484_v0  ;;  %v4492_v43 = vmax.f32 %v4490_v56, %v4491_v37  ;;  %v4498_v49 = vrot.slane %v4497_v38, 1  ;;  %v4565_v25 = vmax.f32 %v4563_v57, %v4564_v6 }
 0x360   : > { %v4848_v9 = vmax.f32 %v4478_v19, %v11045_v51  ;;  %v4559_v7 = vrot.slane %v4558_v28, 2  ;;  %v4572_v58 = vmax.f32 %v4570_v59, %v4571_v2  ;;  %v4578_v11 = vrot.slane %v4577_v21, 4 }
 0x361   : > { %v4499_v34 = vmax.f32 %v4497_v38, %v4498_v49  ;;  %v4849_v50 = vmax.f32 %v4485_v36, %v11055_v41  ;;  %v4850_v32 = vmax.f32 %v4492_v43, %v11057_v62  ;;  %v4566_v15 = vrot.slane %v4565_v25, 2 }
 0x362   : > { %v4919_v17 = vmul.f32 %v10796_v53, %v4848_v9  ;;  %v4560_v14 = vmax.f32 %v4558_v28, %v4559_v7  ;;  %v4573_v55 = vrot.slane %v4572_v58, 2  ;;  %v4579_v8 = vmax.f32 %v4577_v21, %v4578_v11  ;;  %v11918_v9 = vld [vmem:[#allocation11_spill] sm:$0xff] }
 0x363   : > { %v4851_v22 = vmax.f32 %v4499_v34, %v11062_v3  ;;  %v4920_v40 = vmul.f32 %v10796_v53, %v4849_v50  ;;  %v4921_v51 = vmul.f32 %v10796_v53, %v4850_v32  ;;  %v4567_v4 = vmax.f32 %v4565_v25, %v4566_v15  ;;  %v11919_v50 = vld [vmem:[#allocation12_spill] sm:$0xff] }
 0x364   : > { %v4990_v10 = vadd.f32 %v10805_v60, %v4919_v17  ;;  %v4561_v45 = vrot.slane %v4560_v14, 1  ;;  %v4574_v52 = vmax.f32 %v4572_v58, %v4573_v55  ;;  %v4580_v41 = vrot.slane %v4579_v8, 2 }
 0x365   : > { %v4922_v62 = vmul.f32 %v10796_v53, %v4851_v22  ;;  %v4991_v42 = vadd.f32 %v10805_v60, %v4920_v40  ;;  %v4992_v18 = vadd.f32 %v10805_v60, %v4921_v51  ;;  %v4568_v47 = vrot.slane %v4567_v4, 1 }
 0x366   : > { %v11100_v30 = vmax.f32 %v4560_v14, %v4561_v45  ;;  %v4575_v3 = vrot.slane %v4574_v52, 1  ;;  %v4581_v39 = vmax.f32 %v4579_v8, %v4580_v41  ;;  %v3603_v31 = vrot.slane %v11071_v26, %v10441_v63 }
 0x367   : > { %v4993_v29 = vadd.f32 %v10805_v60, %v4922_v62  ;;  %v5176_v12 = vrot.slane %v4991_v42, 7  ;;  %v5178_v16 = vrot.slane %v4992_v18, 6  ;;  %v11105_v56 = vmax.f32 %v4567_v4, %v4568_v47 }
 0x368   : > { %v11107_v35 = vmax.f32 %v4574_v52, %v4575_v3  ;;  %v4582_v53 = vrot.slane %v4581_v39, 1  ;;  %v3610_v54 = vrot.slane %v3596_v24, %v10441_v63  ;;  %v3611_v61 = vcombine.high %v3603_v31, %v3603_v31 }
 0x369   : > { %v5177_v48 = vsel %vm5100_vm5, %v5176_v12, %v4990_v10  ;;  %v5180_v57 = vrot.slane %v4993_v29, 5  ;;  %v4500_v59 = vsel %vm3911_vm3, %v3603_v31, -inf  ;;  %v3201_v0 = vmax.f32 %v11074_v46, 0.0 }
 0x36a   : > { %v5179_v26 = vsel %vm5103_vm6, %v5178_v16, %v5177_v48  ;;  %v11114_v60 = vmax.f32 %v4581_v39, %v4582_v53  ;;  %v3612_v37 = vcombine.high %v3610_v54, %v3610_v54  ;;  %v4501_v38 = vrot.slane %v4500_v59, 4 }
 0x36b   : > { %v4507_v6 = vsel %vm3911_vm3, %v3611_v61, -inf  ;;  %v4514_v19 = vsel %vm3911_vm3, %v3610_v54, -inf  ;;  %v11119_v24 = vsel %vm5106_vm7, %v5180_v57, %v5179_v26  ;;  %v3681_v28 = vcombine.high %v3201_v0, %v3201_v0 }
 0x36c   : > { %v4502_v2 = vmax.f32 %v4500_v59, %v4501_v38  ;;  %v4508_v21 = vrot.slane %v4507_v6, 4  ;;  %v4515_v36 = vrot.slane %v4514_v19, 4  ;;  %v4521_v43 = vsel %vm3911_vm3, %v3612_v37, -inf }
 0x36d   : > { %v4522_v46 = vrot.slane %v4521_v43, 4  ;;  %v3688_v49 = vrot.slane %v3201_v0, %v10441_v63  ;;  %v3695_v25 = vrot.slane %v3681_v28, %v10441_v63  ;;  %v11126_v7 = vadd.f32 %v10785_v27, %v11918_v9 }
 0x36e   : > { %v4503_v58 = vrot.slane %v4502_v2, 2  ;;  %v4509_v11 = vmax.f32 %v4507_v6, %v4508_v21  ;;  %v4516_v34 = vmax.f32 %v4514_v19, %v4515_v36  ;;  %v11130_v32 = vadd.f32 %v10836_v33, %v11919_v50 }
 0x36f   : > { %v4523_v15 = vmax.f32 %v4521_v43, %v4522_v46  ;;  %v3696_v17 = vcombine.high %v3688_v49, %v3688_v49  ;;  %v3697_v14 = vcombine.high %v3695_v25, %v3695_v25  ;;  %v4640_v55 = vsel %vm3911_vm3, %v3688_v49, -inf }
 0x370   : > { %v4504_v8 = vmax.f32 %v4502_v2, %v4503_v58  ;;  %v4510_v22 = vrot.slane %v4509_v11, 2  ;;  %v4517_v40 = vrot.slane %v4516_v34, 2  ;;  %v4641_v51 = vrot.slane %v4640_v55, 4  ;;  %v11142_v2 = vld [vmem:[%s11876_s3] ss:$0 sm:$0xff] }
 0x371   : > { %v4524_v4 = vrot.slane %v4523_v15, 2  ;;  %v4647_v27 = vsel %vm3911_vm3, %v3696_v17, -inf  ;;  %v4654_v10 = vsel %vm3911_vm3, %v3695_v25, -inf  ;;  %v4661_v45 = vsel %vm3911_vm3, %v3697_v14, -inf }
 0x372   : > { %v4505_v52 = vrot.slane %v4504_v8, 1  ;;  %v4511_v41 = vmax.f32 %v4509_v11, %v4510_v22  ;;  %v4518_v33 = vmax.f32 %v4516_v34, %v4517_v40  ;;  %v4642_v62 = vmax.f32 %v4640_v55, %v4641_v51  ;;  %v11162_v55 = vld [vmem:[%s11875_s2] ss:$0 sm:$0xff]  ;;  %v5249_v22 = vld [vmem:[#allocation2 + $0x1] sm:$0xff]  ;;  %v11166_v40 = vld [vmem:[#allocation2 + $0x11] sm:$0xff] }
 0x373   : > { %v4525_v42 = vmax.f32 %v4523_v15, %v4524_v4  ;;  %v4648_v18 = vrot.slane %v4647_v27, 4  ;;  %v4655_v47 = vrot.slane %v4654_v10, 4  ;;  %v4662_v3 = vrot.slane %v4661_v45, 4 }
 0x374   : > { %v4506_v39 = vmax.f32 %v4504_v8, %v4505_v52  ;;  %v4512_v31 = vrot.slane %v4511_v41, 1  ;;  %v4519_v29 = vrot.slane %v4518_v33, 1  ;;  %v4643_v12 = vrot.slane %v4642_v62, 2 }
 0x375   : > { %v4526_v16 = vrot.slane %v4525_v42, 1  ;;  %v4649_v53 = vmax.f32 %v4647_v27, %v4648_v18  ;;  %v4656_v54 = vmax.f32 %v4654_v10, %v4655_v47  ;;  %v4663_v61 = vmax.f32 %v4661_v45, %v4662_v3  ;;  %v11920_v18 = vld [vmem:[#allocation13_spill] sm:$0xff] }
 0x376   : > { %v4513_v48 = vmax.f32 %v4511_v41, %v4512_v31  ;;  %v4520_v57 = vmax.f32 %v4518_v33, %v4519_v29  ;;  %v4852_v59 = vmax.f32 %v4506_v39, %v11100_v30  ;;  %v4644_v0 = vmax.f32 %v4642_v62, %v4643_v12  ;;  %v11921_v29 = vld [vmem:[#allocation14_spill] sm:$0xff] }
 0x377   : > { %v4527_v26 = vmax.f32 %v4525_v42, %v4526_v16  ;;  %v4650_v37 = vrot.slane %v4649_v53, 2  ;;  %v4657_v38 = vrot.slane %v4656_v54, 2  ;;  %v4664_v6 = vrot.slane %v4663_v61, 2 }
 0x378   : > { %v4853_v19 = vmax.f32 %v4513_v48, %v11105_v56  ;;  %v4854_v28 = vmax.f32 %v4520_v57, %v11107_v35  ;;  %v4923_v21 = vmul.f32 %v11142_v2, %v4852_v59  ;;  %v4645_v36 = vrot.slane %v4644_v0, 1  ;;  %v11151_v56 = vld [vmem:[%s11877_s4] ss:$0 sm:$0xff] }
 0x379   : > { %v4855_v43 = vmax.f32 %v4527_v26, %v11114_v60  ;;  %v4651_v30 = vmax.f32 %v4649_v53, %v4650_v37  ;;  %v4658_v46 = vmax.f32 %v4656_v54, %v4657_v38  ;;  %v4665_v49 = vmax.f32 %v4663_v61, %v4664_v6  ;;  %v11922_v53 = vld [vmem:[#allocation15_spill] sm:$0xff] }
 0x37a   : > { %v4924_v25 = vmul.f32 %v11142_v2, %v4853_v19  ;;  %v4925_v9 = vmul.f32 %v11142_v2, %v4854_v28  ;;  %v4994_v35 = vadd.f32 %v11151_v56, %v4923_v21  ;;  %v11154_v58 = vmax.f32 %v4644_v0, %v4645_v36 }
 0x37b   : > { %v4926_v11 = vmul.f32 %v11142_v2, %v4855_v43  ;;  %v4652_v34 = vrot.slane %v4651_v30, 1  ;;  %v4659_v60 = vrot.slane %v4658_v46, 1  ;;  %v4666_v50 = vrot.slane %v4665_v49, 1 }
 0x37c   : > { %v4995_v15 = vadd.f32 %v11151_v56, %v4924_v25  ;;  %v4996_v17 = vadd.f32 %v11151_v56, %v4925_v9  ;;  %v5182_v14 = vrot.slane %v4994_v35, 4  ;;  %v3167_v8 = vadd.f32 %v11162_v55, %v11126_v7 }
 0x37d   : > { %v4997_v51 = vadd.f32 %v11151_v56, %v4926_v11  ;;  %v11169_v4 = vmax.f32 %v4651_v30, %v4652_v34  ;;  %v11171_v27 = vmax.f32 %v4658_v46, %v4659_v60  ;;  %v11173_v10 = vmax.f32 %v4665_v49, %v4666_v50 }
 0x37e   : > { %v5183_v45 = vsel %vm5109_vm8, %v5182_v14, %v11119_v24  ;;  %v5184_v52 = vrot.slane %v4995_v15, 3  ;;  %v5186_v41 = vrot.slane %v4996_v17, 2  ;;  %v3199_v33 = vmax.f32 %v3167_v8, 0.0 }
 0x37f   : > { %v5188_v62 = vrot.slane %v4997_v51, 1  ;;  %v3170_v7 = vadd.f32 %v11162_v55, %v11130_v32  ;;  %v5257_v42 = vpack.c.bf16 %v11166_v40, %v5249_v22  ;;  %v9286_v47 = vadd.f32 %v10857_v20, %v11920_v18 }
 0x380   : > { %v5185_v3 = vsel %vm5112_vm9, %v5184_v52, %v5183_v45  ;;  %v3647_v39 = vcombine.high %v3199_v33, %v3199_v33  ;;  %v3654_v31 = vrot.slane %v3199_v33, %v10441_v63  ;;  %v9287_v24 = vadd.f32 %v10901_v13, %v11921_v29 }
 0x381   : > { %v5187_v12 = vsel %vm5115_vm10, %v5186_v41, %v5185_v3  ;;  %v3202_v16 = vmax.f32 %v3170_v7, 0.0  ;;  %9043 = vmatprep.mubr.msk.bf16.mxu1 %vm5014_vm4, %v5257_v42  ;;  %v3168_v32 = vadd.f32 %v11162_v55, %v9286_v47  ;;  %v11191_v54 = vadd.f32 %v10904_v1, %v11922_v53 }
 0x382   : > { %v5189_v20 = vsel %vm5118_vm11, %v5188_v62, %v5187_v12  ;;  %v3661_v61 = vrot.slane %v3647_v39, %v10441_v63  ;;  %v3662_v48 = vcombine.high %v3654_v31, %v3654_v31  ;;  %v4584_v57 = vsel %vm3911_vm3, %v3654_v31, -inf }
 0x383   : > { %5232 = vst.msk [vmem:[#allocation2 + $0x61] sm:$0xff] %vm5014_vm4, %v5189_v20  ;;  %v4585_v13 = vrot.slane %v4584_v57, 4  ;;  %v3698_v59 = vcombine.high %v3202_v16, %v3202_v16  ;;  %v3705_v0 = vrot.slane %v3202_v16, %v10441_v63  ;;  %v11198_v26 = vmax.f32 %v3168_v32, 0.0 }
 0x384   : > { %v3663_v37 = vcombine.high %v3661_v61, %v3661_v61  ;;  %v4591_v38 = vsel %vm3911_vm3, %v3662_v48, -inf  ;;  %v4598_v1 = vsel %vm3911_vm3, %v3661_v61, -inf  ;;  %v11203_v6 = vadd.f32 %v11162_v55, %v9287_v24 }
 0x385   : > { %v4586_v19 = vmax.f32 %v4584_v57, %v4585_v13  ;;  %v4592_v28 = vrot.slane %v4591_v38, 4  ;;  %v4599_v21 = vrot.slane %v4598_v1, 4  ;;  %v3712_v36 = vrot.slane %v3698_v59, %v10441_v63 }
 0x386   : > { %v4605_v43 = vsel %vm3911_vm3, %v3663_v37, -inf  ;;  %v3713_v30 = vcombine.high %v3705_v0, %v3705_v0  ;;  %v4668_v46 = vsel %vm3911_vm3, %v3705_v0, -inf  ;;  %v3664_v49 = vcombine.high %v11198_v26, %v11198_v26 }
 0x387   : > { %v4587_v25 = vrot.slane %v4586_v19, 2  ;;  %v4593_v9 = vmax.f32 %v4591_v38, %v4592_v28  ;;  %v4600_v35 = vmax.f32 %v4598_v1, %v4599_v21  ;;  %v4606_v11 = vrot.slane %v4605_v43, 4 }
 0x388   : > { %v3714_v34 = vcombine.high %v3712_v36, %v3712_v36  ;;  %v4669_v60 = vrot.slane %v4668_v46, 4  ;;  %v4675_v50 = vsel %vm3911_vm3, %v3713_v30, -inf  ;;  %v4682_v15 = vsel %vm3911_vm3, %v3712_v36, -inf }
 0x389   : > { %v4588_v17 = vmax.f32 %v4586_v19, %v4587_v25  ;;  %v4594_v14 = vrot.slane %v4593_v9, 2  ;;  %v4601_v8 = vrot.slane %v4600_v35, 2  ;;  %v4607_v22 = vmax.f32 %v4605_v43, %v4606_v11 }
 0x38a   : > { %v4670_v51 = vmax.f32 %v4668_v46, %v4669_v60  ;;  %v4676_v45 = vrot.slane %v4675_v50, 4  ;;  %v4683_v52 = vrot.slane %v4682_v15, 4  ;;  %v4689_v41 = vsel %vm3911_vm3, %v3714_v34, -inf }
 0x38b   : > { %v4589_v33 = vrot.slane %v4588_v17, 1  ;;  %v4595_v62 = vmax.f32 %v4593_v9, %v4594_v14  ;;  %v4602_v7 = vmax.f32 %v4600_v35, %v4601_v8  ;;  %v4608_v42 = vrot.slane %v4607_v22, 2 }
 0x38c   : > { %v4671_v18 = vrot.slane %v4670_v51, 2  ;;  %v4677_v47 = vmax.f32 %v4675_v50, %v4676_v45  ;;  %v4684_v3 = vmax.f32 %v4682_v15, %v4683_v52  ;;  %v4690_v39 = vrot.slane %v4689_v41, 4 }
 0x38d   : > { %v4590_v31 = vmax.f32 %v4588_v17, %v4589_v33  ;;  %v4596_v29 = vrot.slane %v4595_v62, 1  ;;  %v4603_v24 = vrot.slane %v4602_v7, 1  ;;  %v4609_v12 = vmax.f32 %v4607_v22, %v4608_v42 }
 0x38e   : > { %v4672_v16 = vmax.f32 %v4670_v51, %v4671_v18  ;;  %v4678_v32 = vrot.slane %v4677_v47, 2  ;;  %v4685_v53 = vrot.slane %v4684_v3, 2  ;;  %v4691_v20 = vmax.f32 %v4689_v41, %v4690_v39 }
 0x38f   : > { %v4597_v61 = vmax.f32 %v4595_v62, %v4596_v29  ;;  %v4604_v48 = vmax.f32 %v4602_v7, %v4603_v24  ;;  %v4610_v57 = vrot.slane %v4609_v12, 1  ;;  %v4856_v13 = vmax.f32 %v4590_v31, %v11154_v58 }
 0x390   : > { %v4673_v59 = vrot.slane %v4672_v16, 1  ;;  %v4679_v0 = vmax.f32 %v4677_v47, %v4678_v32  ;;  %v4686_v37 = vmax.f32 %v4684_v3, %v4685_v53  ;;  %v4692_v38 = vrot.slane %v4691_v20, 2 }
 0x391   : > { %v4611_v1 = vmax.f32 %v4609_v12, %v4610_v57  ;;  %v4857_v19 = vmax.f32 %v4597_v61, %v11169_v4  ;;  %v4858_v28 = vmax.f32 %v4604_v48, %v11171_v27  ;;  %v4927_v21 = vmul.f32 %v11142_v2, %v4856_v13 }
 0x392   : > { %v11217_v36 = vmax.f32 %v4672_v16, %v4673_v59  ;;  %v4680_v43 = vrot.slane %v4679_v0, 1  ;;  %v4687_v30 = vrot.slane %v4686_v37, 1  ;;  %v4693_v46 = vmax.f32 %v4691_v20, %v4692_v38 }
 0x393   : > { %v4859_v25 = vmax.f32 %v4611_v1, %v11173_v10  ;;  %v4928_v58 = vmul.f32 %v11142_v2, %v4857_v19  ;;  %v4929_v9 = vmul.f32 %v11142_v2, %v4858_v28  ;;  %v4998_v35 = vadd.f32 %v11151_v56, %v4927_v21 }
 0x394   : > { %v11223_v11 = vmax.f32 %v4679_v0, %v4680_v43  ;;  %v11225_v4 = vmax.f32 %v4686_v37, %v4687_v30  ;;  %v4694_v27 = vrot.slane %v4693_v46, 1  ;;  %v3671_v34 = vrot.slane %v11198_v26, %v10441_v63 }
 0x395   : > { %v4930_v60 = vmul.f32 %v11142_v2, %v4859_v25  ;;  %v4999_v50 = vadd.f32 %v11151_v56, %v4928_v58  ;;  %v5000_v10 = vadd.f32 %v11151_v56, %v4929_v9  ;;  %v3678_v15 = vrot.slane %v3664_v49, %v10441_v63 }
 0x396   : > { %v11233_v17 = vmax.f32 %v4693_v46, %v4694_v27  ;;  %v3679_v14 = vcombine.high %v3671_v34, %v3671_v34  ;;  %v4612_v8 = vsel %vm3911_vm3, %v3671_v34, -inf  ;;  %v3205_v22 = vmax.f32 %v11203_v6, 0.0 }
 0x397   : > { %v5001_v51 = vadd.f32 %v11151_v56, %v4930_v60  ;;  %v5190_v45 = vrot.slane %v4999_v50, 7  ;;  %v5192_v52 = vrot.slane %v5000_v10, 6  ;;  %v3680_v26 = vcombine.high %v3678_v15, %v3678_v15 }
 0x398   : > { %v4613_v41 = vrot.slane %v4612_v8, 4  ;;  %v4619_v33 = vsel %vm3911_vm3, %v3679_v14, -inf  ;;  %v4626_v62 = vsel %vm3911_vm3, %v3678_v15, -inf  ;;  %v3749_v7 = vcombine.high %v3205_v22, %v3205_v22 }
 0x399   : > { %v5191_v49 = vsel %vm5100_vm5, %v5190_v45, %v4998_v35  ;;  %v5194_v42 = vrot.slane %v5001_v51, 5  ;;  %v4620_v18 = vrot.slane %v4619_v33, 4  ;;  %v4627_v47 = vrot.slane %v4626_v62, 4 }
 0x39a   : > { %v5193_v3 = vsel %vm5103_vm6, %v5192_v52, %v5191_v49  ;;  %v4614_v39 = vmax.f32 %v4612_v8, %v4613_v41  ;;  %v4633_v6 = vsel %vm3911_vm3, %v3680_v26, -inf  ;;  %v3756_v31 = vrot.slane %v3205_v22, %v10441_v63 }
 0x39b   : > { %v4621_v29 = vmax.f32 %v4619_v33, %v4620_v18  ;;  %v4628_v24 = vmax.f32 %v4626_v62, %v4627_v47  ;;  %v4634_v12 = vrot.slane %v4633_v6, 4  ;;  %v11245_v16 = vsel %vm5106_vm7, %v5194_v42, %v5193_v3 }
 0x39c   : > { %v4615_v32 = vrot.slane %v4614_v39, 2  ;;  %v3763_v53 = vrot.slane %v3749_v7, %v10441_v63  ;;  %v3764_v20 = vcombine.high %v3756_v31, %v3756_v31  ;;  %v4752_v61 = vsel %vm3911_vm3, %v3756_v31, -inf }
 0x39d   : > { %v4622_v48 = vrot.slane %v4621_v29, 2  ;;  %v4629_v57 = vrot.slane %v4628_v24, 2  ;;  %v4635_v13 = vmax.f32 %v4633_v6, %v4634_v12  ;;  %v4753_v59 = vrot.slane %v4752_v61, 4 }
 0x39e   : > { %v4616_v0 = vmax.f32 %v4614_v39, %v4615_v32  ;;  %v3765_v37 = vcombine.high %v3763_v53, %v3763_v53  ;;  %v4759_v38 = vsel %vm3911_vm3, %v3764_v20, -inf  ;;  %v4766_v1 = vsel %vm3911_vm3, %v3763_v53, -inf }
 0x39f   : > { %v4623_v19 = vmax.f32 %v4621_v29, %v4622_v48  ;;  %v4630_v28 = vmax.f32 %v4628_v24, %v4629_v57  ;;  %v4636_v21 = vrot.slane %v4635_v13, 2  ;;  %v4754_v43 = vmax.f32 %v4752_v61, %v4753_v59 }
 0x3a0   : > { %v4617_v30 = vrot.slane %v4616_v0, 1  ;;  %v4760_v46 = vrot.slane %v4759_v38, 4  ;;  %v4767_v25 = vrot.slane %v4766_v1, 4  ;;  %v4773_v58 = vsel %vm3911_vm3, %v3765_v37, -inf  ;;  %v11923_v37 = vld [vmem:[#allocation16_spill] sm:$0xff] }
 0x3a1   : > { %v4624_v9 = vrot.slane %v4623_v19, 1  ;;  %v4631_v35 = vrot.slane %v4630_v28, 1  ;;  %v4637_v27 = vmax.f32 %v4635_v13, %v4636_v21  ;;  %v4755_v34 = vrot.slane %v4754_v43, 2  ;;  %v11268_v13 = vld [vmem:[#allocation2 + $0x31] sm:$0xff] }
 0x3a2   : > { %v4618_v60 = vmax.f32 %v4616_v0, %v4617_v30  ;;  %v4761_v50 = vmax.f32 %v4759_v38, %v4760_v46  ;;  %v4768_v10 = vmax.f32 %v4766_v1, %v4767_v25  ;;  %v4774_v15 = vrot.slane %v4773_v58, 4  ;;  %v11278_v30 = vld [vmem:[#allocation2 + $0x21] sm:$0xff]  ;;  %v11280_v46 = vld [vmem:[#allocation2 + $0x51] sm:$0xff] }
 0x3a3   : > { %v4625_v14 = vmax.f32 %v4623_v19, %v4624_v9  ;;  %v4632_v8 = vmax.f32 %v4630_v28, %v4631_v35  ;;  %v4638_v22 = vrot.slane %v4637_v27, 1  ;;  %v4756_v51 = vmax.f32 %v4754_v43, %v4755_v34 }
 0x3a4   : > { %v4860_v45 = vmax.f32 %v4618_v60, %v11217_v36  ;;  %v4762_v52 = vrot.slane %v4761_v50, 2  ;;  %v4769_v26 = vrot.slane %v4768_v10, 2  ;;  %v4775_v41 = vmax.f32 %v4773_v58, %v4774_v15  ;;  %v11296_v60 = vld [vmem:[#allocation2 + $0x41] sm:$0xff] }
 0x3a5   : > { %v4639_v33 = vmax.f32 %v4637_v27, %v4638_v22  ;;  %v4861_v62 = vmax.f32 %v4625_v14, %v11223_v11  ;;  %v4862_v7 = vmax.f32 %v4632_v8, %v11225_v4  ;;  %v4757_v42 = vrot.slane %v4756_v51, 1 }
 0x3a6   : > { %v4931_v49 = vmul.f32 %v11142_v2, %v4860_v45  ;;  %v4763_v18 = vmax.f32 %v4761_v50, %v4762_v52  ;;  %v4776_v47 = vrot.slane %v4775_v41, 2  ;;  %v4770_v36 = vmax.f32 %v4768_v10, %v4769_v26 }
 0x3a7   : > { %v4863_v3 = vmax.f32 %v4639_v33, %v11233_v17  ;;  %v4932_v39 = vmul.f32 %v11142_v2, %v4861_v62  ;;  %v4933_v6 = vmul.f32 %v11142_v2, %v4862_v7  ;;  %v3171_v24 = vadd.f32 %v11162_v55, %v11191_v54  ;;  %v11924_v54 = vld [vmem:[#allocation17_spill] sm:$0xff] }
 0x3a8   : > { %v5002_v31 = vadd.f32 %v11151_v56, %v4931_v49  ;;  %v11265_v32 = vmax.f32 %v4756_v51, %v4757_v42  ;;  %v4764_v17 = vrot.slane %v4763_v18, 1  ;;  %v4777_v53 = vmax.f32 %v4775_v41, %v4776_v47 }
 0x3a9   : > { %v4934_v29 = vmul.f32 %v11142_v2, %v4863_v3  ;;  %v5003_v11 = vadd.f32 %v11151_v56, %v4932_v39  ;;  %v5004_v4 = vadd.f32 %v11151_v56, %v4933_v6  ;;  %v4771_v48 = vrot.slane %v4770_v36, 1 }
 0x3aa   : > { %v5196_v12 = vrot.slane %v5002_v31, 4  ;;  %v3203_v57 = vmax.f32 %v3171_v24, 0.0  ;;  %v9289_v38 = vadd.f32 %v10947_v23, %v11923_v37  ;;  %v9290_v1 = vadd.f32 %v10967_v44, %v11924_v54  ;;  %v11291_v44 = vld [vmem:[%s11878_s5 + $0x10] sm:$0xff]  }
 0x3ab   : > { %v5005_v20 = vadd.f32 %v11151_v56, %v4934_v29  ;;  %v5198_v61 = vrot.slane %v5003_v11, 3  ;;  %v5200_v0 = vrot.slane %v5004_v4, 2  ;;  %v11286_v23 = vpack.c.bf16 %v11268_v13, %v11278_v30 }
 0x3ac   : > { %v5197_v59 = vsel %vm5109_vm8, %v5196_v12, %v11245_v16  ;;  %v3715_v21 = vcombine.high %v3203_v57, %v3203_v57  ;;  %v3722_v43 = vrot.slane %v3203_v57, %v10441_v63  ;;  %v4778_v16 = vrot.slane %v4777_v53, 1 }
 0x3ad   : > { %v5199_v19 = vsel %vm5112_vm9, %v5198_v61, %v5197_v59  ;;  %v5202_v28 = vrot.slane %v5005_v20, 1  ;;  %v3174_v58 = vadd.f32 %v11162_v55, %v9289_v38  ;;  %v11299_v50 = vmax.f32 %v4763_v18, %v4764_v17  ;;  %9044 = vmatmul.mubr.msk.bf16.vlgmr.msra.gmra.mrb[32].mxu1 %vm5014_vm4, %v11286_v23 }
 0x3ae   : > { %v5201_v25 = vsel %vm5115_vm10, %v5200_v0, %v5199_v19  ;;  %v3729_v35 = vrot.slane %v3715_v21, %v10441_v63  ;;  %v3730_v27 = vcombine.high %v3722_v43, %v3722_v43  ;;  %v4696_v34 = vsel %vm3911_vm3, %v3722_v43, -inf  ;;  %9052 = vmatpush3.bf16.msra.mxu1 %v11085_v5 }
 0x3af   : > { %v5203_v9 = vsel %vm5118_vm11, %v5202_v28, %v5201_v25  ;;  %v4697_v10 = vrot.slane %v4696_v34, 4  ;;  %v3206_v15 = vmax.f32 %v3174_v58, 0.0  ;;  %v11305_v14 = vpack.c.bf16 %v11280_v46, %v11296_v60  ;;  %9061 = vmatprep.subr.bf16.mxu1 %v11291_v44 }
 0x3b0   : > { %5233 = vst.msk [vmem:[#allocation2 + $0x71] sm:$0xff] %vm5014_vm4, %v5203_v9  ;;  %v3731_v8 = vcombine.high %v3729_v35, %v3729_v35  ;;  %v4703_v22 = vsel %vm3911_vm3, %v3730_v27, -inf  ;;  %v4710_v51 = vsel %vm3911_vm3, %v3729_v35, -inf  ;;  %v3172_v45 = vadd.f32 %v11162_v55, %v9290_v1 }
 0x3b1   : > { %v4698_v52 = vmax.f32 %v4696_v34, %v4697_v10  ;;  %v4704_v26 = vrot.slane %v4703_v22, 4  ;;  %v4711_v41 = vrot.slane %v4710_v51, 4  ;;  %v3766_v33 = vcombine.high %v3206_v15, %v3206_v15  ;;  %9047 = vmatprep.mubr.msk.bf16.mxu1 %vm5014_vm4, %v11305_v14 }
 0x3b2   : > { %v4772_v62 = vmax.f32 %v4770_v36, %v4771_v48  ;;  %v4779_v7 = vmax.f32 %v4777_v53, %v4778_v16  ;;  %v4717_v49 = vsel %vm3911_vm3, %v3731_v8, -inf  ;;  %v3773_v42 = vrot.slane %v3206_v15, %v10441_v63 }
 0x3b3   : > { %v4699_v18 = vrot.slane %v4698_v52, 2  ;;  %v4705_v47 = vmax.f32 %v4703_v22, %v4704_v26  ;;  %v4712_v55 = vmax.f32 %v4710_v51, %v4711_v41  ;;  %v4718_v3 = vrot.slane %v4717_v49, 4 }
 0x3b4   : > { %v3780_v5 = vrot.slane %v3766_v33, %v10441_v63  ;;  %v3781_v39 = vcombine.high %v3773_v42, %v3773_v42  ;;  %v4780_v6 = vsel %vm3911_vm3, %v3773_v42, -inf  ;;  %v3204_v31 = vmax.f32 %v3172_v45, 0.0  ;;  %v5235_v45 = vld [vmem:[#allocation2] sm:$0xff] }
 0x3b5   : > { %v4700_v29 = vmax.f32 %v4698_v52, %v4699_v18  ;;  %v4706_v11 = vrot.slane %v4705_v47, 2  ;;  %v4713_v4 = vrot.slane %v4712_v55, 2  ;;  %v4719_v24 = vmax.f32 %v4717_v49, %v4718_v3  ;;  %v11324_v52 = vld [vmem:[#allocation2 + $0x10] sm:$0xff] }
 0x3b6   : > { %v3782_v36 = vcombine.high %v3780_v5, %v3780_v5  ;;  %v4781_v12 = vrot.slane %v4780_v6, 4  ;;  %v4787_v17 = vsel %vm3911_vm3, %v3781_v39, -inf  ;;  %v4794_v53 = vsel %vm3911_vm3, %v3780_v5, -inf }
 0x3b7   : > { %v4701_v20 = vrot.slane %v4700_v29, 1  ;;  %v4707_v61 = vmax.f32 %v4705_v47, %v4706_v11  ;;  %v4714_v48 = vmax.f32 %v4712_v55, %v4713_v4  ;;  %v4720_v57 = vrot.slane %v4719_v24, 2 }
 0x3b8   : > { %v4782_v59 = vmax.f32 %v4780_v6, %v4781_v12  ;;  %v4788_v0 = vrot.slane %v4787_v17, 4  ;;  %v4795_v37 = vrot.slane %v4794_v53, 4  ;;  %v4801_v38 = vsel %vm3911_vm3, %v3782_v36, -inf  ;;  %v11337_v12 = vld [vmem:[#allocation2 + $0x71] sm:$0xff] }
 0x3b9   : > { %v4702_v54 = vmax.f32 %v4700_v29, %v4701_v20  ;;  %v4708_v1 = vrot.slane %v4707_v61, 1  ;;  %v4715_v19 = vrot.slane %v4714_v48, 1  ;;  %v4721_v28 = vmax.f32 %v4719_v24, %v4720_v57 }
 0x3ba   : > { %v4789_v21 = vmax.f32 %v4787_v17, %v4788_v0  ;;  %v4796_v43 = vmax.f32 %v4794_v53, %v4795_v37  ;;  %v4802_v25 = vrot.slane %v4801_v38, 4  ;;  %v3732_v16 = vcombine.high %v3204_v31, %v3204_v31  ;;  %v11342_v37 = vld [vmem:[#allocation2 + $0x61] sm:$0xff] }
 0x3bb   : > { %v4709_v58 = vmax.f32 %v4707_v61, %v4708_v1  ;;  %v4716_v9 = vmax.f32 %v4714_v48, %v4715_v19  ;;  %v4722_v35 = vrot.slane %v4721_v28, 1  ;;  %v4864_v27 = vmax.f32 %v4702_v54, %v11265_v32 }
 0x3bc   : > { %v4783_v34 = vrot.slane %v4782_v59, 2  ;;  %v4803_v10 = vmax.f32 %v4801_v38, %v4802_v25  ;;  %v3739_v51 = vrot.slane %v3204_v31, %v10441_v63  ;;  %v4790_v41 = vrot.slane %v4789_v21, 2 }
 0x3bd   : > { %v4723_v15 = vmax.f32 %v4721_v28, %v4722_v35  ;;  %v4865_v8 = vmax.f32 %v4709_v58, %v11299_v50  ;;  %v4866_v22 = vmax.f32 %v4716_v9, %v4772_v62  ;;  %v4935_v26 = vmul.f32 %v11142_v2, %v4864_v27 }
 0x3be   : > { %v4797_v33 = vrot.slane %v4796_v43, 2  ;;  %v3746_v49 = vrot.slane %v3732_v16, %v10441_v63  ;;  %v4784_v47 = vmax.f32 %v4782_v59, %v4783_v34  ;;  %v4804_v55 = vrot.slane %v4803_v10, 2 }
 0x3bf   : > { %v4867_v42 = vmax.f32 %v4723_v15, %v4779_v7  ;;  %v4936_v32 = vmul.f32 %v11142_v2, %v4865_v8  ;;  %v4937_v18 = vmul.f32 %v11142_v2, %v4866_v22  ;;  %v5243_v50 = vpack.c.bf16 %v11324_v52, %v5235_v45 }
 0x3c0   : > { %v3747_v39 = vcombine.high %v3739_v51, %v3739_v51  ;;  %v5006_v6 = vadd.f32 %v11151_v56, %v4935_v26  ;;  %v4791_v31 = vmax.f32 %v4789_v21, %v4790_v41  ;;  %v4798_v29 = vmax.f32 %v4796_v43, %v4797_v33  ;;  %v11354_v26 = vld [vmem:[#allocation2 + $0x30] sm:$0xff] }
 0x3c1   : > { %v4938_v62 = vmul.f32 %v11142_v2, %v4867_v42  ;;  %v5007_v3 = vadd.f32 %v11151_v56, %v4936_v32  ;;  %v5008_v5 = vadd.f32 %v11151_v56, %v4937_v18  ;;  %v3748_v7 = vcombine.high %v3746_v49, %v3746_v49  ;;  %v11356_v32 = vld [vmem:[#allocation2 + $0x50] sm:$0xff] }
 0x3c2   : > { %v4724_v36 = vsel %vm3911_vm3, %v3739_v51, -inf  ;;  %v4805_v17 = vmax.f32 %v4803_v10, %v4804_v55  ;;  %v4731_v20 = vsel %vm3911_vm3, %v3747_v39, -inf  ;;  %v4738_v61 = vsel %vm3911_vm3, %v3746_v49, -inf }
 0x3c3   : > { %v5009_v11 = vadd.f32 %v11151_v56, %v4938_v62  ;;  %v5204_v4 = vrot.slane %v5007_v3, 7  ;;  %v5206_v24 = vrot.slane %v5008_v5, 6  ;;  %v4725_v53 = vrot.slane %v4724_v36, 4  ;;  %v5237_v3 = vld [vmem:[#allocation2 + $0x20] sm:$0xff] }
 0x3c4   : > { %v4732_v59 = vrot.slane %v4731_v20, 4  ;;  %v4739_v0 = vrot.slane %v4738_v61, 4  ;;  %v4745_v1 = vsel %vm3911_vm3, %v3748_v7, -inf  ;;  %v11348_v19 = vpack.c.bf16 %v11337_v12, %v11342_v37  ;;  %v5239_v7 = vld [vmem:[#allocation2 + $0x40] sm:$0xff] }
 0x3c5   : > { %v5205_v48 = vsel %vm5100_vm5, %v5204_v4, %v5006_v6  ;;  %v5208_v57 = vrot.slane %v5009_v11, 5  ;;  %v4726_v54 = vmax.f32 %v4724_v36, %v4725_v53  ;;  %v4746_v43 = vrot.slane %v4745_v1, 4 }
 0x3c6   : > { %v5207_v38 = vsel %vm5103_vm6, %v5206_v24, %v5205_v48  ;;  %v4733_v28 = vmax.f32 %v4731_v20, %v4732_v59  ;;  %v4740_v21 = vmax.f32 %v4738_v61, %v4739_v0  ;;  %v4785_v16 = vrot.slane %v4784_v47, 1  ;;  %9048 = vmatmul.mubr.msk.bf16.gmra.mrb[36].mxu1 %vm5014_vm4, %v11348_v19  ;;  %v5242_v59 = vld [vmem:[#allocation2 + $0x70] sm:$0xff] }
 0x3c7   : > { %v5209_v25 = vsel %vm5106_vm7, %v5208_v57, %v5207_v38  ;;  %v4792_v58 = vrot.slane %v4791_v31, 1  ;;  %v4799_v9 = vrot.slane %v4798_v29, 1  ;;  %v4727_v35 = vrot.slane %v4726_v54, 2  ;;  %9053 = vmatprep.mubr.msk.bf16.mxu1 %vm5014_vm4, %v5243_v50  ;;  %v5430_v38 = vld [vmem:[#allocation2 + $0x2] sm:$0xff] }
 0x3c8   : > { %v4734_v27 = vrot.slane %v4733_v28, 2  ;;  %v4741_v34 = vrot.slane %v4740_v21, 2  ;;  %v4747_v10 = vmax.f32 %v4745_v1, %v4746_v43  ;;  %v4806_v15 = vrot.slane %v4805_v17, 1 }
 0x3c9   : > { %v4728_v8 = vmax.f32 %v4726_v54, %v4727_v35  ;;  %v4786_v41 = vmax.f32 %v4784_v47, %v4785_v16  ;;  %v4793_v33 = vmax.f32 %v4791_v31, %v4792_v58  ;;  %v4800_v49 = vmax.f32 %v4798_v29, %v4799_v9  ;;  %v9595_v47 = vld [vmem:[%s11878_s5 + $0x18] sm:$0xff]  }
 0x3ca   : > { %v4735_v22 = vmax.f32 %v4733_v28, %v4734_v27  ;;  %v4742_v51 = vmax.f32 %v4740_v21, %v4741_v34  ;;  %v4748_v45 = vrot.slane %v4747_v10, 2  ;;  %v5651_v50 = vpack.c.bf16 %v11296_v60, %v11268_v13  ;;  %v5431_v54 = vld [vmem:[#allocation2 + $0x12] sm:$0xff]  ;;  %v5241_v21 = vld [vmem:[#allocation2 + $0x60] sm:$0xff] }
 0x3cb   : > { %v4729_v42 = vrot.slane %v4728_v8, 1  ;;  %v4807_v5 = vmax.f32 %v4805_v17, %v4806_v15  ;;  %v11361_v6 = vpack.c.bf16 %v11354_v26, %v5237_v3  ;;  %v11367_v4 = vpack.c.bf16 %v11356_v32, %v5239_v7 }
 0x3cc   : > { %v4736_v18 = vrot.slane %v4735_v22, 1  ;;  %v4743_v55 = vrot.slane %v4742_v51, 1  ;;  %v4749_v62 = vmax.f32 %v4747_v10, %v4748_v45  ;;  %v11381_v16 = vpack.c.bf16 %v5242_v59, %v5241_v21 }
 0x3cd   : > { %v4730_v39 = vmax.f32 %v4728_v8, %v4729_v42  ;;  %v5438_v35 = vpack.c.bf16 %v5431_v54, %v5430_v38  ;;  %v5436_v42 = vld [vmem:[#allocation2 + $0x62] sm:$0xff]  ;;  %vm7861_vm3 = vcmask 1044480  }
 0x3ce   : > { %v4737_v31 = vmax.f32 %v4735_v22, %v4736_v18  ;;  %v4744_v29 = vmax.f32 %v4742_v51, %v4743_v55  ;;  %v4750_v11 = vrot.slane %v4749_v62, 1  ;;  %9054 = vmatmul.mubr.msk.bf16.vlgmr.msra.gmra.mrb[32].mxu1 %vm5014_vm4, %v11361_v6  ;;  %v5433_v22 = vld [vmem:[#allocation2 + $0x32] sm:$0xff]  ;;  %v5432_v51 = vld [vmem:[#allocation2 + $0x22] sm:$0xff]  ;;  %v5544_v55 = vpack.c.bf16 %v5237_v3, %v11324_v52 }
 0x3cf   : > { %v4868_v24 = vmax.f32 %v4730_v39, %v4786_v41  ;;  %9062 = vmatpush3.bf16.msra.mxu1 %v11291_v44  ;;  %9057 = vmatprep.mubr.msk.bf16.mxu1 %vm5014_vm4, %v11367_v4  ;;  %v11392_v45 = vpack.c.bf16 %v5433_v22, %v5432_v51  ;;  %v9596_v41 = vld [vmem:[%s11878_s5 + $0x20] sm:$0xff]   ;;  %v5546_v39 = vpack.c.bf16 %v5241_v21, %v11356_v32 }
 0x3d0   : > { %v4751_v36 = vmax.f32 %v4749_v62, %v4750_v11  ;;  %v4869_v17 = vmax.f32 %v4737_v31, %v4793_v33  ;;  %v4870_v53 = vmax.f32 %v4744_v29, %v4800_v49  ;;  %9071 = vmatprep.subr.bf16.mxu1 %v9595_v47  ;;  %v5437_v49 = vld [vmem:[#allocation2 + $0x72] sm:$0xff]  ;;  %v5545_v62 = vpack.c.bf16 %v5239_v7, %v11354_v26 }
 0x3d1   : > { %v4939_v20 = vmul.f32 %v11142_v2, %v4868_v24  ;;  %v5441_v18 = vpack.c.bf16 %v5437_v49, %v5436_v42  ;;  %v5650_v3 = vpack.c.bf16 %v11278_v30, %v11166_v40  ;;  %v9598_v26 = vld [vmem:[%s11878_s5 + $0x30] sm:$0xff]   ;;  %v5652_v32 = vpack.c.bf16 %v11342_v37, %v11280_v46  ;;  %v9599_v46 = vld [vmem:[%s11878_s5 + $0x38] sm:$0xff]  }
 0x3d2   : > { %v4871_v61 = vmax.f32 %v4751_v36, %v4807_v5  ;;  %v4940_v48 = vmul.f32 %v11142_v2, %v4869_v17  ;;  %v4941_v57 = vmul.f32 %v11142_v2, %v4870_v53  ;;  %v9597_v5 = vld [vmem:[%s11878_s5 + $0x28] sm:$0xff]   ;;  %v5756_v7 = vpack.c.bf16 %v5432_v51, %v5431_v54  ;;  %v5968_v11 = vld [vmem:[#allocation2 + $0x91] sm:$0xff]  ;;  %v11475_v36 = vld [vmem:[%s11879_s6] ss:$0 sm:$0xff] }
 0x3d3   : > { %v5010_v0 = vadd.f32 %v11151_v56, %v4939_v20 }
 0x3d4   : > { %v4942_v1 = vmul.f32 %v11142_v2, %v4871_v61  ;;  %v5011_v44 = vadd.f32 %v11151_v56, %v4940_v48  ;;  %v5012_v28 = vadd.f32 %v11151_v56, %v4941_v57 }
 0x3d5   : > { %v5210_v43 = vrot.slane %v5010_v0, 4 }
 0x3d6   : > { %v5013_v58 = vadd.f32 %v11151_v56, %v4942_v1  ;;  %v5212_v9 = vrot.slane %v5011_v44, 3  ;;  %v5214_v34 = vrot.slane %v5012_v28, 2  ;;  %9058 = vmatmul.mubr.msk.bf16.gmra.mrb[36].mxu1 %vm5014_vm4, %v11381_v16  ;;  %v5435_v56 = vld [vmem:[#allocation2 + $0x52] sm:$0xff] }
 0x3d7   : > { %v5211_v27 = vsel %vm5109_vm8, %v5210_v43, %v5209_v25  ;;  %9063 = vmatprep.mubr.msk.bf16.mxu1 %vm5014_vm4, %v5438_v35  ;;  %v5434_v25 = vld [vmem:[#allocation2 + $0x42] sm:$0xff]  ;;  %v5758_v13 = vpack.c.bf16 %v5436_v42, %v5435_v56 }
 0x3d8   : > { %v5213_v2 = vsel %vm5112_vm9, %v5212_v9, %v5211_v27  ;;  %v5216_v10 = vrot.slane %v5013_v58, 1  ;;  %v5440_v33 = vpack.c.bf16 %v5435_v56, %v5434_v25  ;;  %v5757_v31 = vpack.c.bf16 %v5434_v25, %v5433_v22 }
 0x3d9   : > { %v5215_v15 = vsel %vm5115_vm10, %v5214_v34, %v5213_v2 }
 0x3da   : > { %v5217_v8 = vsel %vm5118_vm11, %v5216_v10, %v5215_v15 }
 0x3db   : > { %5234 = vst.msk [vmem:[#allocation2 + $0x81] sm:$0xff] %vm5014_vm4, %v5217_v8 }
 0x3de   : > { %9064 = vmatmul.mubr.msk.bf16.vlgmr.msra.gmra.mrb[32].mxu1 %vm5014_vm4, %v11392_v45 }
 0x3df   : > { %9072 = vmatpush3.bf16.msra.mxu1 %v9595_v47  ;;  %9067 = vmatprep.mubr.msk.bf16.mxu1 %vm5014_vm4, %v5440_v33 }
 0x3e0   : > { %9081 = vmatprep.subr.bf16.mxu1 %v9596_v41 }
 0x3e2   : > { %v5543_v47 = vld [vmem:[#allocation2 + $0x80] sm:$0xff] }
 0x3e3   : > { %v5547_v52 = vpack.c.bf16 %v5543_v47, %v5242_v59  ;;  %v5649_v40 = vld [vmem:[#allocation2 + $0x81] sm:$0xff] }
 0x3e4   : > { %v5653_v30 = vpack.c.bf16 %v5649_v40, %v11337_v12  ;;  %v5755_v60 = vld [vmem:[#allocation2 + $0x82] sm:$0xff] }
 0x3e5   : > { %v5759_v37 = vpack.c.bf16 %v5755_v60, %v5437_v49  ;;  %v9600_v12 = vld [vmem:[%s11878_s5 + $0x40] sm:$0xff]  }
 0x3e6   : > { %9068 = vmatmul.mubr.msk.bf16.gmra.mrb[36].mxu1 %vm5014_vm4, %v5441_v18 }
 0x3e7   : > { %9073 = vmatprep.mubr.msk.bf16.mxu1 %vm5014_vm4, %v5544_v55 }
 0x3ee   : > { %9074 = vmatmul.mubr.msk.bf16.vlgmr.msra.gmra.mrb[32].mxu1 %vm5014_vm4, %v5545_v62 }
 0x3ef   : > { %9082 = vmatpush3.bf16.msra.mxu1 %v9596_v41  ;;  %9077 = vmatprep.mubr.msk.bf16.mxu1 %vm5014_vm4, %v5546_v39 }
 0x3f0   : > { %9091 = vmatprep.subr.bf16.mxu1 %v9597_v5 }
 0x3f6   : > { %9078 = vmatmul.mubr.msk.bf16.gmra.mrb[36].mxu1 %vm5014_vm4, %v5547_v52 }
 0x3f7   : > { %9083 = vmatprep.mubr.msk.bf16.mxu1 %vm5014_vm4, %v5650_v3 }
 0x3fe   : > { %9084 = vmatmul.mubr.msk.bf16.vlgmr.msra.gmra.mrb[32].mxu1 %vm5014_vm4, %v5651_v50  ;;  %v5862_v50 = vld [vmem:[#allocation2 + $0x90] sm:$0xff] }
 0x3ff   : > { %9092 = vmatpush3.bf16.msra.mxu1 %v9597_v5  ;;  %9087 = vmatprep.mubr.msk.bf16.mxu1 %vm5014_vm4, %v5652_v32  ;;  %v5866_v29 = vpack.c.bf16 %v5862_v50, %v5543_v47 }
 0x400   : > { %9101 = vmatprep.subr.bf16.mxu1 %v9598_v26 }
 0x406   : > { %9088 = vmatmul.mubr.msk.bf16.gmra.mrb[36].mxu1 %vm5014_vm4, %v5653_v30 }
 0x407   : > { %9093 = vmatprep.mubr.msk.bf16.mxu1 %vm5014_vm4, %v5756_v7 }
 0x40e   : > { %9094 = vmatmul.mubr.msk.bf16.vlgmr.msra.gmra.mrb[32].mxu1 %vm5014_vm4, %v5757_v31 }
 0x40f   : > { %9102 = vmatpush3.bf16.msra.mxu1 %v9598_v26  ;;  %9097 = vmatprep.mubr.msk.bf16.mxu1 %vm5014_vm4, %v5758_v13 }
 0x410   : > { %9111 = vmatprep.subr.bf16.mxu1 %v9599_v46 }
 0x416   : > { %9098 = vmatmul.mubr.msk.bf16.gmra.mrb[36].mxu1 %vm5014_vm4, %v5759_v37 }
 0x417   : > { %9103 = vmatprep.mubr.msk.bf16.mxu1 %vm5014_vm4, %v11361_v6  ;;  %v11925_v6 = vmov 0.0  }
 0x418   : > { %6662 = vst.msk [vmem:[#allocation3 + $0x10] sm:$0x3f] %vm6659_vm12, %v11925_v6  ;;  %6660 = vst.msk [vmem:[#allocation3] sm:$0x3f] %vm6659_vm12, %v11925_v6 }
 0x419   : > { %6661 = vst.msk [vmem:[#allocation3 + $0x8] sm:$0x3f] %vm6659_vm12, %v11925_v6  ;;  %6663 = vst.msk [vmem:[#allocation3 + $0x18] sm:$0x3f] %vm6659_vm12, %v11925_v6 }
 0x41a   : > { %6664 = vst.msk [vmem:[#allocation3 + $0x20] sm:$0x3f] %vm6659_vm12, %v11925_v6  ;;  %6665 = vst.msk [vmem:[#allocation3 + $0x28] sm:$0x3f] %vm6659_vm12, %v11925_v6 }
 0x41e   : > { %9104 = vmatmul.mubr.msk.bf16.vlgmr.msra.gmra.mrb[32].mxu1 %vm5014_vm4, %v11367_v4  ;;  %v5972_v4 = vpack.c.bf16 %v5968_v11, %v5649_v40 }
 0x41f   : > { %9112 = vmatpush3.bf16.msra.mxu1 %v9599_v46  ;;  %9107 = vmatprep.mubr.msk.bf16.mxu1 %vm5014_vm4, %v11381_v16 }
 0x420   : > { %9121 = vmatprep.subr.bf16.mxu1 %v9600_v12 }
 0x426   : > { %9108 = vmatmul.mubr.msk.bf16.gmra.mrb[36].mxu1 %vm5014_vm4, %v5866_v29 }
 0x427   : > { %9113 = vmatprep.mubr.msk.bf16.mxu1 %vm5014_vm4, %v11286_v23  ;;  %v6074_v23 = vld [vmem:[#allocation2 + $0x92] sm:$0xff] }
 0x428   : > { %v6078_v24 = vpack.c.bf16 %v6074_v23, %v5755_v60 }
 0x42e   : > { %9114 = vmatmul.mubr.msk.bf16.vlgmr.msra.gmra.mrb[32].mxu1 %vm5014_vm4, %v11305_v14  ;;  %v9601_v14 = vld [vmem:[%s11882_s9 + $0x10] sm:$0xff]  }
 0x42f   : > { %9122 = vmatpush3.bf16.msra.mxu1 %v9600_v12  ;;  %9117 = vmatprep.mubr.msk.bf16.mxu1 %vm5014_vm4, %v11348_v19  ;;  %v9602_v19 = vld [vmem:[%s11882_s9 + $0x18] sm:$0xff]  }
 0x430   : > { %9131 = vmatprep.subr.bf16.mxu1 %v11925_v6 }
 0x436   : > { %9118 = vmatmul.mubr.msk.bf16.gmra.mrb[36].mxu1 %vm5014_vm4, %v5972_v4 }
 0x437   : > { %9123 = vmatprep.mubr.msk.bf16.mxu1 %vm5014_vm4, %v11392_v45 }
 0x43e   : > { %9124 = vmatmul.mubr.msk.bf16.vlgmr.msra.gmra.mrb[32].mxu1 %vm5014_vm4, %v5440_v33 }
 0x43f   : > { %9127 = vmatprep.mubr.msk.bf16.mxu1 %vm5014_vm4, %v5441_v18  ;;  %9132 = vmatpush3.bf16.msra.mxu1 %v9601_v14 }
 0x440   : > { %9133 = vmatprep.subr.bf16.mxu1 %v11925_v6 }
 0x443   : > { %9134 = vmatpush3.bf16.msra.mxu1 %v9602_v19 }
 0x444   : > { %9139 = vmatprep.subr.bf16.mxu1 %v11925_v6 }
 0x446   : > { %9128 = vmatmul.mubr.msk.bf16.gmra.mrb[36].mxu1 %vm5014_vm4, %v6078_v24  ;;  %vm7857_vm4 = vcmask 80896  }
 0x447   : > { %9135 = vmatprep.mubr.msk.bf16.mxu1 %vm9675_vm13, %v11925_v6 }
 0x511   : > { %v9125_v17 = vpop.f32.mrb[32].mxu1 }
 0x512   : > { %v6182_v53 = vadd.f32 %v9125_v17, %v11475_v36  ;;  %v6134_v20 = vpop.f32.mrb[33].mxu1 }
 0x513   : > { %v6180_v61 = vadd.f32 %v11475_v36, %v6134_v20  ;;  %v9126_v48 = vpop.f32.mrb[34].mxu1 }
 0x514   : > { %v6190_v57 = vmax.f32 %v6182_v53, 0.0  ;;  %v6183_v59 = vadd.f32 %v9126_v48, %v11475_v36  ;;  %v6137_v0 = vpop.f32.mrb[35].mxu1 }
 0x515   : > { %v6188_v38 = vmax.f32 %v6180_v61, 0.0  ;;  %v6181_v54 = vadd.f32 %v11475_v36, %v6137_v0 }
 0x516   : > { %v6238_v1 = vcombine.high %v6190_v57, %v6190_v57  ;;  %v6245_v44 = vrot.slane %v6190_v57, %v10441_v63  ;;  %v11482_v28 = vmax.f32 %v6183_v59, 0.0 }
 0x517   : > { %v6204_v21 = vcombine.high %v6188_v38, %v6188_v38  ;;  %v6211_v43 = vrot.slane %v6188_v38, %v10441_v63  ;;  %v11485_v16 = vmax.f32 %v6181_v54, 0.0 }
 0x518   : > { %v6252_v58 = vrot.slane %v6238_v1, %v10441_v63  ;;  %v6253_v9 = vcombine.high %v6245_v44, %v6245_v44  ;;  %v6429_v35 = vsel %vm6372_vm14, %v6245_v44, -inf  ;;  %v6255_v27 = vcombine.high %v11482_v28, %v11482_v28 }
 0x519   : > { %v6430_v34 = vrot.slane %v6429_v35, 4  ;;  %v6218_v2 = vrot.slane %v6204_v21, %v10441_v63  ;;  %v6219_v10 = vcombine.high %v6211_v43, %v6211_v43  ;;  %v6373_v15 = vsel %vm6372_vm14, %v6211_v43, -inf  ;;  %v11493_v8 = vpop.f32.mrb[36].mxu1 }
 0x51a   : > { %v6254_v22 = vcombine.high %v6252_v58, %v6252_v58  ;;  %v6436_v56 = vsel %vm6372_vm14, %v6253_v9, -inf  ;;  %v6443_v51 = vsel %vm6372_vm14, %v6252_v58, -inf  ;;  %v6374_v45 = vrot.slane %v6373_v15, 4  ;;  %v11497_v25 = vpop.f32.mrb[37].mxu1 }
 0x51b   : > { %v6431_v41 = vmax.f32 %v6429_v35, %v6430_v34  ;;  %v6437_v33 = vrot.slane %v6436_v56, 4  ;;  %v6444_v49 = vrot.slane %v6443_v51, 4  ;;  %v6220_v42 = vcombine.high %v6218_v2, %v6218_v2  ;;  %v11499_v18 = vpop.f32.mrb[38].mxu1 }
 0x51c   : > { %v6450_v55 = vsel %vm6372_vm14, %v6254_v22, -inf  ;;  %v6375_v62 = vmax.f32 %v6373_v15, %v6374_v45  ;;  %v6380_v5 = vsel %vm6372_vm14, %v6219_v10, -inf  ;;  %v6387_v39 = vsel %vm6372_vm14, %v6218_v2, -inf  ;;  %v11504_v47 = vpop.f32.mrb[39].mxu1 }
 0x51d   : > { %v6432_v52 = vrot.slane %v6431_v41, 2  ;;  %v6438_v3 = vmax.f32 %v6436_v56, %v6437_v33  ;;  %v6445_v26 = vmax.f32 %v6443_v51, %v6444_v49  ;;  %v6451_v32 = vrot.slane %v6450_v55, 4 }
 0x51e   : > { %v6376_v40 = vrot.slane %v6375_v62, 2  ;;  %v6381_v30 = vrot.slane %v6380_v5, 4  ;;  %v6388_v7 = vrot.slane %v6387_v39, 4  ;;  %v6394_v31 = vsel %vm6372_vm14, %v6220_v42, -inf }
 0x51f   : > { %v6433_v46 = vmax.f32 %v6431_v41, %v6432_v52  ;;  %v6439_v13 = vrot.slane %v6438_v3, 2  ;;  %v6446_v60 = vrot.slane %v6445_v26, 2  ;;  %v6452_v37 = vmax.f32 %v6450_v55, %v6451_v32 }
 0x520   : > { %v6377_v12 = vmax.f32 %v6375_v62, %v6376_v40  ;;  %v6382_v50 = vmax.f32 %v6380_v5, %v6381_v30  ;;  %v6389_v29 = vmax.f32 %v6387_v39, %v6388_v7  ;;  %v6395_v11 = vrot.slane %v6394_v31, 4 }
 0x521   : > { %v6434_v4 = vrot.slane %v6433_v46, 1  ;;  %v6440_v23 = vmax.f32 %v6438_v3, %v6439_v13  ;;  %v6447_v24 = vmax.f32 %v6445_v26, %v6446_v60  ;;  %v6453_v14 = vrot.slane %v6452_v37, 2 }
 0x522   : > { %v6378_v19 = vrot.slane %v6377_v12, 1  ;;  %v6383_v17 = vrot.slane %v6382_v50, 2  ;;  %v6390_v53 = vrot.slane %v6389_v29, 2  ;;  %v6396_v20 = vmax.f32 %v6394_v31, %v6395_v11 }
 0x523   : > { %v11507_v61 = vmax.f32 %v6433_v46, %v6434_v4  ;;  %v6441_v48 = vrot.slane %v6440_v23, 1  ;;  %v6448_v57 = vrot.slane %v6447_v24, 1  ;;  %v6454_v59 = vmax.f32 %v6452_v37, %v6453_v14 }
 0x524   : > { %v11509_v0 = vmax.f32 %v6377_v12, %v6378_v19  ;;  %v6384_v38 = vmax.f32 %v6382_v50, %v6383_v17  ;;  %v6391_v54 = vmax.f32 %v6389_v29, %v6390_v53  ;;  %v6397_v1 = vrot.slane %v6396_v20, 2 }
 0x525   : > { %v11511_v44 = vmax.f32 %v6440_v23, %v6441_v48  ;;  %v11513_v21 = vmax.f32 %v6447_v24, %v6448_v57  ;;  %v6455_v43 = vrot.slane %v6454_v59, 1  ;;  %v6262_v58 = vrot.slane %v11482_v28, %v10441_v63 }
 0x526   : > { %v6385_v9 = vrot.slane %v6384_v38, 1  ;;  %v6392_v35 = vrot.slane %v6391_v54, 1  ;;  %v6398_v34 = vmax.f32 %v6396_v20, %v6397_v1  ;;  %v6269_v2 = vrot.slane %v6255_v27, %v10441_v63 }
 0x527   : > { %v11518_v10 = vmax.f32 %v6454_v59, %v6455_v43  ;;  %v6270_v15 = vcombine.high %v6262_v58, %v6262_v58  ;;  %v6457_v22 = vsel %vm6372_vm14, %v6262_v58, -inf  ;;  %v6221_v56 = vcombine.high %v11485_v16, %v11485_v16 }
 0x528   : > { %v11523_v51 = vmax.f32 %v6384_v38, %v6385_v9  ;;  %v11525_v45 = vmax.f32 %v6391_v54, %v6392_v35  ;;  %v6399_v41 = vrot.slane %v6398_v34, 1  ;;  %v6271_v33 = vcombine.high %v6269_v2, %v6269_v2 }
 0x529   : > { %v6458_v28 = vrot.slane %v6457_v22, 4  ;;  %v6464_v49 = vsel %vm6372_vm14, %v6270_v15, -inf  ;;  %v6471_v42 = vsel %vm6372_vm14, %v6269_v2, -inf  ;;  %v6228_v27 = vrot.slane %v11485_v16, %v10441_v63  ;;  %v11546_v15 = vld [vmem:[%s11880_s7] ss:$0 sm:$0xff] }
 0x52a   : > { %v11531_v55 = vmax.f32 %v6398_v34, %v6399_v41  ;;  %v6465_v62 = vrot.slane %v6464_v49, 4  ;;  %v6472_v5 = vrot.slane %v6471_v42, 4  ;;  %v6478_v39 = vsel %vm6372_vm14, %v6271_v33, -inf }
 0x52b   : > { %v6459_v52 = vmax.f32 %v6457_v22, %v6458_v28  ;;  %v6479_v3 = vrot.slane %v6478_v39, 4  ;;  %v6235_v26 = vrot.slane %v6221_v56, %v10441_v63  ;;  %v6236_v32 = vcombine.high %v6228_v27, %v6228_v27 }
 0x52c   : > { %v6466_v40 = vmax.f32 %v6464_v49, %v6465_v62  ;;  %v6473_v30 = vmax.f32 %v6471_v42, %v6472_v5  ;;  %v6401_v7 = vsel %vm6372_vm14, %v6228_v27, -inf  ;;  %v11538_v31 = vadd.f32 %v11493_v8, %v11475_v36  ;;  %v11554_v62 = vld [vmem:[%s11881_s8] ss:$0 sm:$0xff] }
 0x52d   : > { %v6460_v16 = vrot.slane %v6459_v52, 2  ;;  %v6480_v46 = vmax.f32 %v6478_v39, %v6479_v3  ;;  %v6237_v13 = vcombine.high %v6235_v26, %v6235_v26  ;;  %v6402_v60 = vrot.slane %v6401_v7, 4 }
 0x52e   : > { %v6467_v37 = vrot.slane %v6466_v40, 2  ;;  %v6474_v12 = vrot.slane %v6473_v30, 2  ;;  %v6408_v50 = vsel %vm6372_vm14, %v6236_v32, -inf  ;;  %v6415_v29 = vsel %vm6372_vm14, %v6235_v26, -inf }
 0x52f   : > { %v6461_v11 = vmax.f32 %v6459_v52, %v6460_v16  ;;  %v6481_v4 = vrot.slane %v6480_v46, 2  ;;  %v6403_v23 = vmax.f32 %v6401_v7, %v6402_v60  ;;  %v6409_v24 = vrot.slane %v6408_v50, 4 }
 0x530   : > { %v6468_v14 = vmax.f32 %v6466_v40, %v6467_v37  ;;  %v6475_v19 = vmax.f32 %v6473_v30, %v6474_v12  ;;  %v6416_v17 = vrot.slane %v6415_v29, 4  ;;  %v6422_v8 = vsel %vm6372_vm14, %v6237_v13, -inf }
 0x531   : > { %v6462_v53 = vrot.slane %v6461_v11, 1  ;;  %v6482_v20 = vmax.f32 %v6480_v46, %v6481_v4  ;;  %v6404_v48 = vrot.slane %v6403_v23, 2  ;;  %v6410_v57 = vmax.f32 %v6408_v50, %v6409_v24 }
 0x532   : > { %v6469_v59 = vrot.slane %v6468_v14, 1  ;;  %v6476_v38 = vrot.slane %v6475_v19, 1  ;;  %v6417_v54 = vmax.f32 %v6415_v29, %v6416_v17  ;;  %v6423_v1 = vrot.slane %v6422_v8, 4 }
 0x533   : > { %v6463_v43 = vmax.f32 %v6461_v11, %v6462_v53  ;;  %v6483_v58 = vrot.slane %v6482_v20, 1  ;;  %v6405_v9 = vmax.f32 %v6403_v23, %v6404_v48  ;;  %v6411_v35 = vrot.slane %v6410_v57, 2 }
 0x534   : > { %v6470_v34 = vmax.f32 %v6468_v14, %v6469_v59  ;;  %v6477_v2 = vmax.f32 %v6475_v19, %v6476_v38  ;;  %v6418_v22 = vrot.slane %v6417_v54, 2  ;;  %v6424_v56 = vmax.f32 %v6422_v8, %v6423_v1 }
 0x535   : > { %v6484_v41 = vmax.f32 %v6482_v20, %v6483_v58  ;;  %v6601_v33 = vmax.f32 %v11507_v61, %v6463_v43  ;;  %v6406_v28 = vrot.slane %v6405_v9, 1  ;;  %v6412_v49 = vmax.f32 %v6410_v57, %v6411_v35 }
 0x536   : > { %v6602_v42 = vmax.f32 %v11511_v44, %v6470_v34  ;;  %v6603_v27 = vmax.f32 %v11513_v21, %v6477_v2  ;;  %v6419_v5 = vmax.f32 %v6417_v54, %v6418_v22  ;;  %v6425_v39 = vrot.slane %v6424_v56, 2 }
 0x537   : > { %v6604_v52 = vmax.f32 %v11518_v10, %v6484_v41  ;;  %v6624_v3 = vmul.f32 %v11546_v15, %v6601_v33  ;;  %v6407_v26 = vmax.f32 %v6405_v9, %v6406_v28  ;;  %v6413_v61 = vrot.slane %v6412_v49, 1 }
 0x538   : > { %v6625_v32 = vmul.f32 %v11546_v15, %v6602_v42  ;;  %v6626_v44 = vmul.f32 %v11546_v15, %v6603_v27  ;;  %v6420_v40 = vrot.slane %v6419_v5, 1  ;;  %v6426_v21 = vmax.f32 %v6424_v56, %v6425_v39 }
 0x539   : > { %v6627_v30 = vmul.f32 %v11546_v15, %v6604_v52  ;;  %v6647_v7 = vadd.f32 %v11554_v62, %v6624_v3  ;;  %v6414_v16 = vmax.f32 %v6412_v49, %v6413_v61  ;;  %v6597_v46 = vmax.f32 %v11509_v0, %v6407_v26 }
 0x53a   : > { %v6648_v13 = vadd.f32 %v11554_v62, %v6625_v32  ;;  %v6649_v10 = vadd.f32 %v11554_v62, %v6626_v44  ;;  %v6421_v60 = vmax.f32 %v6419_v5, %v6420_v40  ;;  %v6427_v37 = vrot.slane %v6426_v21, 1 }
 0x53b   : > { %v6650_v12 = vadd.f32 %v11554_v62, %v6627_v30  ;;  %v6598_v50 = vmax.f32 %v11523_v51, %v6414_v16  ;;  %v6620_v29 = vmul.f32 %v11546_v15, %v6597_v46  ;;  %v6194_v11 = vmax.f32 %v11538_v31, 0.0 }
 0x53c   : > { %v6688_v4 = vrot.slane %v6648_v13, 7  ;;  %v6690_v23 = vrot.slane %v6649_v10, 6  ;;  %v6428_v24 = vmax.f32 %v6426_v21, %v6427_v37  ;;  %v6599_v14 = vmax.f32 %v11525_v45, %v6421_v60 }
 0x53d   : > { %v6692_v0 = vrot.slane %v6650_v12, 5  ;;  %v6621_v19 = vmul.f32 %v11546_v15, %v6598_v50  ;;  %v6643_v17 = vadd.f32 %v11554_v62, %v6620_v29  ;;  %v6306_v8 = vcombine.high %v6194_v11, %v6194_v11 }
 0x53e   : > { %v6689_v53 = vsel %vm5100_vm5, %v6688_v4, %v6647_v7  ;;  %v6600_v20 = vmax.f32 %v11531_v55, %v6428_v24  ;;  %v6622_v51 = vmul.f32 %v11546_v15, %v6599_v14  ;;  %v6313_v48 = vrot.slane %v6194_v11, %v10441_v63 }
 0x53f   : > { %v6691_v31 = vsel %vm5103_vm6, %v6690_v23, %v6689_v53  ;;  %v6644_v57 = vadd.f32 %v11554_v62, %v6621_v19  ;;  %v6320_v45 = vrot.slane %v6306_v8, %v10441_v63  ;;  %v6184_v59 = vadd.f32 %v11475_v36, %v11497_v25 }
 0x540   : > { %v6693_v38 = vsel %vm5106_vm7, %v6692_v0, %v6691_v31  ;;  %v6623_v54 = vmul.f32 %v11546_v15, %v6600_v20  ;;  %v6645_v1 = vadd.f32 %v11554_v62, %v6622_v51  ;;  %v6321_v55 = vcombine.high %v6313_v48, %v6313_v48 }
 0x541   : > { %6713 = vst.msk [vmem:[#allocation3 + $0x11] sm:$0xf] %vm6711_vm15, %v6693_v38  ;;  %v6682_v43 = vrot.slane %v6644_v57, 7  ;;  %v6322_v58 = vcombine.high %v6320_v45, %v6320_v45  ;;  %v6541_v9 = vsel %vm6372_vm14, %v6313_v48, -inf  ;;  %v6555_v35 = vsel %vm6372_vm14, %v6320_v45, -inf }
 0x542   : > { %v6646_v34 = vadd.f32 %v11554_v62, %v6623_v54  ;;  %v6684_v2 = vrot.slane %v6645_v1, 6  ;;  %v6542_v22 = vrot.slane %v6541_v9, 4  ;;  %v6548_v25 = vsel %vm6372_vm14, %v6321_v55, -inf }
 0x543   : > { %v6683_v56 = vsel %vm5100_vm5, %v6682_v43, %v6643_v17  ;;  %v6549_v41 = vrot.slane %v6548_v25, 4  ;;  %v6556_v33 = vrot.slane %v6555_v35, 4  ;;  %v6562_v28 = vsel %vm6372_vm14, %v6322_v58, -inf }
 0x544   : > { %v6685_v49 = vsel %vm5103_vm6, %v6684_v2, %v6683_v56  ;;  %v6686_v42 = vrot.slane %v6646_v34, 5  ;;  %v6543_v27 = vmax.f32 %v6541_v9, %v6542_v22  ;;  %v6563_v5 = vrot.slane %v6562_v28, 4 }
 0x545   : > { %v6550_v39 = vmax.f32 %v6548_v25, %v6549_v41  ;;  %v6557_v52 = vmax.f32 %v6555_v35, %v6556_v33  ;;  %v6192_v3 = vmax.f32 %v6184_v59, 0.0  ;;  %v6187_v26 = vadd.f32 %v11499_v18, %v11475_v36 }
 0x546   : > { %v6687_v61 = vsel %vm5106_vm7, %v6686_v42, %v6685_v49  ;;  %v6544_v32 = vrot.slane %v6543_v27, 2  ;;  %v6564_v44 = vmax.f32 %v6562_v28, %v6563_v5  ;;  %v6185_v10 = vadd.f32 %v11475_v36, %v11504_v47 }
 0x547   : > { %6712 = vst.msk [vmem:[#allocation3 + $0x9] sm:$0xf] %vm6711_vm15, %v6687_v61  ;;  %v6551_v40 = vrot.slane %v6550_v39, 2  ;;  %v6558_v21 = vrot.slane %v6557_v52, 2  ;;  %v6272_v30 = vcombine.high %v6192_v3, %v6192_v3  ;;  %v6279_v7 = vrot.slane %v6192_v3, %v10441_v63 }
 0x548   : > { %v6545_v16 = vmax.f32 %v6543_v27, %v6544_v32  ;;  %v6565_v46 = vrot.slane %v6564_v44, 2  ;;  %v6195_v13 = vmax.f32 %v6187_v26, 0.0  ;;  %v6193_v19 = vmax.f32 %v6185_v10, 0.0 }
 0x549   : > { %v6552_v60 = vmax.f32 %v6550_v39, %v6551_v40  ;;  %v6559_v37 = vmax.f32 %v6557_v52, %v6558_v21  ;;  %v6286_v18 = vrot.slane %v6272_v30, %v10441_v63  ;;  %v6287_v12 = vcombine.high %v6279_v7, %v6279_v7 }
 0x54a   : > { %v6546_v50 = vrot.slane %v6545_v16, 1  ;;  %v6485_v29 = vsel %vm6372_vm14, %v6279_v7, -inf  ;;  %v6323_v23 = vcombine.high %v6195_v13, %v6195_v13  ;;  %v6566_v24 = vmax.f32 %v6564_v44, %v6565_v46 }
 0x54b   : > { %v6288_v11 = vcombine.high %v6286_v18, %v6286_v18  ;;  %v6486_v4 = vrot.slane %v6485_v29, 4  ;;  %v6492_v14 = vsel %vm6372_vm14, %v6287_v12, -inf  ;;  %v6499_v0 = vsel %vm6372_vm14, %v6286_v18, -inf }
 0x54c   : > { %v6553_v17 = vrot.slane %v6552_v60, 1  ;;  %v6560_v8 = vrot.slane %v6559_v37, 1  ;;  %v6493_v47 = vrot.slane %v6492_v14, 4  ;;  %v11603_v53 = vmax.f32 %v6545_v16, %v6546_v50 }
 0x54d   : > { %v6487_v36 = vmax.f32 %v6485_v29, %v6486_v4  ;;  %v6500_v20 = vrot.slane %v6499_v0, 4  ;;  %v6506_v51 = vsel %vm6372_vm14, %v6288_v11, -inf  ;;  %v6330_v48 = vrot.slane %v6195_v13, %v10441_v63 }
 0x54e   : > { %v6494_v57 = vmax.f32 %v6492_v14, %v6493_v47  ;;  %v6507_v45 = vrot.slane %v6506_v51, 4  ;;  %v6337_v59 = vrot.slane %v6323_v23, %v10441_v63  ;;  %v6567_v38 = vrot.slane %v6566_v24, 1 }
 0x54f   : > { %v6488_v31 = vrot.slane %v6487_v36, 2  ;;  %v6501_v54 = vmax.f32 %v6499_v0, %v6500_v20  ;;  %v6338_v1 = vcombine.high %v6330_v48, %v6330_v48  ;;  %v6569_v55 = vsel %vm6372_vm14, %v6330_v48, -inf }
 0x550   : > { %v6495_v58 = vrot.slane %v6494_v57, 2  ;;  %v6508_v9 = vmax.f32 %v6506_v51, %v6507_v45  ;;  %v6339_v35 = vcombine.high %v6337_v59, %v6337_v59  ;;  %v6570_v2 = vrot.slane %v6569_v55, 4 }
 0x551   : > { %v6489_v43 = vmax.f32 %v6487_v36, %v6488_v31  ;;  %v6502_v34 = vrot.slane %v6501_v54, 2  ;;  %v6576_v22 = vsel %vm6372_vm14, %v6338_v1, -inf  ;;  %v6583_v25 = vsel %vm6372_vm14, %v6337_v59, -inf }
 0x552   : > { %v6554_v56 = vmax.f32 %v6552_v60, %v6553_v17  ;;  %v11611_v33 = vmax.f32 %v6494_v57, %v6495_v58  ;;  %v6577_v28 = vrot.slane %v6576_v22, 4  ;;  %v6509_v49 = vrot.slane %v6508_v9, 2 }
 0x553   : > { %v6490_v41 = vrot.slane %v6489_v43, 1  ;;  %v6571_v42 = vmax.f32 %v6569_v55, %v6570_v2  ;;  %v6584_v27 = vrot.slane %v6583_v25, 4  ;;  %v6590_v5 = vsel %vm6372_vm14, %v6339_v35, -inf }
 0x554   : > { %v6561_v39 = vmax.f32 %v6559_v37, %v6560_v8  ;;  %v11614_v52 = vmax.f32 %v6501_v54, %v6502_v34  ;;  %v6578_v3 = vmax.f32 %v6576_v22, %v6577_v28  ;;  %v6289_v26 = vcombine.high %v6193_v19, %v6193_v19 }
 0x555   : > { %v6568_v61 = vmax.f32 %v6566_v24, %v6567_v38  ;;  %v6572_v32 = vrot.slane %v6571_v42, 2  ;;  %v6585_v44 = vmax.f32 %v6583_v25, %v6584_v27  ;;  %v6591_v40 = vrot.slane %v6590_v5, 4 }
 0x556   : > { %v11616_v21 = vmax.f32 %v6489_v43, %v6490_v41  ;;  %v6497_v30 = vrot.slane %v11611_v33, 1  ;;  %v6579_v7 = vrot.slane %v6578_v3, 2  ;;  %v6296_v16 = vrot.slane %v6193_v19, %v10441_v63 }
 0x557   : > { %v11620_v46 = vmax.f32 %v6508_v9, %v6509_v49  ;;  %v6573_v13 = vmax.f32 %v6571_v42, %v6572_v32  ;;  %v6586_v10 = vrot.slane %v6585_v44, 2  ;;  %v6592_v60 = vmax.f32 %v6590_v5, %v6591_v40 }
 0x558   : > { %v6504_v37 = vrot.slane %v11614_v52, 1  ;;  %v6580_v18 = vmax.f32 %v6578_v3, %v6579_v7  ;;  %v6303_v12 = vrot.slane %v6289_v26, %v10441_v63  ;;  %v6304_v50 = vcombine.high %v6296_v16, %v6296_v16 }
 0x559   : > { %v6574_v29 = vrot.slane %v6573_v13, 1  ;;  %v6587_v11 = vmax.f32 %v6585_v44, %v6586_v10  ;;  %v6593_v4 = vrot.slane %v6592_v60, 2  ;;  %v6513_v23 = vsel %vm6372_vm14, %v6296_v16, -inf }
 0x55a   : > { %v6581_v24 = vrot.slane %v6580_v18, 1  ;;  %v6305_v14 = vcombine.high %v6303_v12, %v6303_v12  ;;  %v6514_v0 = vrot.slane %v6513_v23, 4  ;;  %v6520_v19 = vsel %vm6372_vm14, %v6304_v50, -inf }
 0x55b   : > { %v6575_v17 = vmax.f32 %v6573_v13, %v6574_v29  ;;  %v6588_v8 = vrot.slane %v6587_v11, 1  ;;  %v6594_v36 = vmax.f32 %v6592_v60, %v6593_v4  ;;  %v6521_v47 = vrot.slane %v6520_v19, 4 }
 0x55c   : > { %v6582_v20 = vmax.f32 %v6580_v18, %v6581_v24  ;;  %v6515_v51 = vmax.f32 %v6513_v23, %v6514_v0  ;;  %v6527_v48 = vsel %vm6372_vm14, %v6303_v12, -inf  ;;  %v6534_v31 = vsel %vm6372_vm14, %v6305_v14, -inf }
 0x55d   : > { %v6589_v57 = vmax.f32 %v6587_v11, %v6588_v8  ;;  %v6595_v45 = vrot.slane %v6594_v36, 1  ;;  %v6609_v59 = vmax.f32 %v11603_v53, %v6575_v17  ;;  %v6522_v38 = vmax.f32 %v6520_v19, %v6521_v47 }
 0x55e   : > { %v6610_v54 = vmax.f32 %v6554_v56, %v6582_v20  ;;  %v6516_v1 = vrot.slane %v6515_v51, 2  ;;  %v6528_v55 = vrot.slane %v6527_v48, 4  ;;  %v6535_v43 = vrot.slane %v6534_v31, 4 }
 0x55f   : > { %v6596_v58 = vmax.f32 %v6594_v36, %v6595_v45  ;;  %v6611_v9 = vmax.f32 %v6561_v39, %v6589_v57  ;;  %v6632_v35 = vmul.f32 %v11546_v15, %v6609_v59  ;;  %v6523_v34 = vrot.slane %v6522_v38, 2 }
 0x560   : > { %v6633_v2 = vmul.f32 %v11546_v15, %v6610_v54  ;;  %v6517_v22 = vmax.f32 %v6515_v51, %v6516_v1  ;;  %v6529_v25 = vmax.f32 %v6527_v48, %v6528_v55  ;;  %v6536_v41 = vmax.f32 %v6534_v31, %v6535_v43  ;;  %v9603_v54 = vld [vmem:[#allocation3 + $0x1] ss:$8 sps:$4 sm:$0xff]  }
 0x561   : > { %v6511_v28 = vrot.slane %v11620_v46, 1  ;;  %v6612_v49 = vmax.f32 %v6568_v61, %v6596_v58  ;;  %v6634_v53 = vmul.f32 %v11546_v15, %v6611_v9  ;;  %v6524_v42 = vmax.f32 %v6522_v38, %v6523_v34  ;;  %v9607_v58 = vld [vmem:[#allocation3] ss:$8 sps:$4 sm:$0xff]  }
 0x562   : > { %v6656_v56 = vadd.f32 %v11554_v62, %v6633_v2  ;;  %v6518_v27 = vrot.slane %v6517_v22, 1  ;;  %v6530_v5 = vrot.slane %v6529_v25, 2  ;;  %v6537_v3 = vrot.slane %v6536_v41, 2  ;;  %v9609_v9 = vld [vmem:[%s11882_s9 + $0x20] sm:$0xff]   ;;  %v9610_v34 = vld [vmem:[%s11882_s9 + $0x28] sm:$0xff]  }
 0x563   : > { %v6635_v39 = vmul.f32 %v11546_v15, %v6612_v49  ;;  %v6655_v26 = vadd.f32 %v11554_v62, %v6632_v35  ;;  %v6657_v32 = vadd.f32 %v11554_v62, %v6634_v53  ;;  %v6525_v44 = vrot.slane %v6524_v42, 1  ;;  %v9615_v53 = vld [vmem:[#allocation3 + $0x8] ss:$8 sps:$4 sm:$0xff]  }
 0x564   : > { %v6700_v40 = vrot.slane %v6656_v56, 7  ;;  %v6519_v7 = vmax.f32 %v6517_v22, %v6518_v27  ;;  %v6531_v16 = vmax.f32 %v6529_v25, %v6530_v5  ;;  %v6538_v13 = vmax.f32 %v6536_v41, %v6537_v3  ;;  %v9611_v22 = vld [vmem:[#allocation3 + $0x2] ss:$8 sps:$4 sm:$0xff]   ;;  %v9613_v25 = vld [vmem:[%s11882_s9 + $0x30] sm:$0xff]  }
 0x565   : > { %v6498_v61 = vmax.f32 %v11611_v33, %v6497_v30  ;;  %v6658_v10 = vadd.f32 %v11554_v62, %v6635_v39  ;;  %v6702_v60 = vrot.slane %v6657_v32, 6  ;;  %v6526_v18 = vmax.f32 %v6524_v42, %v6525_v44  ;;  %v9617_v42 = vld [vmem:[%s11882_s9 + $0x40] sm:$0xff]   ;;  %v9618_v27 = vld [vmem:[%s11882_s9 + $0x48] sm:$0xff]   ;;  %v9621_v39 = vld [vmem:[%s11882_s9 + $0x50] sm:$0xff]  }
 0x566   : > { %v6701_v12 = vsel %vm5100_vm5, %v6700_v40, %v6655_v26  ;;  %v6532_v50 = vrot.slane %v6531_v16, 1  ;;  %v6539_v29 = vrot.slane %v6538_v13, 1  ;;  %v6605_v11 = vmax.f32 %v11616_v21, %v6519_v7  ;;  %v9619_v3 = vld [vmem:[#allocation3 + $0x9] ss:$8 sps:$4 sm:$0xff]   ;;  %v9622_v32 = vld [vmem:[%s11882_s9 + $0x58] sm:$0xff]   ;;  %v9625_v7 = vld [vmem:[%s11882_s9 + $0x60] sm:$0xff]  }
 0x567   : > { %v6703_v4 = vsel %vm5103_vm6, %v6702_v60, %v6701_v12  ;;  %v6704_v23 = vrot.slane %v6658_v10, 5  ;;  %v6606_v24 = vmax.f32 %v6498_v61, %v6526_v18  ;;  %v6505_v14 = vmax.f32 %v11614_v52, %v6504_v37  ;;  %v9623_v40 = vld [vmem:[#allocation3 + $0xa] ss:$8 sps:$4 sm:$0xff]   ;;  %v9630_v12 = vld [vmem:[%s11882_s9 + $0x78] sm:$0xff]  }
 0x568   : > { %v6512_v33 = vmax.f32 %v11620_v46, %v6511_v28  ;;  %v6533_v30 = vmax.f32 %v6531_v16, %v6532_v50  ;;  %v6540_v0 = vmax.f32 %v6538_v13, %v6539_v29  ;;  %v6628_v17 = vmul.f32 %v11546_v15, %v6605_v11  ;;  %v9614_v28 = vld [vmem:[%s11882_s9 + $0x38] sm:$0xff]   ;;  %v9626_v13 = vld [vmem:[%s11882_s9 + $0x68] sm:$0xff]   ;;  %v9629_v60 = vld [vmem:[%s11882_s9 + $0x70] sm:$0xff]  }
 0x569   : > { %v6705_v19 = vsel %vm5106_vm7, %v6704_v23, %v6703_v4  ;;  %v6629_v8 = vmul.f32 %v11546_v15, %v6606_v24  ;;  %v9633_v11 = vld [vmem:[%s11882_s9 + $0x80] sm:$0xff]   ;;  %v9634_v23 = vld [vmem:[%s11882_s9 + $0x88] sm:$0xff]  }
 0x56a   : > { %6715 = vst.msk [vmem:[#allocation3 + $0x21] sm:$0xf] %vm6711_vm15, %v6705_v19  ;;  %v6607_v21 = vmax.f32 %v6505_v14, %v6533_v30  ;;  %v6608_v36 = vmax.f32 %v6512_v33, %v6540_v0  ;;  %v6651_v46 = vadd.f32 %v11554_v62, %v6628_v17  ;;  %v9637_v30 = vld [vmem:[%s11886_s13 + $0x20] sm:$0xff]   ;;  %v9638_v0 = vld [vmem:[%s11886_s13 + $0x28] sm:$0xff]   ;;  %v9639_v19 = vld [vmem:[%s11886_s13 + $0x30] sm:$0xff]  }
 0x56b   : > { %v6652_v47 = vadd.f32 %v11554_v62, %v6629_v8  ;;  %v9640_v17 = vld [vmem:[%s11886_s13 + $0x38] sm:$0xff]  }
 0x56c   : > { %v6630_v20 = vmul.f32 %v11546_v15, %v6607_v21  ;;  %v6631_v52 = vmul.f32 %v11546_v15, %v6608_v36  ;;  %v9605_v15 = vld [vmem:[%s11882_s9] sm:$0xff]  }
 0x56d   : > { %v6694_v37 = vrot.slane %v6652_v47, 7 }
 0x56e   : > { %v6653_v51 = vadd.f32 %v11554_v62, %v6630_v20  ;;  %v6654_v48 = vadd.f32 %v11554_v62, %v6631_v52  ;;  %v9606_v62 = vld [vmem:[%s11882_s9 + $0x8] sm:$0xff]  }
 0x56f   : > { %v6695_v31 = vsel %vm5100_vm5, %v6694_v37, %v6651_v46  ;;  %vm7911_vm5 = vcmask 0  }
 0x570   : > { %v6696_v57 = vrot.slane %v6653_v51, 6  ;;  %v6698_v45 = vrot.slane %v6654_v48, 5 }
 0x571   : > { %v9628_v10 = vld [vmem:[#allocation3 + $0x20] ss:$8 sps:$4 sm:$0xff]  }
 0x572   : > { %v6697_v59 = vsel %vm5103_vm6, %v6696_v57, %v6695_v31  ;;  %v9632_v29 = vld [vmem:[#allocation3 + $0x21] ss:$8 sps:$4 sm:$0xff]  }
 0x573   : > { %v6699_v38 = vsel %vm5106_vm7, %v6698_v45, %v6697_v59  ;;  %v9636_v14 = vld [vmem:[#allocation3 + $0x22] ss:$8 sps:$4 sm:$0xff]  }
 0x574   : > { %6714 = vst.msk [vmem:[#allocation3 + $0x19] sm:$0xf] %vm6711_vm15, %v6699_v38 }
 0x57b   : > { %v9604_v1 = vld [vmem:[#allocation3 + $0x11] ss:$8 sps:$4 sm:$0xff]  }
 0x57c   : > { %v6745_v55 = vpack.c.bf16 %v9604_v1, %v9603_v54  ;;  %v9608_v43 = vld [vmem:[#allocation3 + $0x10] ss:$8 sps:$4 sm:$0xff]  }
 0x57d   : > { %v6728_v35 = vpack.c.bf16 %v9608_v43, %v9607_v58  ;;  %v9612_v2 = vld [vmem:[#allocation3 + $0x12] ss:$8 sps:$4 sm:$0xff]  }
 0x57e   : > { %9136 = vmatmul.mubr.msk.bf16.vlgmr.msra.gmra.mrb[40].mxu1 %vm6763_vm0, %v6745_v55  ;;  %v6876_v41 = vpack.c.bf16 %v9612_v2, %v9611_v22  ;;  %v9616_v49 = vld [vmem:[#allocation3 + $0x18] ss:$8 sps:$4 sm:$0xff]  }
 0x57f   : > { %9140 = vmatpush3.bf16.msra.mxu1 %v9605_v15  ;;  %9143 = vmatprep.mubr.msk.bf16.mxu1 %vm9675_vm13, %v11925_v6  ;;  %v6952_v56 = vpack.c.bf16 %v9616_v49, %v9615_v53  ;;  %v9620_v5 = vld [vmem:[#allocation3 + $0x19] ss:$8 sps:$4 sm:$0xff]  }
 0x580   : > { %9141 = vmatprep.subr.bf16.mxu1 %v11925_v6  ;;  %v7028_v26 = vpack.c.bf16 %v9620_v5, %v9619_v3  ;;  %v9624_v44 = vld [vmem:[#allocation3 + $0x1a] ss:$8 sps:$4 sm:$0xff]  }
 0x581   : > { %v7104_v16 = vpack.c.bf16 %v9624_v44, %v9623_v40  ;;  %v9627_v61 = vld [vmem:[#allocation3 + $0x10] ss:$8 sps:$4 sm:$0xff]  }
 0x582   : > { %v7181_v18 = vpack.c.bf16 %v9628_v10, %v9627_v61  ;;  %v9631_v50 = vld [vmem:[#allocation3 + $0x11] ss:$8 sps:$4 sm:$0xff]  }
 0x583   : > { %9142 = vmatpush3.bf16.msra.mxu1 %v9606_v62  ;;  %v7257_v4 = vpack.c.bf16 %v9632_v29, %v9631_v50  ;;  %v9635_v24 = vld [vmem:[#allocation3 + $0x12] ss:$8 sps:$4 sm:$0xff]  }
 0x584   : > { %9147 = vmatprep.subr.bf16.mxu1 %v11925_v6  ;;  %v7333_v33 = vpack.c.bf16 %v9636_v14, %v9635_v24 }
 0x586   : > { %9144 = vmatmul.mubr.msk.bf16.vlgmr.msra.gmra.mrb[44].mxu1 %vm6763_vm0, %v6728_v35 }
 0x587   : > { %9148 = vmatpush3.bf16.msra.mxu1 %v9609_v9  ;;  %9151 = vmatprep.mubr.msk.bf16.mxu1 %vm9675_vm13, %v11925_v6 }
 0x588   : > { %9149 = vmatprep.subr.bf16.mxu1 %v11925_v6 }
 0x58b   : > { %9150 = vmatpush3.bf16.msra.mxu1 %v9610_v34 }
 0x58c   : > { %9155 = vmatprep.subr.bf16.mxu1 %v11925_v6 }
 0x58e   : > { %9152 = vmatmul.mubr.msk.bf16.vlgmr.msra.gmra.mrb[48].mxu1 %vm6763_vm0, %v6876_v41 }
 0x58f   : > { %9156 = vmatpush3.bf16.msra.mxu1 %v9613_v25  ;;  %9159 = vmatprep.mubr.msk.bf16.mxu1 %vm9675_vm13, %v11925_v6 }
 0x590   : > { %9157 = vmatprep.subr.bf16.mxu1 %v11925_v6 }
 0x593   : > { %9158 = vmatpush3.bf16.msra.mxu1 %v9614_v28 }
 0x594   : > { %9163 = vmatprep.subr.bf16.mxu1 %v11925_v6 }
 0x596   : > { %9160 = vmatmul.mubr.msk.bf16.vlgmr.msra.gmra.mrb[52].mxu1 %vm6763_vm0, %v6952_v56 }
 0x597   : > { %9164 = vmatpush3.bf16.msra.mxu1 %v9617_v42  ;;  %9167 = vmatprep.mubr.msk.bf16.mxu1 %vm9675_vm13, %v11925_v6 }
 0x598   : > { %9165 = vmatprep.subr.bf16.mxu1 %v11925_v6 }
 0x59b   : > { %9166 = vmatpush3.bf16.msra.mxu1 %v9618_v27 }
 0x59c   : > { %9171 = vmatprep.subr.bf16.mxu1 %v11925_v6 }
 0x59e   : > { %9168 = vmatmul.mubr.msk.bf16.vlgmr.msra.gmra.mrb[56].mxu1 %vm6763_vm0, %v7028_v26 }
 0x59f   : > { %9172 = vmatpush3.bf16.msra.mxu1 %v9621_v39  ;;  %9175 = vmatprep.mubr.msk.bf16.mxu1 %vm9675_vm13, %v11925_v6 }
 0x5a0   : > { %9173 = vmatprep.subr.bf16.mxu1 %v11925_v6 }
 0x5a3   : > { %9174 = vmatpush3.bf16.msra.mxu1 %v9622_v32 }
 0x5a4   : > { %9179 = vmatprep.subr.bf16.mxu1 %v11925_v6 }
 0x5a6   : > { %9176 = vmatmul.mubr.msk.bf16.vlgmr.msra.gmra.mrb[60].mxu1 %vm6763_vm0, %v7104_v16 }
 0x5a7   : > { %9180 = vmatpush3.bf16.msra.mxu1 %v9625_v7  ;;  %9183 = vmatprep.mubr.msk.bf16.mxu1 %vm9675_vm13, %v11925_v6 }
 0x5a8   : > { %9181 = vmatprep.subr.bf16.mxu1 %v11925_v6 }
 0x5ab   : > { %9182 = vmatpush3.bf16.msra.mxu1 %v9626_v13 }
 0x5ac   : > { %9187 = vmatprep.subr.bf16.mxu1 %v11925_v6 }
 0x5ae   : > { %9184 = vmatmul.mubr.msk.bf16.vlgmr.msra.gmra.mrb[64].mxu1 %vm6763_vm0, %v7181_v18 }
 0x5af   : > { %9188 = vmatpush3.bf16.msra.mxu1 %v9629_v60  ;;  %9191 = vmatprep.mubr.msk.bf16.mxu1 %vm9675_vm13, %v11925_v6  ;;  %v8436_v60 = vld [vmem:[%s11883_s10] ss:$0 sm:$0xff] }
 0x5b0   : > { %9189 = vmatprep.subr.bf16.mxu1 %v11925_v6 }
 0x5b3   : > { %9190 = vmatpush3.bf16.msra.mxu1 %v9630_v12 }
 0x5b4   : > { %9195 = vmatprep.subr.bf16.mxu1 %v11925_v6 }
 0x5b6   : > { %9192 = vmatmul.mubr.msk.bf16.vlgmr.msra.gmra.mrb[68].mxu1 %vm6763_vm0, %v7257_v4 }
 0x5b7   : > { %9196 = vmatpush3.bf16.msra.mxu1 %v9633_v11  ;;  %9199 = vmatprep.mubr.msk.bf16.mxu1 %vm9675_vm13, %v11925_v6 }
 0x5b8   : > { %9197 = vmatprep.subr.bf16.mxu1 %v11925_v6 }
 0x5bb   : > { %9198 = vmatpush3.bf16.msra.mxu1 %v9634_v23 }
 0x5bc   : > { %9203 = vmatprep.subr.bf16.mxu1 %v11925_v6 }
 0x5be   : > { %9200 = vmatmul.mubr.msk.bf16.vlgmr.msra.gmra.mrb[72].mxu1 %vm6763_vm0, %v7333_v33 }
 0x5bf   : > { %9211 = vmatprep.mubr.msk.bf16.mxu1 %vm9675_vm13, %v11925_v6  ;;  %9204 = vmatpush3.bf16.msra.mxu1 %v9637_v30 }
 0x5c0   : > { %9205 = vmatprep.subr.bf16.mxu1 %v11925_v6 }
 0x5c3   : > { %9206 = vmatpush3.bf16.msra.mxu1 %v9638_v0 }
 0x5c4   : > { %9207 = vmatprep.subr.bf16.mxu1 %v11925_v6 }
 0x5c7   : > { %9208 = vmatpush3.bf16.msra.mxu1 %v9639_v19 }
 0x5c8   : > { %9209 = vmatprep.subr.bf16.mxu1 %v11925_v6 }
 0x5cb   : > { %9210 = vmatpush3.bf16.msra.mxu1 %v9640_v17 }
 0x5cc   : > { %9215 = vmatprep.subr.bf16.mxu1 %v11925_v6 }
 0x651   : > { %v6801_v8 = vpop.f32.mrb[40].mxu1 }
 0x652   : > { %v9137_v21 = vpop.f32.mrb[41].mxu1 }
 0x653   : > { %v6804_v36 = vpop.f32.mrb[42].mxu1 }
 0x654   : > { %v9138_v47 = vpop.f32.mrb[43].mxu1 }
 0x659   : > { %v6857_v20 = vpop.f32.mrb[44].mxu1 }
 0x65a   : > { %v6858_v52 = vadd.f32 %v6857_v20, %v6801_v8  ;;  %v9145_v46 = vpop.f32.mrb[45].mxu1 }
 0x65b   : > { %v6860_v37 = vpop.f32.mrb[46].mxu1 }
 0x65c   : > { %v6861_v51 = vadd.f32 %v6860_v37, %v6804_v36  ;;  %v9146_v48 = vpop.f32.mrb[47].mxu1 }
 0x661   : > { %v6931_v31 = vpop.f32.mrb[48].mxu1 }
 0x662   : > { %v6938_v57 = vadd.f32 %v6931_v31, %v6858_v52  ;;  %v9153_v45 = vpop.f32.mrb[49].mxu1 }
 0x663   : > { %v6934_v59 = vpop.f32.mrb[50].mxu1 }
 0x664   : > { %v6939_v38 = vadd.f32 %v6934_v59, %v6861_v51  ;;  %v9154_v54 = vpop.f32.mrb[51].mxu1 }
 0x669   : > { %v7007_v1 = vpop.f32.mrb[52].mxu1 }
 0x66a   : > { %v7014_v15 = vadd.f32 %v7007_v1, %v6938_v57  ;;  %v9161_v55 = vpop.f32.mrb[53].mxu1 }
 0x66b   : > { %v7010_v62 = vpop.f32.mrb[54].mxu1 }
 0x66c   : > { %v7015_v43 = vadd.f32 %v7010_v62, %v6939_v38  ;;  %v9162_v58 = vpop.f32.mrb[55].mxu1 }
 0x671   : > { %v7083_v9 = vpop.f32.mrb[56].mxu1 }
 0x672   : > { %v7090_v35 = vadd.f32 %v7083_v9, %v7014_v15  ;;  %v9169_v34 = vpop.f32.mrb[57].mxu1 }
 0x673   : > { %v7086_v2 = vpop.f32.mrb[58].mxu1 }
 0x674   : > { %v7091_v22 = vadd.f32 %v7086_v2, %v7015_v43  ;;  %v9170_v25 = vpop.f32.mrb[59].mxu1 }
 0x679   : > { %v7159_v41 = vpop.f32.mrb[60].mxu1 }
 0x67a   : > { %v7166_v28 = vadd.f32 %v7159_v41, %v7090_v35  ;;  %v9177_v49 = vpop.f32.mrb[61].mxu1 }
 0x67b   : > { %v7162_v53 = vpop.f32.mrb[62].mxu1  ;;  %v11783_v49 = vld [vmem:[%s11884_s11] ss:$0 sm:$0xff] }
 0x67c   : > { %v7167_v42 = vadd.f32 %v7162_v53, %v7091_v22  ;;  %v9178_v56 = vpop.f32.mrb[63].mxu1 }
 0x681   : > { %v7236_v27 = vpop.f32.mrb[64].mxu1 }
 0x682   : > { %v7243_v5 = vadd.f32 %v7236_v27, %v7166_v28  ;;  %v9185_v3 = vpop.f32.mrb[65].mxu1 }
 0x683   : > { %v7239_v39 = vpop.f32.mrb[66].mxu1 }
 0x684   : > { %v7244_v26 = vadd.f32 %v7239_v39, %v7167_v42  ;;  %v9186_v32 = vpop.f32.mrb[67].mxu1  ;;  %v9641_v39 = vld [vmem:[%s11886_s13] sm:$0xff]  }
 0x689   : > { %v7312_v44 = vpop.f32.mrb[68].mxu1 }
 0x68a   : > { %v7319_v40 = vadd.f32 %v7312_v44, %v7243_v5  ;;  %v9193_v7 = vpop.f32.mrb[69].mxu1 }
 0x68b   : > { %v7315_v16 = vpop.f32.mrb[70].mxu1 }
 0x68c   : > { %v7320_v13 = vadd.f32 %v7315_v16, %v7244_v26  ;;  %v9194_v61 = vpop.f32.mrb[71].mxu1  ;;  %v9642_v16 = vld [vmem:[%s11886_s13 + $0x8] sm:$0xff]  }
 0x691   : > { %v7388_v10 = vpop.f32.mrb[72].mxu1 }
 0x692   : > { %v7395_v18 = vadd.f32 %v7388_v10, %v7319_v40  ;;  %v9201_v12 = vpop.f32.mrb[73].mxu1 }
 0x693   : > { %v7391_v50 = vpop.f32.mrb[74].mxu1  ;;  %v9643_v12 = vld [vmem:[%s11886_s13 + $0x10] sm:$0xff]  }
 0x694   : > { %v7404_v29 = vadd.f32 %v8436_v60, %v7395_v18  ;;  %v7396_v11 = vadd.f32 %v7391_v50, %v7320_v13  ;;  %v9202_v4 = vpop.f32.mrb[75].mxu1 }
 0x696   : > { %v7406_v23 = vmax.f32 %v7404_v29, 0.0  ;;  %v7405_v0 = vadd.f32 %v8436_v60, %v7396_v11 }
 0x698   : > { %v7410_v24 = vcombine.high %v7406_v23, %v7406_v23  ;;  %v7417_v14 = vrot.slane %v7406_v23, %v10441_v63  ;;  %v7407_v52 = vmax.f32 %v7405_v0, 0.0 }
 0x69a   : > { %v7424_v33 = vrot.slane %v7410_v24, %v10441_v63  ;;  %v7425_v30 = vcombine.high %v7417_v14, %v7417_v14  ;;  %v7453_v17 = vsel %vm7452_vm1, %v7417_v14, -inf  ;;  %v7427_v45 = vcombine.high %v7407_v52, %v7407_v52  ;;  %v9644_v24 = vld [vmem:[%s11886_s13 + $0x18] sm:$0xff]  }
 0x69b   : > { %v7454_v46 = vrot.slane %v7453_v17, 4  ;;  %v7434_v9 = vrot.slane %v7407_v52, %v10441_v63  ;;  %v9646_v52 = vld [vmem:[%s11886_s13 + $0x48] sm:$0xff]  }
 0x69c   : > { %v7426_v19 = vcombine.high %v7424_v33, %v7424_v33  ;;  %v7460_v8 = vsel %vm7452_vm1, %v7425_v30, -inf  ;;  %v7467_v21 = vsel %vm7452_vm1, %v7424_v33, -inf  ;;  %v7441_v62 = vrot.slane %v7427_v45, %v10441_v63  ;;  %v11789_v63 = vld [vmem:[%s11885_s12] ss:$0 sm:$0xff] }
 0x69d   : > { %v7461_v36 = vrot.slane %v7460_v8, 4  ;;  %v7468_v47 = vrot.slane %v7467_v21, 4  ;;  %v7455_v59 = vmax.f32 %v7453_v17, %v7454_v46  ;;  %v7481_v28 = vsel %vm7452_vm1, %v7434_v9, -inf  ;;  %v9645_v17 = vld [vmem:[%s11886_s13 + $0x40] sm:$0xff]  }
 0x69e   : > { %v7474_v20 = vsel %vm7452_vm1, %v7426_v19, -inf  ;;  %v7495_v22 = vsel %vm7452_vm1, %v7441_v62, -inf  ;;  %v7482_v5 = vrot.slane %v7481_v28, 4  ;;  %v7443_v10 = vcombine.high %v7441_v62, %v7441_v62 }
 0x69f   : > { %v7462_v37 = vmax.f32 %v7460_v8, %v7461_v36  ;;  %v7475_v51 = vrot.slane %v7474_v20, 4  ;;  %v7469_v31 = vmax.f32 %v7467_v21, %v7468_v47  ;;  %v7456_v43 = vrot.slane %v7455_v59, 2 }
 0x6a0   : > { %v7496_v42 = vrot.slane %v7495_v22, 4  ;;  %v7483_v7 = vmax.f32 %v7481_v28, %v7482_v5  ;;  %v7442_v18 = vcombine.high %v7434_v9, %v7434_v9  ;;  %v7502_v11 = vsel %vm7452_vm1, %v7443_v10, -inf }
 0x6a1   : > { %v7463_v48 = vrot.slane %v7462_v37, 2  ;;  %v7476_v57 = vmax.f32 %v7474_v20, %v7475_v51  ;;  %v7470_v15 = vrot.slane %v7469_v31, 2  ;;  %v7457_v25 = vmax.f32 %v7455_v59, %v7456_v43  ;;  %v9648_v59 = vld [vmem:[%s11886_s13 + $0x58] sm:$0xff]  }
 0x6a2   : > { %v7497_v32 = vmax.f32 %v7495_v22, %v7496_v42  ;;  %v7484_v60 = vrot.slane %v7483_v7, 2  ;;  %v7488_v23 = vsel %vm7452_vm1, %v7442_v18, -inf  ;;  %v7503_v33 = vrot.slane %v7502_v11, 4 }
 0x6a3   : > { %v7464_v38 = vmax.f32 %v7462_v37, %v7463_v48  ;;  %v7477_v54 = vrot.slane %v7476_v57, 2  ;;  %v7471_v34 = vmax.f32 %v7469_v31, %v7470_v15  ;;  %v7458_v27 = vrot.slane %v7457_v25, 1  ;;  %v9647_v48 = vld [vmem:[%s11886_s13 + $0x50] sm:$0xff]   ;;  %v9649_v15 = vld [vmem:[%s11886_s13 + $0x60] sm:$0xff]  }
 0x6a4   : > { %v7498_v61 = vrot.slane %v7497_v32, 2  ;;  %v7485_v4 = vmax.f32 %v7483_v7, %v7484_v60  ;;  %v7489_v19 = vrot.slane %v7488_v23, 4  ;;  %v7504_v21 = vmax.f32 %v7502_v11, %v7503_v33 }
 0x6a5   : > { %v7465_v1 = vrot.slane %v7464_v38, 1  ;;  %v7478_v55 = vmax.f32 %v7476_v57, %v7477_v54  ;;  %v7472_v53 = vrot.slane %v7471_v34, 1  ;;  %v7459_v40 = vmax.f32 %v7457_v25, %v7458_v27 }
 0x6a6   : > { %v7499_v50 = vmax.f32 %v7497_v32, %v7498_v61  ;;  %v7486_v0 = vrot.slane %v7485_v4, 1  ;;  %v7490_v20 = vmax.f32 %v7488_v23, %v7489_v19  ;;  %v7505_v46 = vrot.slane %v7504_v21, 2 }
 0x6a7   : > { %v7479_v58 = vrot.slane %v7478_v55, 1  ;;  %v7466_v35 = vmax.f32 %v7464_v38, %v7465_v1  ;;  %v7473_v26 = vmax.f32 %v7471_v34, %v7472_v53 }
 0x6a8   : > { %v7500_v14 = vrot.slane %v7499_v50, 1  ;;  %v7487_v47 = vmax.f32 %v7485_v4, %v7486_v0  ;;  %v7491_v51 = vrot.slane %v7490_v20, 2  ;;  %v7506_v31 = vmax.f32 %v7504_v21, %v7505_v46 }
 0x6a9   : > { %v7480_v2 = vmax.f32 %v7478_v55, %v7479_v58  ;;  %v7509_v13 = vmax.f32 %v7459_v40, %v7473_v26  ;;  %v9650_v58 = vld [vmem:[%s11886_s13 + $0x68] sm:$0xff]  }
 0x6aa   : > { %v7501_v8 = vmax.f32 %v7499_v50, %v7500_v14  ;;  %v7492_v45 = vmax.f32 %v7490_v20, %v7491_v51  ;;  %v7507_v38 = vrot.slane %v7506_v31, 1 }
 0x6ab   : > { %v7510_v41 = vmax.f32 %v7466_v35, %v7480_v2  ;;  %v7520_v29 = vmul.f32 %v11783_v49, %v7509_v13  ;;  %v9651_v35 = vld [vmem:[%s11886_s13 + $0x70] sm:$0xff]   ;;  %v9652_v2 = vld [vmem:[%s11886_s13 + $0x78] sm:$0xff]  }
 0x6ac   : > { %v7511_v37 = vmax.f32 %v7487_v47, %v7501_v8  ;;  %v7493_v1 = vrot.slane %v7492_v45, 1  ;;  %v7508_v55 = vmax.f32 %v7506_v31, %v7507_v38 }
 0x6ad   : > { %v7521_v56 = vmul.f32 %v11783_v49, %v7510_v41  ;;  %v7531_v30 = vadd.f32 %v11789_v63, %v7520_v29  ;;  %v9653_v41 = vld [vmem:[%s11888_s15] sm:$0x1f]   ;;  %v7851_v29 = vld [vmem:[#allocation4] sm:$0x1] }
 0x6ae   : > { %v7522_v57 = vmul.f32 %v11783_v49, %v7511_v37  ;;  %v7494_v43 = vmax.f32 %v7492_v45, %v7493_v1  ;;  %v7863_v28 = vsel %vm7861_vm3, %v9653_v41, 0 }
 0x6af   : > { %v7532_v3 = vadd.f32 %v11789_v63, %v7521_v56  ;;  %v7535_v36 = vpack.c.bf16 %v7531_v30, %v7531_v30 }
 0x6b0   : > { %v7533_v54 = vadd.f32 %v11789_v63, %v7522_v57  ;;  %v7512_v9 = vmax.f32 %v7494_v43, %v7508_v55 }
 0x6b1   : > { %v7544_v44 = vpack.c.bf16 %v7532_v3, %v7532_v3 }
 0x6b2   : > { %v7689_v62 = vpack.c.bf16 %v7533_v54, %v7533_v54  ;;  %v7523_v34 = vmul.f32 %v11783_v49, %v7512_v9 }
 0x6b3   : > { %9212 = vmatmul.mubr.msk.bf16.vlgmr.msra.gmra.mrb[76].mxu1 %vm7578_vm2, %v7544_v44 }
 0x6b4   : > { %9216 = vmatpush3.bf16.msra.mxu1 %v9641_v39  ;;  %9223 = vmatprep.mubr.msk.bf16.mxu1 %vm9675_vm13, %v11925_v6  ;;  %v7534_v22 = vadd.f32 %v11789_v63, %v7523_v34 }
 0x6b5   : > { %9217 = vmatprep.subr.bf16.mxu1 %v11925_v6 }
 0x6b6   : > { %v7767_v25 = vpack.c.bf16 %v7534_v22, %v7534_v22 }
 0x6b8   : > { %9218 = vmatpush3.bf16.msra.mxu1 %v9642_v16  ;;  %v7845_v16 = vld [vmem:[%s11887_s14] sm:$0x1] }
 0x6b9   : > { %9219 = vmatprep.subr.bf16.mxu1 %v11925_v6 }
 0x6bc   : > { %9220 = vmatpush3.bf16.msra.mxu1 %v9643_v12 }
 0x6bd   : > { %9221 = vmatprep.subr.bf16.mxu1 %v11925_v6 }
 0x6c0   : > { %9222 = vmatpush3.bf16.msra.mxu1 %v9644_v24 }
 0x6c1   : > { %9227 = vmatprep.subr.bf16.mxu1 %v11925_v6 }
 0x6c3   : > { %9224 = vmatmul.mubr.msk.bf16.vlgmr.msra.gmra.mrb[80].mxu1 %vm7578_vm2, %v7535_v36 }
 0x6c4   : > { %9228 = vmatpush3.bf16.msra.mxu1 %v9645_v17  ;;  %9235 = vmatprep.mubr.msk.bf16.mxu1 %vm9675_vm13, %v11925_v6 }
 0x6c5   : > { %9229 = vmatprep.subr.bf16.mxu1 %v11925_v6 }
 0x6c8   : > { %9230 = vmatpush3.bf16.msra.mxu1 %v9646_v52 }
 0x6c9   : > { %9231 = vmatprep.subr.bf16.mxu1 %v11925_v6 }
 0x6cc   : > { %9232 = vmatpush3.bf16.msra.mxu1 %v9647_v48 }
 0x6cd   : > { %9233 = vmatprep.subr.bf16.mxu1 %v11925_v6 }
 0x6d0   : > { %9234 = vmatpush3.bf16.msra.mxu1 %v9648_v59 }
 0x6d1   : > { %9239 = vmatprep.subr.bf16.mxu1 %v11925_v6 }
 0x6d3   : > { %9236 = vmatmul.mubr.msk.bf16.vlgmr.msra.gmra.mrb[84].mxu1 %vm7578_vm2, %v7689_v62 }
 0x6d4   : > { %9240 = vmatpush3.bf16.msra.mxu1 %v9649_v15  ;;  %9247 = vmatprep.mubr.msk.bf16.mxu1 %vm9675_vm13, %v11925_v6 }
 0x6d5   : > { %9241 = vmatprep.subr.bf16.mxu1 %v11925_v6 }
 0x6d8   : > { %9242 = vmatpush3.bf16.msra.mxu1 %v9650_v58 }
 0x6d9   : > { %9243 = vmatprep.subr.bf16.mxu1 %v11925_v6 }
 0x6dc   : > { %9244 = vmatpush3.bf16.msra.mxu1 %v9651_v35 }
 0x6dd   : > { %9245 = vmatprep.subr.bf16.mxu1 %v11925_v6 }
 0x6e0   : > { %9246 = vmatpush3.bf16.msra.mxu1 %v9652_v2 }
 0x6e1   : > { %9251 = vmatprep.subr.bf16.mxu1 %v11925_v6 }
 0x6e3   : > { %9248 = vmatmul.mubr.msk.bf16.vlgmr.msra.gmra.mrb[88].mxu1 %vm7578_vm2, %v7767_v25 }
 0x6e4   : > { %9253 = vmatprep.mubr.msk.bf16.mxu1 %vm9675_vm13, %v11925_v6  ;;  %9252 = vmatpush3.bf16.msra.mxu1 %v7863_v28 }
 0x786   : > { %v7616_v49 = vpop.f32.mrb[76].mxu1 }
 0x787   : > { %v9213_v53 = vpop.f32.mrb[77].mxu1 }
 0x788   : > { %v7619_v42 = vpop.f32.mrb[78].mxu1 }
 0x789   : > { %v9214_v56 = vpop.f32.mrb[79].mxu1 }
 0x796   : > { %v7683_v63 = vpop.f32.mrb[80].mxu1 }
 0x797   : > { %v7684_v27 = vadd.f32 %v7683_v63, %v7616_v49  ;;  %v9225_v5 = vpop.f32.mrb[81].mxu1 }
 0x798   : > { %v7686_v3 = vpop.f32.mrb[82].mxu1 }
 0x799   : > { %v9226_v39 = vpop.f32.mrb[83].mxu1 }
 0x7a6   : > { %v7760_v26 = vpop.f32.mrb[84].mxu1 }
 0x7a7   : > { %v7766_v32 = vadd.f32 %v7760_v26, %v7684_v27  ;;  %v9237_v44 = vpop.f32.mrb[85].mxu1 }
 0x7a8   : > { %v7763_v6 = vpop.f32.mrb[86].mxu1 }
 0x7a9   : > { %v9238_v40 = vpop.f32.mrb[87].mxu1 }
 0x7b6   : > { %v7838_v7 = vpop.f32.mrb[88].mxu1 }
 0x7b7   : > { %v7844_v13 = vadd.f32 %v7838_v7, %v7766_v32  ;;  %v9249_v61 = vpop.f32.mrb[89].mxu1 }
 0x7b8   : > { %v7841_v10 = vpop.f32.mrb[90].mxu1 }
 0x7b9   : > { %v7846_v60 = vadd.f32 %v7845_v16, %v7844_v13  ;;  %v9250_v18 = vpop.f32.mrb[91].mxu1 }
 0x7bb   : > { %v7847_v12 = vmax.f32 %v7846_v60, 0.0 }
 0x7bd   : > { %v7848_v50 = vpack.c.bf16 %v7847_v12, %v7847_v12 }
 0x7bf   : > { %9254 = vmatmul.mubr.msk.bf16.vlgmr.msra.gmra.mrb[92].mxu1 %vm7857_vm4, %v7848_v50 }
 0x892   : > { %v7899_v11 = vpop.f32.mrb[92].mxu1 }
 0x893   : > { %v7900_v4 = vadd.f32 %v7899_v11, %v7851_v29  ;;  %v9255_v23 = vpop.f32.mrb[93].mxu1 }
 0x894   : > { %v7902_v24 = vpop.f32.mrb[94].mxu1 }
 0x895   : > { %v8485_v14 = vmul.f32 -1.442695, %v7900_v4  ;;  %v9256_v33 = vpop.f32.mrb[95].mxu1 }
 0x897   : > { %9654 = vpow2.f32 %v8485_v14 }
 0x8a1   : > { %v9655_v30 = vpop.eup %9654 }
 0x8a2   : > { %v7908_v0 = vadd.f32 1.0, %v9655_v30 }
 0x8a4   : > { %9656 = vrcp.f32 %v7908_v0 }
 0x8ae   : > { %v9657_v19 = vpop.eup %9656 }
 0x8af   : > { %7912 = vst.msk [vmem:[%s546_s0] sm:$0x1] %vm7911_vm5, %v9657_v19 }
 0x8b0 PF: > { %s29_s26 = sadd.s32 1, %s9670_s26  }
 0x8b1   : > { %p26_p4 = scmp.ge.s32.totalorder %s29_s26, 4  }
 0x8b3   :  { %28 = sbr.rel (!%p26_p4) target bundleno = 3 (0x3), region = 151 }

</bundles_post_ra>
